<compile_context>
chip_gen: v6e
topology: v6e:2x2x1
jax: 0.10.0
libtpu: 0.0.40
codegen_flags: <defaults>
</compile_context>

<pallas_src>
import functools

import jax
import jax.numpy as jnp
from jax import lax
from jax.experimental import pallas as pl
from jax.experimental.pallas import tpu as pltpu

_LANE = 128


def _mlp_kernel_t(xT_ref, w_ref, b_ref, outT_ref, *, layer_dims, chunk,
                  last_layer_vpu):
    """Fused MLP over one batch tile, batch-on-lanes (transposed) layout.

    xT_ref:   (D_in, tile_n)   features on sublanes, batch on lanes
    w_ref:    (L, Dp, Dp)      zero-padded weight slab, PyTorch (out, in)
                               orientation; the last slot is stored TRANSPOSED
                               (in, out) when last_layer_vpu is True.
    b_ref:    (L, Dp, 1)       zero-padded bias slab (broadcasts over lanes)
    outT_ref: (D_out, tile_n)
    Hidden layers apply tanh; the final layer is linear (matches PINN.forward).
    """
    num_layers = len(layer_dims) - 1
    tile_n = outT_ref.shape[-1]
    n_chunks = tile_n // chunk

    # Parameters are tiny and VMEM-resident (constant-index blocks): load the
    # slabs once per grid step and slice out each layer's real shapes.
    w_full = w_ref[...]                                   # (L, Dp, Dp)
    b_full = b_ref[...]                                   # (L, Dp, 1)
    ws, bs = [], []
    for i in range(num_layers):
        d_in, d_out = layer_dims[i], layer_dims[i + 1]
        if last_layer_vpu and i == num_layers - 1:
            ws.append(w_full[i, :d_in, :d_out])           # transposed: (d_in, 1)
        else:
            ws.append(w_full[i, :d_out, :d_in])           # (d_out, d_in)
        bs.append(b_full[i, :d_out, :])                   # (d_out, 1)

    def chunk_body(c, carry):
        # Strip-mine the lane dimension so big grid tiles don't spill vregs.
        col = pl.multiple_of(c * chunk, chunk)
        h = xT_ref[:, pl.ds(col, chunk)].astype(jnp.float32)   # (D_in, chunk)
        for i in range(num_layers):
            is_last = i == num_layers - 1
            if is_last and last_layer_vpu:
                # 1-row output layer on VPU (broadcast-mul) + XLU sublane sum,
                # instead of an MXU dot using 1 of 128/256 result rows.
                z = jnp.sum(h * ws[i], axis=0, keepdims=True) + bs[i]
            else:
                z = jnp.dot(ws[i], h,
                            preferred_element_type=jnp.float32,
                            precision=jax.lax.Precision.HIGHEST) + bs[i]
            h = z if is_last else jnp.tanh(z)
        outT_ref[:, pl.ds(col, chunk)] = h.astype(outT_ref.dtype)
        return carry

    lax.fori_loop(0, n_chunks, chunk_body, 0, unroll=True)


def _choose_tiling(N, *, target_tile=2048, chunk=512):
    """Pick (tile_n, n_tiles): big tiles (overhead-bound kernel) while keeping
    the grid >= 2 and even so both v7x TensorCores get work."""
    chunk = max(_LANE, chunk)
    n_tiles = max(2, pl.cdiv(N, target_tile))
    if n_tiles % 2:
        n_tiles += 1
    tile_n = pl.cdiv(N, n_tiles * chunk) * chunk      # multiple of chunk
    return tile_n, n_tiles


def prepare_collocation(x, *, target_tile=2048, chunk=512):
    """Pay the (N, D) -> (D, N_pad) transpose + pad ONCE (collocation points
    are reused every training step); returns (xT_pad, tile_n)."""
    N, _ = x.shape
    tile_n, n_tiles = _choose_tiling(N, target_tile=target_tile, chunk=chunk)
    n_pad = tile_n * n_tiles
    xT = jnp.pad(x.T.astype(jnp.float32), ((0, 0), (0, n_pad - N)))
    return xT, tile_n


def _pack_params(weights, biases, last_layer_vpu):
    """Collapse per-layer params into one padded weight slab + one bias slab."""
    num_layers = len(weights)
    dp = max(max(w.shape) for w in weights)
    dp = ((dp + 7) // 8) * 8                              # sublane-friendly
    w_slab = jnp.zeros((num_layers, dp, dp), jnp.float32)
    b_slab = jnp.zeros((num_layers, dp, 1), jnp.float32)
    for i, (w, b) in enumerate(zip(weights, biases)):
        wi = w.T if (last_layer_vpu and i == num_layers - 1) else w
        w_slab = w_slab.at[i, :wi.shape[0], :wi.shape[1]].set(
            wi.astype(jnp.float32))
        b_slab = b_slab.at[i, :b.shape[0], 0].set(b.astype(jnp.float32))
    return w_slab, b_slab


def pinn_forward_t(xT_pad, weights, biases, *, tile_n, chunk=512):
    """Forward pass on the prepared (D_in, N_pad) layout.

    Returns the lane-dense (D_out, N_pad) output (a training loop should
    consume this directly; padded columns are garbage-free zeros-of-bias and
    simply unused).
    """
    d0, n_pad = xT_pad.shape
    chunk = max(_LANE, min(chunk, tile_n))
    assert n_pad % tile_n == 0, "N_pad must be a multiple of tile_n"
    assert tile_n % chunk == 0, "tile_n must be a multiple of the lane chunk"
    n_tiles = n_pad // tile_n

    layer_dims = [weights[0].shape[1]] + [w.shape[0] for w in weights]
    assert d0 == layer_dims[0]
    d_out = layer_dims[-1]
    last_layer_vpu = d_out == 1

    w_slab, b_slab = _pack_params(weights, biases, last_layer_vpu)

    kernel = functools.partial(
        _mlp_kernel_t, layer_dims=tuple(layer_dims), chunk=chunk,
        last_layer_vpu=last_layer_vpu)

    cost = pl.CostEstimate(
        flops=2 * sum(int(w.shape[0] * w.shape[1]) for w in weights) * n_pad,
        transcendentals=int(sum(layer_dims[1:-1])) * n_pad,
        bytes_accessed=4 * (d0 * n_pad + d_out * n_pad
                            + int(w_slab.size) + int(b_slab.size)),
    )

    in_specs = [
        pl.BlockSpec((d0, tile_n), lambda i: (0, i)),
        # Full-array, constant-index parameter slabs: resident in VMEM across
        # all grid steps, no per-step re-DMA.
        pl.BlockSpec(w_slab.shape, lambda i: (0, 0, 0)),
        pl.BlockSpec(b_slab.shape, lambda i: (0, 0, 0)),
    ]
    out_spec = pl.BlockSpec((d_out, tile_n), lambda i: (0, i))

    return pl.pallas_call(
        kernel,
        out_shape=jax.ShapeDtypeStruct((d_out, n_pad), jnp.float32),
        grid_spec=pltpu.PrefetchScalarGridSpec(
            num_scalar_prefetch=0,
            grid=(n_tiles,),
            in_specs=in_specs,
            out_specs=out_spec,
        ),
        compiler_params=pltpu.CompilerParams(
            dimension_semantics=("parallel",),   # megacore-shardable on v7x
        ),
        cost_estimate=cost,
    )(xT_pad, w_slab, b_slab)


def pinn_forward(x, weights, biases, *, target_tile=2048, chunk=512):
    """Convenience wrapper matching PyTorch's (batch, features) convention.

    For training loops prefer prepare_collocation + pinn_forward_t so the
    transpose/pad (and the back-transpose) are not paid on every call.
    """
    N, _ = x.shape
    xT_pad, tile_n = prepare_collocation(x, target_tile=target_tile, chunk=chunk)
    outT = pinn_forward_t(xT_pad, weights, biases, tile_n=tile_n, chunk=chunk)
    return outT[:, :N].T


def init_pinn_params(key, layers_size):
    """Deterministic Xavier-normal weights, zero biases (mirrors init_layers).

    Weights stay in PyTorch nn.Linear orientation: (out_features, in_features).
    """
    weights, biases = [], []
    for i in range(len(layers_size) - 1):
        d_in, d_out = layers_size[i], layers_size[i + 1]
        key, sub = jax.random.split(key)
        std = (2.0 / (d_in + d_out)) ** 0.5  # xavier_normal_ gain=1
        w = std * jax.random.normal(sub, (d_out, d_in), dtype=jnp.float32)
        b = jnp.zeros((d_out,), dtype=jnp.float32)
        weights.append(w)
        biases.append(b)
    return weights, biases


def pinn_forward_ref(x, weights, biases):
    """Pure-JAX reference of PINN.forward for correctness checking."""
    h = x
    for i in range(len(weights) - 1):
        h = jnp.tanh(jnp.dot(h, weights[i].T,
                             precision=jax.lax.Precision.HIGHEST) + biases[i])
    return jnp.dot(h, weights[-1].T,
                   precision=jax.lax.Precision.HIGHEST) + biases[-1]


if __name__ == "__main__":
    # PINN for a 2D heat equation: inputs (x, y, t) -> u, layers [3, 32, 32, 1]
    layers_size = [3, 32, 32, 1]
    N = 2000   # collocation points; deliberately not a multiple of the tile

    key = jax.random.PRNGKey(0)
    key, kx = jax.random.split(key)
    x = jax.random.normal(kx, (N, layers_size[0]), dtype=jnp.float32)
    weights, biases = init_pinn_params(key, layers_size)

    # Hoisted-layout path (what a training loop should use): pad/transpose the
    # collocation points once, consume the lane-dense transposed output.
    xT_pad, tile_n = prepare_collocation(x)
    outT = jax.block_until_ready(
        pinn_forward_t(xT_pad, weights, biases, tile_n=tile_n))

    # Convenience (batch, features) wrapper matching PINN.forward.
    out = jax.block_until_ready(pinn_forward(x, weights, biases))

    ref = pinn_forward_ref(x, weights, biases)
    assert out.shape == (N, layers_size[-1])
    assert jnp.allclose(out, ref, atol=1e-5, rtol=1e-5), "wrapper mismatch"
    assert jnp.allclose(outT[:, :N].T, ref, atol=1e-5, rtol=1e-5), \
        "transposed-path mismatch"

    print("KERNEL_OK")
</pallas_src>

<mosaic_0001>
module attributes {stable_mosaic.version = 11 : i64} {
  func.func @_mlp_kernel_t(%arg0: i32, %arg1: memref<3x1024xf32, #tpu.memory_space<vmem>>, %arg2: memref<3x32x32xf32, #tpu.memory_space<vmem>>, %arg3: memref<3x32x1xf32, #tpu.memory_space<vmem>>, %arg4: memref<1x1024xf32, #tpu.memory_space<vmem>>) attributes {dimension_semantics = [#tpu.dimension_semantics<parallel>], iteration_bounds = array<i64: 2>, scalar_prefetch = 0 : i64, scratch_operands = 0 : i64, tpu.core_type = #tpu.core_type<tc>, window_params = [{transform_indices = @transform_0, window_bounds = array<i64: 3, 1024>}, {pipeline_mode = #tpu.pipeline_mode<synchronous>, transform_indices = @transform_1, window_bounds = array<i64: 3, 32, 32>}, {pipeline_mode = #tpu.pipeline_mode<synchronous>, transform_indices = @transform_2, window_bounds = array<i64: 3, 32, 1>}, {transform_indices = @transform_3, window_bounds = array<i64: 1, 1024>}]} {
    %c0 = arith.constant 0 : index
    %c0_0 = arith.constant 0 : index
    %c0_1 = arith.constant 0 : index
    %0 = vector.load %arg2[%c0, %c0_0, %c0_1] : memref<3x32x32xf32, #tpu.memory_space<vmem>>, vector<3x32x32xf32>
    %c0_2 = arith.constant 0 : index
    %c0_3 = arith.constant 0 : index
    %c0_4 = arith.constant 0 : index
    %1 = vector.load %arg3[%c0_2, %c0_3, %c0_4] : memref<3x32x1xf32, #tpu.memory_space<vmem>>, vector<3x32x1xf32>
    %2 = vector.extract_strided_slice %0 {offsets = [0, 0, 0], sizes = [1, 32, 3], strides = [1, 1, 1]} : vector<3x32x32xf32> to vector<1x32x3xf32>
    %3 = vector.shape_cast %2 : vector<1x32x3xf32> to vector<32x3xf32>
    %4 = vector.extract_strided_slice %1 {offsets = [0, 0, 0], sizes = [1, 32, 1], strides = [1, 1, 1]} : vector<3x32x1xf32> to vector<1x32x1xf32>
    %5 = vector.shape_cast %4 : vector<1x32x1xf32> to vector<32x1xf32>
    %6 = vector.extract_strided_slice %0 {offsets = [1, 0, 0], sizes = [1, 32, 32], strides = [1, 1, 1]} : vector<3x32x32xf32> to vector<1x32x32xf32>
    %7 = vector.shape_cast %6 : vector<1x32x32xf32> to vector<32x32xf32>
    %8 = vector.extract_strided_slice %1 {offsets = [1, 0, 0], sizes = [1, 32, 1], strides = [1, 1, 1]} : vector<3x32x1xf32> to vector<1x32x1xf32>
    %9 = vector.shape_cast %8 : vector<1x32x1xf32> to vector<32x1xf32>
    %10 = vector.extract_strided_slice %0 {offsets = [2, 0, 0], sizes = [1, 32, 1], strides = [1, 1, 1]} : vector<3x32x32xf32> to vector<1x32x1xf32>
    %11 = vector.shape_cast %10 : vector<1x32x1xf32> to vector<32x1xf32>
    %12 = vector.extract_strided_slice %1 {offsets = [2, 0, 0], sizes = [1, 1, 1], strides = [1, 1, 1]} : vector<3x32x1xf32> to vector<1x1x1xf32>
    %13 = vector.shape_cast %12 : vector<1x1x1xf32> to vector<1x1xf32>
    %c0_i32 = arith.constant 0 : i32
    %c512_i32 = arith.constant 512 : i32
    %14 = arith.muli %c0_i32, %c512_i32 : i32
    %15 = tpu.assume_multiple %14, 512 : i32
    %c0_5 = arith.constant 0 : index
    %16 = arith.index_cast %15 : i32 to index
    %17 = vector.load %arg1[%c0_5, %16] : memref<3x1024xf32, #tpu.memory_space<vmem>>, vector<3x512xf32>
    %cst = arith.constant dense<0.000000e+00> : vector<32x512xf32>
    %18 = tpu.matmul %3, %17, %cst {dimension_numbers = #tpu.dot_dimension_numbers<[1], [0], [0], [1], [0, 0, 1, 1], [], []>, precision = #tpu.contract_precision<fp32>} : vector<32x3xf32>, vector<3x512xf32>, vector<32x512xf32> -> vector<32x512xf32>
    %19 = vector.broadcast %5 : vector<32x1xf32> to vector<32x512xf32>
    %20 = arith.addf %18, %19 : vector<32x512xf32>
    %21 = math.tanh %20 : vector<32x512xf32>
    %cst_6 = arith.constant dense<0.000000e+00> : vector<32x512xf32>
    %22 = tpu.matmul %7, %21, %cst_6 {dimension_numbers = #tpu.dot_dimension_numbers<[1], [0], [0], [1], [0, 0, 1, 1], [], []>, precision = #tpu.contract_precision<fp32>} : vector<32x32xf32>, vector<32x512xf32>, vector<32x512xf32> -> vector<32x512xf32>
    %23 = vector.broadcast %9 : vector<32x1xf32> to vector<32x512xf32>
    %24 = arith.addf %22, %23 : vector<32x512xf32>
    %25 = math.tanh %24 : vector<32x512xf32>
    %26 = vector.broadcast %11 : vector<32x1xf32> to vector<32x512xf32>
    %27 = arith.mulf %25, %26 : vector<32x512xf32>
    %cst_7 = arith.constant dense<0.000000e+00> : vector<512xf32>
    %28 = vector.multi_reduction <add>, %27, %cst_7 [0] : vector<32x512xf32> to vector<512xf32>
    %29 = vector.shape_cast %28 : vector<512xf32> to vector<1x512xf32>
    %30 = vector.broadcast %13 : vector<1x1xf32> to vector<1x512xf32>
    %31 = arith.addf %29, %30 : vector<1x512xf32>
    %c0_8 = arith.constant 0 : index
    %32 = arith.index_cast %15 : i32 to index
    %33 = vector.load %arg4[%c0_8, %32] : memref<1x1024xf32, #tpu.memory_space<vmem>>, vector<1x512xf32>
    tpu.vector_store %arg4[%c0_8, %32], %31 {strides = array<i32>} : memref<1x1024xf32, #tpu.memory_space<vmem>>, vector<1x512xf32>,
    %c1_i32 = arith.constant 1 : i32
    %c512_i32_9 = arith.constant 512 : i32
    %34 = arith.muli %c1_i32, %c512_i32_9 : i32
    %35 = tpu.assume_multiple %34, 512 : i32
    %c0_10 = arith.constant 0 : index
    %36 = arith.index_cast %35 : i32 to index
    %37 = vector.load %arg1[%c0_10, %36] : memref<3x1024xf32, #tpu.memory_space<vmem>>, vector<3x512xf32>
    %cst_11 = arith.constant dense<0.000000e+00> : vector<32x512xf32>
    %38 = tpu.matmul %3, %37, %cst_11 {dimension_numbers = #tpu.dot_dimension_numbers<[1], [0], [0], [1], [0, 0, 1, 1], [], []>, precision = #tpu.contract_precision<fp32>} : vector<32x3xf32>, vector<3x512xf32>, vector<32x512xf32> -> vector<32x512xf32>
    %39 = vector.broadcast %5 : vector<32x1xf32> to vector<32x512xf32>
    %40 = arith.addf %38, %39 : vector<32x512xf32>
    %41 = math.tanh %40 : vector<32x512xf32>
    %cst_12 = arith.constant dense<0.000000e+00> : vector<32x512xf32>
    %42 = tpu.matmul %7, %41, %cst_12 {dimension_numbers = #tpu.dot_dimension_numbers<[1], [0], [0], [1], [0, 0, 1, 1], [], []>, precision = #tpu.contract_precision<fp32>} : vector<32x32xf32>, vector<32x512xf32>, vector<32x512xf32> -> vector<32x512xf32>
    %43 = vector.broadcast %9 : vector<32x1xf32> to vector<32x512xf32>
    %44 = arith.addf %42, %43 : vector<32x512xf32>
    %45 = math.tanh %44 : vector<32x512xf32>
    %46 = vector.broadcast %11 : vector<32x1xf32> to vector<32x512xf32>
    %47 = arith.mulf %45, %46 : vector<32x512xf32>
    %cst_13 = arith.constant dense<0.000000e+00> : vector<512xf32>
    %48 = vector.multi_reduction <add>, %47, %cst_13 [0] : vector<32x512xf32> to vector<512xf32>
    %49 = vector.shape_cast %48 : vector<512xf32> to vector<1x512xf32>
    %50 = vector.broadcast %13 : vector<1x1xf32> to vector<1x512xf32>
    %51 = arith.addf %49, %50 : vector<1x512xf32>
    %c0_14 = arith.constant 0 : index
    %52 = arith.index_cast %35 : i32 to index
    %53 = vector.load %arg4[%c0_14, %52] : memref<1x1024xf32, #tpu.memory_space<vmem>>, vector<1x512xf32>
    tpu.vector_store %arg4[%c0_14, %52], %51 {strides = array<i32>} : memref<1x1024xf32, #tpu.memory_space<vmem>>, vector<1x512xf32>,
    %c2_i32 = arith.constant 2 : i32
    return
  }
  func.func @transform_0(%arg0: i32) -> (i32, i32) {
    %c0_i32 = arith.constant 0 : i32
    %c0_i32_0 = arith.constant 0 : i32
    return %c0_i32, %arg0 : i32, i32
  }
  func.func @transform_1(%arg0: i32) -> (i32, i32, i32) {
    %c0_i32 = arith.constant 0 : i32
    %c0_i32_0 = arith.constant 0 : i32
    %c0_i32_1 = arith.constant 0 : i32
    %c0_i32_2 = arith.constant 0 : i32
    return %c0_i32, %c0_i32_0, %c0_i32_1 : i32, i32, i32
  }
  func.func @transform_2(%arg0: i32) -> (i32, i32, i32) {
    %c0_i32 = arith.constant 0 : i32
    %c0_i32_0 = arith.constant 0 : i32
    %c0_i32_1 = arith.constant 0 : i32
    %c0_i32_2 = arith.constant 0 : i32
    return %c0_i32, %c0_i32_0, %c0_i32_1 : i32, i32, i32
  }
  func.func @transform_3(%arg0: i32) -> (i32, i32) {
    %c0_i32 = arith.constant 0 : i32
    %c0_i32_0 = arith.constant 0 : i32
    return %c0_i32, %arg0 : i32, i32
  }
}

</mosaic_0001>

<bundles_post_ra>
// kernel: tpu_custom_call.1
= control target key start
LH: loop header
LB: loop body
LE: loop exit
PB: predicated region body
PF: predicated region fallthrough
CT: control target
= control target key end

     0   :  { %8 = vsyncpa [#allocation3], 0  ;;  %s8085_s0 = inlined_call_operand.hbm [shape: f32[3,2048], index: 0, kind: input, shape index: {}]   ;;  %s8086_s1 = inlined_call_operand.vmem [shape: f32[3,32,32], index: 1, kind: input, shape index: {}]   ;;  %s8087_s2 = inlined_call_operand.vmem [shape: f32[3,32,1], index: 2, kind: input, shape index: {}]   ;;  %s8088_s3 = inlined_call_operand.hbm [shape: f32[1,2048], index: 3, kind: output, shape index: {}]  }
   0x1   :  { %10 = vsyncpa [#allocation3 + $0x1], 0 }
   0x2   :  { %11 = vsyncpa [#allocation4], 0 }
   0x3   :  { %13 = vsyncpa [#allocation4 + $0x1], 0  ;;  %s6186_s12 = smov 0   ;;  %s6188_s13 = smov 0  }
   0x4   :  { %s6190_s14 = smov 0   ;;  %s6192_s15 = smov 0  }
   0x5 LB: > { %s6207_s16 = sadd.s32 4294967295, %s6159_s15   ;;  %s5865_s17 = sadd.s32 4294967294, %s6159_s15   ;;  %s6159_s15 = sphi %s6192_s15, %s8361_s15   ;;  %s6155_s14 = sphi %s6190_s14, %s8360_s14   ;;  %s6151_s13 = sphi %s6188_s13, %s8359_s13   ;;  %s6147_s12 = sphi %s6186_s12, %s8358_s12  }
   0x6   : > { %s6211_s18 = sadd.s32 1, %s6159_s15   ;;  %s26_s19 = sadd.s32 1, %s6155_s14 }
   0x7   : > { %s23_s20 = ssub.s32 %s6159_s15, %s6211_s18  ;;  %p33_p0 = scmp.ne.s32.totalorder %s6155_s14, %s6151_s13 }
   0x8   : > { %p24_p1 = scmp.eq.s32.totalorder %s23_s20, 0  ;;  %p34_p2 = scmp.eq.s32.totalorder %s6159_s15, 0 }
   0x9   : > { %p39_p3 = scmp.ne.s32.totalorder %s6151_s13, %s6147_s12  ;;  %p40_p4 = scmp.eq.s32.totalorder %s6207_s16, 0 }
   0xa   : > { %s6223_s21 = scalar_select %p24_p1, %s6155_s14, %s26_s19  }
   0xb   : > { %p6225_p5 = por %p34_p2, %p33_p0  ;;  %p6229_p6 = por %p40_p4, %p39_p3 }
   0xc   : > { %p105_p7 = scmp.eq.s32.totalorder %s6207_s16, 1  ;;  %p111_p8 = scmp.eq.s32.totalorder %s5865_s17, 1 }
   0xd   : > { %s8199_s23 = scalar_select %p6229_p6, 1, 0 }
   0xe   : > { %p5896_p10 = scmp.lt.s32.totalorder %s6159_s15, 2  ;;  %p6236_p11 = por %p105_p7, %p33_p0 }
   0xf   : > { %p6240_p12 = por %p111_p8, %p39_p3  ;;  %s137_s26 = sand.u32 1, %s6155_s14  }
  0x10   : > { %s8200_s24 = scalar_select %p6236_p11, 1, 0 }
  0x11   : > { %s8201_s25 = scalar_select %p6240_p12, 1, 0 }
  0x12   : > { %s5882_s27 = sshll.u32 %s6159_s15, 9  ;;  %s5868_s28 = sshll.u32 %s137_s26, 5 }
  0x13   : > { %s6249_s4 = scalar_lea.hbm %s8085_s0, %s5882_s27  ;;  %s141_s5 = scalar_lea.vmem [#allocation2], %s5868_s28 }
  0x14   : > { %s149_s6 = sshll.u32 %s141_s5, 4  ;;  %p6253_p13 = pnand %p5896_p10, %p6225_p5  ;;  %s6257_s6 = int_to_ptr.vmem [resolvable:$true] %s149_s6 }
  0x15   : > { %s138_s8 = scalar_lea.sflag [#allocation3], %s137_s26  ;;  %s6067_s9 = scalar_lea.hbm %s6249_s4, 512 }
  0x16   : > { %p6068_p2 = scmp.ne.s32.totalorder %s6249_s4, %s6067_s9  ;;  %p6069_p3 = pneg %p6253_p13 }
  0x17   : > { %s6072_s17 = scalar_lea.hbm %s8085_s0, 1024  ;;  %p6073_p5 = scmp.lt.s32.totalorder %s6249_s4, %s8085_s0 }
  0x18   : > { %p6070_p4 = pnand %p6069_p3, %p6068_p2  ;;  %p6074_p8 = scmp.lt.s32.totalorder %s6072_s17, %s6067_s9 }
  0x1a   : > { %p6071_p7 = pneg %p6070_p4  ;;  %p6075_p10 = por %p6074_p8, %p6073_p5 }
  0x1c   : > { %p6076_p9 = pnand %p6075_p10, %p6071_p7 }
  0x1e   : > { %6079 = shalt.err (!%p6076_p9)
}
  0x1f   : > { %s6080_s22 = scalar_lea.vmem %s6257_s6, 512  ;;  %s6161_s26 = smov [#allocation2]  }
  0x20   : > { %p6081_p0 = scmp.ne.s32.totalorder %s6257_s6, %s6080_s22  ;;  %s6085_s27 = sshll.u32 %s6161_s26, 4  ;;  %s6086_s27 = int_to_ptr.vmem [resolvable:$false] %s6085_s27 }
  0x21   : > { %s6087_s28 = scalar_lea.vmem %s6086_s27, 1024  ;;  %p6088_p4 = scmp.lt.s32.totalorder %s6257_s6, %s6086_s27 }
  0x22   : > { %p6083_p1 = pnand %p6081_p0, %p6069_p3  ;;  %p6089_p12 = scmp.lt.s32.totalorder %s6087_s28, %s6080_s22 }
  0x24   : > { %p6084_p2 = pneg %p6083_p1  ;;  %p6090_p11 = por %p6089_p12, %p6088_p4 }
  0x26   : > { %p6091_p6 = pnand %p6090_p11, %p6084_p2 }
  0x28   : > { %6094 = shalt.err (!%p6091_p6)
}
  0x29   : > { %5891 = dma.hbm_to_vmem [thread:$0]  (!%p6253_p13), %s6249_s4, 512, %s6257_s6, %s138_s8  }
  0x2a   : > { %p8203_p9 = scmp.lt.s32.totalorder %s6159_s15, 3  ;;  %p8204_p7 = scmp.ge.s32.totalorder %s6159_s15, 1 }
  0x2c   : > { %p155_p0 = pnand %p8204_p7, %p8203_p9 }
  0x2e   : > { %158 = sbr.rel (%p155_p0) target bundleno = 1074 (0x432), region = 32 }
  0x33   : > { %s6284_s29 = sand.u32 1, %s6151_s13   ;;  %p8205_p6 = scmp.ne.s32.totalorder %s8199_s23, 0 }
  0x34   : > { %s5872_s30 = sshll.u32 %s6284_s29, 5  ;;  %s161_s5 = scalar_lea.sflag [#allocation3], %s6284_s29 }
  0x35   : > { %s6288_s9 = scalar_lea.vmem [#allocation2], %s5872_s30 }
  0x36   : > { %6138 = dma.done.wait (%p8205_p6), %s161_s5, 512  }
  0x37   : > { %6140 = vsyncadd (%p8205_p6), %s161_s5, 4294966784  ;;  %v8091_v0 = vmov 0.0   ;;  %v6163_v1 = vmov 0   ;;  %vm249_vm0 = vcmask 1042432   ;;  %vm236_vm1 = vcmask 23552   ;;  %v189_v3 = vld [vmem:[%s8086_s1] sm:$0xff] }
  0x38   : > { %324 = vmatprep.mubr.f32.mxu0 %v8091_v0  ;;  %443 = vmatprep.mubr.f32.mxu1 %v8091_v0  ;;  %v210_v2 = vld [vmem:[%s6288_s9] sm:$0x77]  ;;  %v190_v4 = vld [vmem:[%s8086_s1 + $0x8] sm:$0xff]  ;;  %v238_v7 = vsel %vm236_vm1, %v189_v3, 0  ;;  %v191_v9 = vld [vmem:[%s8086_s1 + $0x10] sm:$0xff]  ;;  %vm1518_vm2 = vcmask 261120  }
  0x39   : > { %5934 = vset.pattern.permute.xlu1 %v6163_v1  ;;  %5933 = vset.pattern.permute.xlu0 %v6163_v1  ;;  %v234_v5 = vcombine.high %v210_v2, %v210_v2  ;;  %v250_v6 = vsel %vm249_vm0, %v210_v2, 0  ;;  %v241_v8 = vsel %vm236_vm1, %v190_v4, 0  ;;  %v192_v10 = vld [vmem:[%s8086_s1 + $0x18] sm:$0xff]  ;;  %v202_v11 = vld [vmem:[%s8087_s2 + $0x8] sm:$0xff]  ;;  %v6317_v13 = vand.u32 4294901760, %v238_v7  ;;  %v201_v19 = vld [vmem:[%s8087_s2] sm:$0xff] }
  0x3a   : > { %v6315_v12 = vand.u32 4294901760, %v250_v6  ;;  %v6319_v14 = vand.u32 4294901760, %v241_v8  ;;  %v244_v15 = vsel %vm236_vm1, %v191_v9, 0  ;;  %219 = vperm.xlu1 %5934, %v202_v11   ;;  %v247_v18 = vsel %vm236_vm1, %v192_v10, 0  ;;  %v204_v20 = vld [vmem:[%s8087_s2 + $0x18] sm:$0xff]  ;;  %v203_v28 = vld [vmem:[%s8087_s2 + $0x10] sm:$0xff] }
  0x3b   : > { %8206 = vst [vmem:[#allocation8_spill] sm:$0xff] %v6317_v13  ;;  %v252_v16 = vsel %vm249_vm0, %v234_v5, 0  ;;  %v6323_v17 = vand.u32 4294901760, %v244_v15  ;;  %v6335_v22 = vsub.f32 %v238_v7, %v6317_v13  ;;  %v6344_v25 = vld [vmem:[%s6288_s9 + $0x8] sm:$0x77]  ;;  %229 = vperm.xlu0 %5933, %v204_v20   ;;  %v6349_v27 = vand.u32 4294901760, %v247_v18 }
  0x3c   : > { %8207 = vst [vmem:[#allocation9_spill] sm:$0xff] %v6319_v14  ;;  %v6332_v21 = vand.u32 4294901760, %v252_v16  ;;  %v6338_v23 = vsub.f32 %v250_v6, %v6315_v12  ;;  %v6341_v24 = vsub.f32 %v241_v8, %v6319_v14  ;;  %v235_v35 = vcombine.high %v6344_v25, %v6344_v25  ;;  %v206_v36 = vld [vmem:[%s8087_s2 + $0x28] sm:$0xff]  ;;  %v205_v41 = vld [vmem:[%s8087_s2 + $0x20] sm:$0xff]  ;;  %v208_v50 = vld [vmem:[%s8087_s2 + $0x38] sm:$0xff]  ;;  %s5883_s26 = sshll.u32 %s6207_s16, 7 }
  0x3d   : > { %8208 = vst [vmem:[#allocation10_spill] sm:$0xff] %v6323_v17  ;;  %8209 = vst [vmem:[#allocation11_spill] sm:$0xff] %v6335_v22  ;;  %v6347_v26 = vsub.f32 %v244_v15, %v6323_v17  ;;  %v6356_v29 = vand.u32 4294901760, %v6335_v22  ;;  %v6368_v34 = vsub.f32 %v247_v18, %v6349_v27  ;;  %v207_v52 = vld [vmem:[%s8087_s2 + $0x30] sm:$0xff]  ;;  %v198_v55 = vld [vmem:[%s8086_s1 + $0x48] sm:$0xff]  ;;  %v254_v62 = vsel %vm249_vm0, %v6344_v25, 0  ;;  %s5793_s5 = scalar_lea.hbm %s8088_s3, %s5883_s26 }
  0x3e   : > { %8210 = vst [vmem:[#allocation12_spill] sm:$0xff] %v6341_v24  ;;  %8212 = vst [vmem:[#allocation14_spill] sm:$0xff] %v6349_v27  ;;  %289 = vmatprep.subr.mxu0 %v6332_v21  ;;  %v400_v30 = vsub.f32 %v252_v16, %v6332_v21  ;;  %v407_v31 = vand.u32 4294901760, %v6338_v23  ;;  %v6361_v32 = vand.u32 4294901760, %v6341_v24  ;;  %214 = vperm.xlu1 %5934, %v201_v19   ;;  %v256_v45 = vsel %vm249_vm0, %v235_v35, 0  ;;  %v197_v57 = vld [vmem:[%s8086_s1 + $0x40] sm:$0xff] }
  0x3f   : > { %8211 = vst [vmem:[#allocation13_spill] sm:$0xff] %v6347_v26  ;;  %8213 = vst [vmem:[#allocation15_spill] sm:$0xff] %v6356_v29  ;;  %291 = vmatpush1.msra.mxu0 %v6315_v12  ;;  %v6365_v33 = vand.u32 4294901760, %v6347_v26  ;;  %v328_v37 = vsub.f32 %v6335_v22, %v6356_v29  ;;  %224 = vperm.xlu0 %5933, %v203_v28   ;;  %v6394_v49 = vand.u32 4294901760, %v6368_v34  ;;  %v6401_v51 = vand.u32 4294901760, %v256_v45  ;;  %v200_v59 = vld [vmem:[%s8086_s1 + $0x58] sm:$0xff] }
  0x40   : > { %8214 = vst [vmem:[#allocation16_spill] sm:$0xff] %v6361_v32  ;;  %8216 = vst [vmem:[#allocation18_spill] sm:$0xff] %v6368_v34  ;;  %v401_v38 = vand.u32 4294901760, %v400_v30  ;;  %v408_v39 = vsub.f32 %v6338_v23, %v407_v31  ;;  %v339_v40 = vsub.f32 %v6341_v24, %v6361_v32  ;;  %504 = vmatprep.subr.mxu0 %v400_v30  ;;  %v199_v61 = vld [vmem:[%s8086_s1 + $0x50] sm:$0xff]  ;;  %v209_v1 = vld [vmem:[%s8087_s2 + $0x40] sm:$0xff]  ;;  %v6455_v2 = vand.u32 4294901760, %v254_v62 }
  0x41   : > { %8215 = vst [vmem:[#allocation17_spill] sm:$0xff] %v6365_v33  ;;  %v6385_v42 = vand.u32 4294901760, %v328_v37  ;;  %v350_v48 = vsub.f32 %v6347_v26, %v6365_v33  ;;  %8219 = vst [vmem:[#allocation21_spill] sm:$0xff] %v6394_v49  ;;  %v361_v54 = vsub.f32 %v6368_v34, %v6394_v49  ;;  %v6420_v56 = vsub.f32 %v256_v45, %v6401_v51  ;;  %s5781_s4 = scalar_lea.sflag [#allocation4], %s6284_s29  ;;  %p8355_p12 = scmp.ne.s32.totalorder %s8200_s24, 0 }
  0x42   : > { %v402_v43 = vsub.f32 %v400_v30, %v401_v38  ;;  %1505 = vperm.xlu1 %5934, %v206_v36   ;;  %v409_v44 = vand.u32 4294901760, %v408_v39  ;;  %v6389_v47 = vand.u32 4294901760, %v339_v40  ;;  %v1018_v4 = vsub.f32 %v254_v62, %v6455_v2  ;;  %s6165_s7 = smov [#allocation5]  }
  0x43   : > { %8217 = vst [vmem:[#allocation19_spill] sm:$0xff] %v6385_v42  ;;  %330 = vmatmul.mubr.f32.vlgmr.msra.gmra.mxu0 %v6385_v42  ;;  %1500 = vperm.xlu0 %5933, %v205_v41   ;;  %v6408_v53 = vand.u32 4294901760, %v350_v48  ;;  %v6427_v58 = vand.u32 4294901760, %v361_v54  ;;  %v1013_v60 = vand.u32 4294901760, %v6420_v56  ;;  %s6099_s16 = sshll.u32 %s6165_s7, 4  ;;  %s6100_s16 = int_to_ptr.vmem [resolvable:$false] %s6099_s16 }
  0x44   : > { %v403_v46 = vand.u32 4294901760, %v402_v43  ;;  %8218 = vst [vmem:[#allocation20_spill] sm:$0xff] %v6389_v47  ;;  %335 = vmatprep.mubr.f32.mxu0 %v8091_v0  ;;  %507 = vmatpush1.msra.mxu0 %v6338_v23  ;;  %v1019_v5 = vand.u32 4294901760, %v1018_v4  ;;  %s6101_s8 = scalar_lea.vmem %s6100_s16, 256 }
  0x45   : > { %709 = vmatprep.subr.mxu0 %v401_v38  ;;  %8220 = vst [vmem:[#allocation22_spill] sm:$0xff] %v6408_v53  ;;  %8221 = vst [vmem:[#allocation23_spill] sm:$0xff] %v6427_v58  ;;  %v1014_v63 = vsub.f32 %v6420_v56, %v1013_v60 }
  0x46   : > { %404 = vmatprep.subr.mxu1 %v403_v46  ;;  %1515 = vperm.xlu1 %5934, %v208_v50   ;;  %v1020_v6 = vsub.f32 %v1018_v4, %v1019_v5 }
  0x47   : > { %410 = vmatpush1.msra.mxu1 %v409_v44  ;;  %341 = vmatmul.mubr.f32.gmra.mxu0 %v6389_v47  ;;  %v1015_v3 = vand.u32 4294901760, %v1014_v63 }
  0x48   : > { %445 = vmatmul.mubr.f32.vlgmr.msra.gmra.mxu1 %v6317_v13  ;;  %346 = vmatprep.mubr.f32.mxu0 %v8091_v0  ;;  %v1021_v7 = vand.u32 4294901760, %v1020_v6 }
  0x49   : > { %450 = vmatprep.mubr.f32.mxu1 %v8091_v0  ;;  %604 = vmatprep.subr.mxu1 %v6332_v21 }
  0x4a   : > { %1510 = vperm.xlu0 %5933, %v207_v52   ;;  %606 = vmatpush1.msra.mxu1 %v6315_v12 }
  0x4b   : > { %2934 = vperm.xlu1 %5934, %v198_v55   ;;  %352 = vmatmul.mubr.f32.gmra.mxu0 %v6408_v53 }
  0x4c   : > { %452 = vmatmul.mubr.f32.gmra.mxu1 %v6319_v14  ;;  %357 = vmatprep.mubr.f32.mxu0 %v8091_v0 }
  0x4d   : > { %457 = vmatprep.mubr.f32.mxu1 %v8091_v0  ;;  %806 = vmatprep.subr.mxu1 %v6332_v21 }
  0x4e   : > { %2929 = vperm.xlu0 %5933, %v197_v57  }
  0x4f   : > { %2944 = vperm.xlu1 %5934, %v200_v59   ;;  %363 = vmatmul.mubr.f32.gmra.mxu0 %v6427_v58 }
  0x50   : > { %459 = vmatmul.mubr.f32.gmra.mxu1 %v6323_v17  ;;  %540 = vmatprep.mubr.f32.mxu0 %v8091_v0 }
  0x51   : > { %464 = vmatprep.mubr.f32.mxu1 %v8091_v0 }
  0x52   : > { %2939 = vperm.xlu0 %5933, %v199_v61  }
  0x53   : > { %543 = vmatmul.mubr.f32.vlgmr.msra.gmra.mxu0 %v6335_v22 }
  0x54   : > { %466 = vmatmul.mubr.f32.gmra.mxu1 %v6349_v27  ;;  %548 = vmatprep.mubr.f32.mxu0 %v8091_v0 }
  0x55   : > { %639 = vmatprep.mubr.f32.mxu1 %v8091_v0  ;;  %713 = vmatpush1.msra.mxu0 %v407_v31 }
  0x56   : > { %3001 = vperm.xlu0 %5933, %v209_v1   ;;  %901 = vmatprep.subr.mxu0 %v6401_v51 }
  0x57   : > { %551 = vmatmul.mubr.f32.gmra.mxu0 %v6341_v24 }
  0x58   : > { %643 = vmatmul.mubr.f32.vlgmr.msra.gmra.mxu1 %v6356_v29  ;;  %556 = vmatprep.mubr.f32.mxu0 %v8091_v0 }
  0x59   : > { %648 = vmatprep.mubr.f32.mxu1 %v8091_v0  ;;  %808 = vmatpush1.msra.mxu1 %v6315_v12 }
  0x5a   : > { %1016 = vmatprep.subr.mxu1 %v1015_v3 }
  0x5b   : > { %559 = vmatmul.mubr.f32.gmra.mxu0 %v6347_v26 }
  0x5c   : > { %652 = vmatmul.mubr.f32.gmra.mxu1 %v6361_v32  ;;  %564 = vmatprep.mubr.f32.mxu0 %v8091_v0 }
  0x5d   : > { %657 = vmatprep.mubr.f32.mxu1 %v8091_v0 }
  0x5f   : > { %567 = vmatmul.mubr.f32.gmra.mxu0 %v6368_v34 }
  0x60   : > { %661 = vmatmul.mubr.f32.gmra.mxu1 %v6365_v33  ;;  %746 = vmatprep.mubr.f32.mxu0 %v8091_v0 }
  0x61   : > { %666 = vmatprep.mubr.f32.mxu1 %v8091_v0 }
  0x63   : > { %748 = vmatmul.mubr.f32.vlgmr.msra.gmra.mxu0 %v6317_v13 }
  0x64   : > { %670 = vmatmul.mubr.f32.gmra.mxu1 %v6394_v49  ;;  %753 = vmatprep.mubr.f32.mxu0 %v8091_v0 }
  0x65   : > { %841 = vmatprep.mubr.f32.mxu1 %v8091_v0  ;;  %903 = vmatpush1.msra.mxu0 %v6455_v2 }
  0x66   : > { %1116 = vmatprep.subr.mxu0 %v6420_v56 }
  0x67   : > { %755 = vmatmul.mubr.f32.gmra.mxu0 %v6319_v14 }
  0x68   : > { %843 = vmatmul.mubr.f32.vlgmr.msra.gmra.mxu1 %v6317_v13  ;;  %760 = vmatprep.mubr.f32.mxu0 %v8091_v0 }
  0x69   : > { %848 = vmatprep.mubr.f32.mxu1 %v8091_v0  ;;  %1022 = vmatpush1.msra.mxu1 %v1021_v7 }
  0x6a   : > { %1216 = vmatprep.subr.mxu1 %v6401_v51 }
  0x6b   : > { %762 = vmatmul.mubr.f32.gmra.mxu0 %v6323_v17 }
  0x6c   : > { %850 = vmatmul.mubr.f32.gmra.mxu1 %v6319_v14  ;;  %767 = vmatprep.mubr.f32.mxu0 %v8091_v0 }
  0x6d   : > { %855 = vmatprep.mubr.f32.mxu1 %v8091_v0 }
  0x6f   : > { %769 = vmatmul.mubr.f32.gmra.mxu0 %v6349_v27 }
  0x70   : > { %857 = vmatmul.mubr.f32.gmra.mxu1 %v6323_v17  ;;  %936 = vmatprep.mubr.f32.mxu0 %v8091_v0 }
  0x71   : > { %862 = vmatprep.mubr.f32.mxu1 %v8091_v0 }
  0x73   : > { %942 = vmatmul.mubr.f32.vlgmr.msra.gmra.mxu0 %v6385_v42 }
  0x74   : > { %864 = vmatmul.mubr.f32.gmra.mxu1 %v6349_v27  ;;  %947 = vmatprep.mubr.f32.mxu0 %v8091_v0 }
  0x75   : > { %1055 = vmatprep.mubr.f32.mxu1 %v8091_v0  ;;  %1119 = vmatpush1.msra.mxu0 %v1018_v4 }
  0x76   : > { %1321 = vmatprep.subr.mxu0 %v1013_v60 }
  0x77   : > { %953 = vmatmul.mubr.f32.gmra.mxu0 %v6389_v47 }
  0x78   : > { %1057 = vmatmul.mubr.f32.vlgmr.msra.gmra.mxu1 %v6317_v13  ;;  %958 = vmatprep.mubr.f32.mxu0 %v8091_v0 }
  0x79   : > { %1062 = vmatprep.mubr.f32.mxu1 %v8091_v0  ;;  %1218 = vmatpush1.msra.mxu1 %v6455_v2 }
  0x7a   : > { %1418 = vmatprep.subr.mxu1 %v6401_v51 }
  0x7b   : > { %964 = vmatmul.mubr.f32.gmra.mxu0 %v6408_v53 }
  0x7c   : > { %1064 = vmatmul.mubr.f32.gmra.mxu1 %v6319_v14  ;;  %969 = vmatprep.mubr.f32.mxu0 %v8091_v0 }
  0x7d   : > { %1069 = vmatprep.mubr.f32.mxu1 %v8091_v0 }
  0x7f   : > { %975 = vmatmul.mubr.f32.gmra.mxu0 %v6427_v58 }
  0x80   : > { %1071 = vmatmul.mubr.f32.gmra.mxu1 %v6323_v17  ;;  %1152 = vmatprep.mubr.f32.mxu0 %v8091_v0 }
  0x81   : > { %1076 = vmatprep.mubr.f32.mxu1 %v8091_v0 }
  0x83   : > { %1155 = vmatmul.mubr.f32.vlgmr.msra.gmra.mxu0 %v6335_v22 }
  0x84   : > { %1078 = vmatmul.mubr.f32.gmra.mxu1 %v6349_v27  ;;  %1160 = vmatprep.mubr.f32.mxu0 %v8091_v0 }
  0x85   : > { %1251 = vmatprep.mubr.f32.mxu1 %v8091_v0  ;;  %1325 = vmatpush1.msra.mxu0 %v1019_v5 }
  0x87   : > { %1163 = vmatmul.mubr.f32.gmra.mxu0 %v6341_v24 }
  0x88   : > { %1255 = vmatmul.mubr.f32.vlgmr.msra.gmra.mxu1 %v6356_v29  ;;  %1168 = vmatprep.mubr.f32.mxu0 %v8091_v0 }
  0x89   : > { %1260 = vmatprep.mubr.f32.mxu1 %v8091_v0  ;;  %1420 = vmatpush1.msra.mxu1 %v6455_v2 }
  0x8b   : > { %1171 = vmatmul.mubr.f32.gmra.mxu0 %v6347_v26 }
  0x8c   : > { %1264 = vmatmul.mubr.f32.gmra.mxu1 %v6361_v32  ;;  %1176 = vmatprep.mubr.f32.mxu0 %v8091_v0 }
  0x8d   : > { %1269 = vmatprep.mubr.f32.mxu1 %v8091_v0 }
  0x8f   : > { %1179 = vmatmul.mubr.f32.gmra.mxu0 %v6368_v34 }
  0x90   : > { %1273 = vmatmul.mubr.f32.gmra.mxu1 %v6365_v33  ;;  %1358 = vmatprep.mubr.f32.mxu0 %v8091_v0 }
  0x91   : > { %1278 = vmatprep.mubr.f32.mxu1 %v8091_v0 }
  0x93   : > { %1360 = vmatmul.mubr.f32.vlgmr.msra.gmra.mxu0 %v6317_v13 }
  0x94   : > { %1282 = vmatmul.mubr.f32.gmra.mxu1 %v6394_v49  ;;  %1365 = vmatprep.mubr.f32.mxu0 %v8091_v0 }
  0x95   : > { %1453 = vmatprep.mubr.f32.mxu1 %v8091_v0 }
  0x97   : > { %1367 = vmatmul.mubr.f32.gmra.mxu0 %v6319_v14 }
  0x98   : > { %1455 = vmatmul.mubr.f32.vlgmr.msra.gmra.mxu1 %v6317_v13  ;;  %1372 = vmatprep.mubr.f32.mxu0 %v8091_v0 }
  0x99   : > { %1460 = vmatprep.mubr.f32.mxu1 %v8091_v0 }
  0x9b   : > { %1374 = vmatmul.mubr.f32.gmra.mxu0 %v6323_v17 }
  0x9c   : > { %1462 = vmatmul.mubr.f32.gmra.mxu1 %v6319_v14  ;;  %1379 = vmatprep.mubr.f32.mxu0 %v8091_v0 }
  0x9d   : > { %1467 = vmatprep.mubr.f32.mxu1 %v8091_v0 }
  0x9f   : > { %1381 = vmatmul.mubr.f32.gmra.mxu0 %v6349_v27 }
  0xa0   : > { %1469 = vmatmul.mubr.f32.gmra.mxu1 %v6323_v17  ;;  %1603 = vmatprep.mubr.f32.mxu0 %v8091_v0 }
  0xa1   : > { %1474 = vmatprep.mubr.f32.mxu1 %v8091_v0 }
  0xa4   : > { %1476 = vmatmul.mubr.f32.gmra.mxu1 %v6349_v27 }
  0xa5   : > { %1752 = vmatprep.mubr.f32.mxu1 %v8091_v0 }
  0xb5   : > { %v6546_v48 = vpop.permute.xlu1 %219 }
  0xb6   : > { %v6544_v41 = vpop.permute.xlu0 %229 }
  0xb9   : > { %v6551_v60 = vpop.permute.xlu1 %214 }
  0xba   : > { %v6548_v52 = vpop.permute.xlu0 %224 }
 0x103   : > { %v331_v8 = vpop.f32.mrf.mxu0 }
 0x104   : > { %v332_v4 = vadd.f32 %v331_v8, %v6551_v60 }
 0x105   : > { %v333_v9 = vpop.f32.mrf.mxu0 }
 0x106   : > { %v334_v3 = vadd.f32 %v333_v9, %v6551_v60 }
 0x107   : > { %v342_v10 = vpop.f32.mrf.mxu0 }
 0x108   : > { %v446_v11 = vpop.f32.mrf.mxu1  ;;  %v343_v54 = vadd.f32 %v342_v10, %v6546_v48 }
 0x109   : > { %v344_v12 = vpop.f32.mrf.mxu0  ;;  %v447_v26 = vadd.f32 %v446_v11, %v332_v4 }
 0x10a   : > { %v448_v15 = vpop.f32.mrf.mxu1  ;;  %v345_v62 = vadd.f32 %v344_v12, %v6546_v48 }
 0x10b   : > { %v353_v16 = vpop.f32.mrf.mxu0  ;;  %v449_v32 = vadd.f32 %v448_v15, %v334_v3 }
 0x10c   : > { %v453_v18 = vpop.f32.mrf.mxu1  ;;  %v354_v61 = vadd.f32 %v353_v16, %v6548_v52 }
 0x10d   : > { %v355_v19 = vpop.f32.mrf.mxu0  ;;  %v454_v63 = vadd.f32 %v453_v18, %v343_v54 }
 0x10e   : > { %v455_v20 = vpop.f32.mrf.mxu1  ;;  %v356_v0 = vadd.f32 %v355_v19, %v6548_v52 }
 0x10f   : > { %v364_v21 = vpop.f32.mrf.mxu0  ;;  %v456_v5 = vadd.f32 %v455_v20, %v345_v62 }
 0x110   : > { %v460_v23 = vpop.f32.mrf.mxu1  ;;  %v365_v49 = vadd.f32 %v364_v21, %v6544_v41 }
 0x111   : > { %v366_v25 = vpop.f32.mrf.mxu0  ;;  %v461_v33 = vadd.f32 %v460_v23, %v354_v61 }
 0x112   : > { %v462_v28 = vpop.f32.mrf.mxu1  ;;  %v367_v62 = vadd.f32 %v366_v25, %v6544_v41 }
 0x113   : > { %v544_v31 = vpop.f32.mrf.mxu0  ;;  %v463_v54 = vadd.f32 %v462_v28, %v356_v0 }
 0x114   : > { %v467_v30 = vpop.f32.mrf.mxu1  ;;  %v545_v21 = vadd.f32 %v544_v31, %v447_v26 }
 0x115   : > { %v546_v36 = vpop.f32.mrf.mxu0 }
 0x116   : > { %v469_v35 = vpop.f32.mrf.mxu1  ;;  %v547_v9 = vadd.f32 %v546_v36, %v449_v32 }
 0x117   : > { %v552_v37 = vpop.f32.mrf.mxu0  ;;  %v470_v3 = vadd.f32 %v469_v35, %v367_v62 }
 0x118   : > { %v644_v38 = vpop.f32.mrf.mxu1  ;;  %v553_v6 = vadd.f32 %v552_v37, %v454_v63  ;;  %v468_v63 = vadd.f32 %v467_v30, %v365_v49 }
 0x119   : > { %v554_v39 = vpop.f32.mrf.mxu0  ;;  %v645_v32 = vadd.f32 %v644_v38, %v545_v21 }
 0x11a   : > { %v646_v40 = vpop.f32.mrf.mxu1  ;;  %v555_v16 = vadd.f32 %v554_v39, %v456_v5 }
 0x11b   : > { %v560_v43 = vpop.f32.mrf.mxu0  ;;  %v647_v23 = vadd.f32 %v646_v40, %v547_v9 }
 0x11c   : > { %v653_v44 = vpop.f32.mrf.mxu1  ;;  %v561_v29 = vadd.f32 %v560_v43, %v461_v33 }
 0x11d   : > { %v562_v45 = vpop.f32.mrf.mxu0  ;;  %v654_v34 = vadd.f32 %v653_v44, %v553_v6 }
 0x11e   : > { %v655_v46 = vpop.f32.mrf.mxu1  ;;  %v563_v19 = vadd.f32 %v562_v45, %v463_v54 }
 0x11f   : > { %v568_v50 = vpop.f32.mrf.mxu0  ;;  %v656_v27 = vadd.f32 %v655_v46, %v555_v16 }
 0x120   : > { %v662_v51 = vpop.f32.mrf.mxu1  ;;  %v569_v0 = vadd.f32 %v568_v50, %v468_v63 }
 0x121   : > { %v570_v55 = vpop.f32.mrf.mxu0  ;;  %v663_v24 = vadd.f32 %v662_v51, %v561_v29 }
 0x122   : > { %v664_v56 = vpop.f32.mrf.mxu1  ;;  %v571_v46 = vadd.f32 %v570_v55, %v470_v3 }
 0x123   : > { %v749_v59 = vpop.f32.mrf.mxu0  ;;  %v665_v33 = vadd.f32 %v664_v56, %v563_v19 }
 0x124   : > { %v671_v57 = vpop.f32.mrf.mxu1  ;;  %v750_v29 = vadd.f32 %v749_v59, %v645_v32  ;;  %v193_v59 = vld [vmem:[%s8086_s1 + $0x20] sm:$0xff] }
 0x125   : > { %v751_v2 = vpop.f32.mrf.mxu0  ;;  %v672_v25 = vadd.f32 %v671_v57, %v569_v0  ;;  %v1520_v5 = vsel %vm1518_vm2, %v193_v59, 0 }
 0x126   : > { %v673_v1 = vpop.f32.mrf.mxu1  ;;  %v752_v28 = vadd.f32 %v751_v2, %v647_v23  ;;  %v195_v23 = vld [vmem:[%s8086_s1 + $0x30] sm:$0xff] }
 0x127   : > { %v756_v7 = vpop.f32.mrf.mxu0  ;;  %v674_v40 = vadd.f32 %v673_v1, %v571_v46 }
 0x128   : > { %v844_v10 = vpop.f32.mrf.mxu1  ;;  %v757_v8 = vadd.f32 %v756_v7, %v654_v34 }
 0x129   : > { %v758_v12 = vpop.f32.mrf.mxu0  ;;  %v845_v50 = vadd.f32 %v844_v10, %v750_v29  ;;  %v196_v29 = vld [vmem:[%s8086_s1 + $0x38] sm:$0xff] }
 0x12a   : > { %v846_v18 = vpop.f32.mrf.mxu1  ;;  %v759_v15 = vadd.f32 %v758_v12, %v656_v27  ;;  %v6580_v12 = vand.u32 4294901760, %v1520_v5 }
 0x12b   : > { %v763_v20 = vpop.f32.mrf.mxu0  ;;  %v847_v26 = vadd.f32 %v846_v18, %v752_v28  ;;  %v194_v18 = vld [vmem:[%s8086_s1 + $0x28] sm:$0xff] }
 0x12c   : > { %v851_v37 = vpop.f32.mrf.mxu1  ;;  %v764_v11 = vadd.f32 %v763_v20, %v663_v24  ;;  %8222 = vst [vmem:[#allocation24_spill] sm:$0xff] %v6580_v12  ;;  %v1523_v20 = vsel %vm1518_vm2, %v194_v18, 0  ;;  %v6595_v19 = vsub.f32 %v1520_v5, %v6580_v12  ;;  %v1529_v18 = vsel %vm1518_vm2, %v196_v29, 0 }
 0x12d   : > { %v852_v39 = vadd.f32 %v851_v37, %v757_v8  ;;  %v765_v44 = vpop.f32.mrf.mxu0 }
 0x12e   : > { %v853_v61 = vpop.f32.mrf.mxu1  ;;  %v766_v49 = vadd.f32 %v765_v44, %v665_v33  ;;  %8223 = vst [vmem:[#allocation25_spill] sm:$0xff] %v6595_v19 }
 0x12f   : > { %v854_v34 = vadd.f32 %v853_v61, %v759_v15  ;;  %v770_v36 = vpop.f32.mrf.mxu0  ;;  %5939 = vtanh.f32 %v852_v39  ;;  %v6604_v61 = vand.u32 4294901760, %v1523_v20 }
 0x130   : > { %v858_v43 = vpop.f32.mrf.mxu1  ;;  %v771_v45 = vadd.f32 %v770_v36, %v672_v25  ;;  %v6617_v36 = vand.u32 4294901760, %v6595_v19 }
 0x131   : > { %v859_v30 = vadd.f32 %v858_v43, %v764_v11  ;;  %v772_v27 = vpop.f32.mrf.mxu0  ;;  %8224 = vst [vmem:[#allocation26_spill] sm:$0xff] %v6604_v61  ;;  %v1526_v43 = vsel %vm1518_vm2, %v195_v23, 0 }
 0x132   : > { %v860_v31 = vpop.f32.mrf.mxu1  ;;  %v773_v51 = vadd.f32 %v772_v27, %v674_v40  ;;  %8225 = vst [vmem:[#allocation27_spill] sm:$0xff] %v6617_v36 }
 0x133   : > { %5941 = vtanh.f32 %v859_v30  ;;  %v861_v35 = vadd.f32 %v860_v31, %v766_v49  ;;  %v6560_v38 = vpop.f32.mrf.mxu0 }
 0x134   : > { %5943 = vtanh.f32 %v854_v34  ;;  %v865_v24 = vpop.f32.mrf.mxu1 }
 0x135   : > { %5945 = vtanh.f32 %v861_v35  ;;  %v866_v55 = vadd.f32 %v865_v24, %v771_v45  ;;  %v6562_v57 = vpop.f32.mrf.mxu0  ;;  %v6637_v45 = vsub.f32 %v1523_v20, %v6604_v61 }
 0x136   : > { %5947 = vtanh.f32 %v847_v26  ;;  %v867_v56 = vpop.f32.mrf.mxu1 }
 0x137   : > { %5949 = vtanh.f32 %v866_v55  ;;  %v868_v1 = vadd.f32 %v867_v56, %v773_v51  ;;  %v6567_v2 = vpop.f32.mrf.mxu0  ;;  %8229 = vst [vmem:[#allocation31_spill] sm:$0xff] %v6637_v45  ;;  %v6647_v51 = vand.u32 4294901760, %v1526_v43 }
 0x138   : > { %5951 = vtanh.f32 %v845_v50  ;;  %v6569_v4 = vpop.f32.mrf.mxu1 }
 0x139   : > { %5953 = vtanh.f32 %v868_v1  ;;  %v6572_v6 = vpop.f32.mrf.mxu0  ;;  %8230 = vst [vmem:[#allocation32_spill] sm:$0xff] %v6647_v51  ;;  %v1607_v1 = vsub.f32 %v6595_v19, %v6617_v36 }
 0x13a   : > { %v6574_v7 = vpop.f32.mrf.mxu1 }
 0x13b   : > { %v6576_v10 = vpop.f32.mrf.mxu0 }
 0x13c   : > { %v6578_v16 = vpop.f32.mrf.mxu1  ;;  %v5940_v8 = vpop.eup %5939 }
 0x13d   : > { %v6585_v54 = vpop.f32.mrf.mxu0  ;;  %v6622_v49 = vand.u32 4294901760, %v5940_v8 }
 0x13e   : > { %v6587_v9 = vpop.f32.mrf.mxu1 }
 0x13f   : > { %v6590_v62 = vpop.f32.mrf.mxu0  ;;  %8226 = vst [vmem:[#allocation28_spill] sm:$0xff] %v6622_v49 }
 0x140   : > { %v5942_v37 = vpop.eup %5941  ;;  %v6592_v63 = vpop.f32.mrf.mxu1 }
 0x141   : > { %v5944_v21 = vpop.eup %5943  ;;  %v6600_v39 = vpop.f32.mrf.mxu0  ;;  %v6608_v33 = vand.u32 4294901760, %v5942_v37 }
 0x142   : > { %v5946_v15 = vpop.eup %5945  ;;  %v6602_v44 = vpop.f32.mrf.mxu1  ;;  %v6614_v34 = vand.u32 4294901760, %v5944_v21 }
 0x143   : > { %v5948_v3 = vpop.eup %5947  ;;  %v6606_v0 = vand.u32 4294901760, %v5946_v15  ;;  %v6612_v28 = vpop.f32.mrf.mxu0  ;;  %v6645_v24 = vsub.f32 %v5942_v37, %v6608_v33  ;;  %v6687_v37 = vand.u32 4294901760, %v1529_v18 }
 0x144   : > { %v5950_v11 = vpop.eup %5949  ;;  %v6610_v32 = vpop.f32.mrf.mxu1  ;;  %v6634_v40 = vand.u32 4294901760, %v5948_v3  ;;  %v6658_v5 = vsub.f32 %v5944_v21, %v6614_v34  ;;  %v6676_v21 = vand.u32 4294901760, %v6637_v45 }
 0x145   : > { %v5952_v46 = vpop.eup %5951  ;;  %v6620_v25 = vand.u32 4294901760, %v5950_v11  ;;  %v6625_v30 = vsub.f32 %v5946_v15, %v6606_v0  ;;  %v6632_v31 = vpop.f32.mrf.mxu0  ;;  %v6668_v15 = vsub.f32 %v5940_v8, %v6622_v49  ;;  %v6685_v8 = vsub.f32 %v1526_v43, %v6647_v51  ;;  %8235 = vst [vmem:[#allocation37_spill] sm:$0xff] %v6687_v37 }
 0x146   : > { %v5954_v26 = vpop.eup %5953  ;;  %v6630_v27 = vpop.f32.mrf.mxu1  ;;  %8228 = vst [vmem:[#allocation30_spill] sm:$0xff] %v6634_v40  ;;  %v6653_v59 = vand.u32 4294901760, %v5952_v46  ;;  %8233 = vst [vmem:[#allocation35_spill] sm:$0xff] %v6676_v21  ;;  %v6679_v29 = vsub.f32 %v5948_v3, %v6634_v40  ;;  %v6702_v43 = vand.u32 4294901760, %v1607_v1  ;;  %v8241_v51 = vand.u32 4294901760, %v6645_v24 }
 0x147   : > { %8227 = vst [vmem:[#allocation29_spill] sm:$0xff] %v6625_v30  ;;  %v6639_v35 = vand.u32 4294901760, %v5954_v26  ;;  %v6642_v50 = vsub.f32 %v5950_v11, %v6620_v25  ;;  %v6649_v55 = vpop.f32.mrf.mxu0  ;;  %8234 = vst [vmem:[#allocation36_spill] sm:$0xff] %v6685_v8  ;;  %v8240_v47 = vand.u32 4294901760, %v6625_v30  ;;  %v6724_v36 = vand.u32 4294901760, %v6685_v8 }
 0x148   : > { %v6651_v56 = vpop.f32.mrf.mxu1  ;;  %8232 = vst [vmem:[#allocation34_spill] sm:$0xff] %v6653_v59  ;;  %8238 = vst [vmem:[#allocation39_spill] sm:$0xff] %v6702_v43 }
 0x149   : > { %8231 = vst [vmem:[#allocation33_spill] sm:$0xff] %v6651_v56  ;;  %1556 = vmatprep.subr.mxu0 %v6639_v35  ;;  %v6663_v20 = vsub.f32 %v5954_v26, %v6639_v35  ;;  %v6670_v11 = vpop.f32.mrf.mxu0  ;;  %v8237_v3 = vand.u32 4294901760, %v6642_v50  ;;  %v6699_v26 = vsub.f32 %v5952_v46, %v6653_v59  ;;  %v1687_v42 = vsub.f32 %v6625_v30, %v8240_v47 }
 0x14a   : > { %v6672_v17 = vpop.f32.mrf.mxu1  ;;  %1558 = vmatpush1.msra.mxu0 %v6620_v25  ;;  %v1618_v46 = vsub.f32 %v6637_v45, %v6676_v21  ;;  %v1693_v47 = vsub.f32 %v6645_v24, %v8241_v51  ;;  %8242 = vst [vmem:[#allocation40_spill] sm:$0xff] %v6724_v36  ;;  %v6727_v56 = vsub.f32 %v1529_v18, %v6687_v37  ;;  %v8244_v21 = vand.u32 4294901760, %v6658_v5 }
 0x14b   : > { %1560 = vmatprep.subr.mxu0 %v6606_v0  ;;  %v6689_v22 = vpop.f32.mrf.mxu0  ;;  %v1681_v58 = vsub.f32 %v6642_v50, %v8237_v3  ;;  %v8239_v23 = vand.u32 4294901760, %v6663_v20  ;;  %v1688_v51 = vand.u32 4294901760, %v1687_v42  ;;  %v8245_v18 = vand.u32 4294901760, %v6668_v15 }
 0x14c   : > { %v6691_v14 = vpop.f32.mrf.mxu1  ;;  %1562 = vmatpush1.msra.mxu0 %v6608_v33  ;;  %8243 = vst [vmem:[#allocation41_spill] sm:$0xff] %v6727_v56  ;;  %v1694_v42 = vand.u32 4294901760, %v1693_v47 }
 0x14d   : > { %8236 = vst [vmem:[#allocation38_spill] sm:$0xff] %v6691_v14  ;;  %1564 = vmatprep.subr.mxu0 %v6614_v34  ;;  %v1675_v53 = vsub.f32 %v6663_v20, %v8239_v23  ;;  %v6711_v3 = vpop.f32.mrf.mxu0  ;;  %v1682_v1 = vand.u32 4294901760, %v1681_v58  ;;  %v1705_v37 = vsub.f32 %v6668_v15, %v8245_v18  ;;  %v6747_v58 = vand.u32 4294901760, %v1618_v46 }
 0x14e   : > { %v6713_v13 = vpop.f32.mrf.mxu1  ;;  %1566 = vmatpush1.msra.mxu0 %v6622_v49  ;;  %v6756_v18 = vand.u32 4294901760, %v6727_v56 }
 0x14f   : > { %1568 = vmatprep.subr.mxu0 %v6634_v40  ;;  %v1676_v23 = vand.u32 4294901760, %v1675_v53  ;;  %v6729_v19 = vpop.f32.mrf.mxu0  ;;  %v1699_v53 = vsub.f32 %v6658_v5, %v8244_v21  ;;  %8246 = vst [vmem:[#allocation42_spill] sm:$0xff] %v6747_v58  ;;  %v8247_v21 = vand.u32 4294901760, %v6679_v29  ;;  %v1706_v47 = vand.u32 4294901760, %v1705_v37 }
 0x150   : > { %v6731_v14 = vpop.f32.mrf.mxu1  ;;  %1570 = vmatpush1.msra.mxu0 %v6653_v59  ;;  %8248 = vst [vmem:[#allocation43_spill] sm:$0xff] %v6756_v18  ;;  %v946_v37 = vadd.f32 %v6562_v57, %v6551_v60  ;;  %v968_v57 = vadd.f32 %v6585_v54, %v6548_v52  ;;  %v979_v54 = vadd.f32 %v6600_v39, %v6544_v41 }
 0x151   : > { %1609 = vmatmul.mubr.f32.vlgmr.msra.gmra.mxu0 %v6702_v43  ;;  %1677 = vmatprep.subr.mxu1 %v1676_v23  ;;  %v6743_v40 = vpop.f32.mrf.mxu0  ;;  %v1711_v45 = vsub.f32 %v6679_v29, %v8247_v21  ;;  %v1629_v23 = vsub.f32 %v6685_v8, %v6724_v36  ;;  %v1700_v49 = vand.u32 4294901760, %v1699_v53  ;;  %v8251_v21 = vand.u32 4294901760, %v6699_v26 }
 0x152   : > { %1807 = vmatprep.subr.mxu0 %v6663_v20  ;;  %v6745_v59 = vpop.f32.mrf.mxu1  ;;  %1683 = vmatpush1.msra.mxu1 %v1682_v1  ;;  %v8250_v1 = vmov 0.0  }
 0x153   : > { %1810 = vmatpush1.msra.mxu0 %v6642_v50  ;;  %1689 = vmatprep.subr.mxu1 %v1688_v51  ;;  %v6761_v46 = vpop.f32.mrf.mxu0  ;;  %v1717_v51 = vsub.f32 %v6699_v26, %v8251_v21  ;;  %v6776_v53 = vand.u32 4294901760, %v1629_v23 }
 0x154   : > { %1813 = vmatprep.subr.mxu0 %v6625_v30  ;;  %v6759_v43 = vpop.f32.mrf.mxu1  ;;  %8249 = vst [vmem:[#allocation44_spill] sm:$0xff] %v6761_v46  ;;  %1614 = vmatprep.mubr.f32.mxu0 %v8250_v1  ;;  %v1712_v30 = vand.u32 4294901760, %v1711_v45  ;;  %v944_v46 = vadd.f32 %v6560_v38, %v6551_v60  ;;  %v966_v45 = vadd.f32 %v6576_v10, %v6548_v52 }
 0x155   : > { %1695 = vmatpush1.msra.mxu1 %v1694_v42  ;;  %1816 = vmatpush1.msra.mxu0 %v6645_v24  ;;  %v6771_v8 = vpop.f32.mrf.mxu0  ;;  %v1640_v42 = vsub.f32 %v6727_v56, %v6756_v18  ;;  %v1718_v23 = vand.u32 4294901760, %v1717_v51  ;;  %v977_v10 = vadd.f32 %v6590_v62, %v6544_v41  ;;  %v1075_v51 = vadd.f32 %v6602_v44, %v968_v57  ;;  %v8254_v57 = vld [vmem:[#allocation28_spill] sm:$0xff] }
 0x156   : > { %1620 = vmatmul.mubr.f32.gmra.mxu0 %v6747_v58  ;;  %1701 = vmatprep.subr.mxu1 %v1700_v49  ;;  %v6769_v36 = vpop.f32.mrf.mxu1  ;;  %v955_v49 = vadd.f32 %v6567_v2, %v6546_v48  ;;  %v957_v58 = vadd.f32 %v6572_v6, %v6546_v48  ;;  %v1061_v2 = vadd.f32 %v6574_v7, %v946_v37 }
 0x157   : > { %1819 = vmatprep.subr.mxu0 %v6658_v5  ;;  %1707 = vmatpush1.msra.mxu1 %v1706_v47  ;;  %v6787_v38 = vpop.f32.mrf.mxu0  ;;  %v1059_v47 = vadd.f32 %v6569_v4, %v944_v46  ;;  %v6811_v7 = vand.u32 4294901760, %v1640_v42  ;;  %v1175_v42 = vadd.f32 %v6711_v3, %v1075_v51 }
 0x158   : > { %1822 = vmatpush1.msra.mxu0 %v6668_v15  ;;  %1713 = vmatprep.subr.mxu1 %v1712_v30  ;;  %v6789_v21 = vpop.f32.mrf.mxu1  ;;  %v1073_v30 = vadd.f32 %v6592_v63, %v966_v45  ;;  %v1066_v6 = vadd.f32 %v6578_v16, %v955_v49  ;;  %v1068_v62 = vadd.f32 %v6587_v9, %v957_v58  ;;  %v8253_v16 = vand.u32 4294901760, %v6663_v20 }
 0x159   : > { %1825 = vmatprep.subr.mxu0 %v6679_v29  ;;  %1625 = vmatprep.mubr.f32.mxu0 %v8250_v1  ;;  %v1370_v4 = vpop.f32.mrf.mxu0  ;;  %8252 = vst [vmem:[#allocation45_spill] sm:$0xff] %v6811_v7  ;;  %v1080_v63 = vadd.f32 %v6610_v32, %v977_v10  ;;  %v1157_v44 = vadd.f32 %v6612_v28, %v1059_v47 }
 0x15a   : > { %1719 = vmatpush1.msra.mxu1 %v1718_v23  ;;  %1828 = vmatpush1.msra.mxu0 %v6699_v26  ;;  %v6803_v46 = vpop.f32.mrf.mxu1  ;;  %v1173_v37 = vadd.f32 %v6689_v22, %v1073_v30  ;;  %v1082_v45 = vadd.f32 %v6630_v27, %v979_v54  ;;  %v1159_v9 = vadd.f32 %v6632_v31, %v1061_v2  ;;  %v8255_v2 = vld [vmem:[#allocation38_spill] sm:$0xff] }
 0x15b   : > { %1631 = vmatmul.mubr.f32.gmra.mxu0 %v6776_v53  ;;  %1754 = vmatmul.mubr.f32.vlgmr.msra.gmra.mxu1 %v6580_v12  ;;  %v1375_v39 = vpop.f32.mrf.mxu0  ;;  %v1167_v22 = vadd.f32 %v6670_v11, %v1068_v62  ;;  %v1165_v27 = vadd.f32 %v6649_v55, %v1066_v6  ;;  %v1181_v3 = vadd.f32 %v6729_v19, %v1080_v63  ;;  %v8257_v62 = vld [vmem:[#allocation34_spill] sm:$0xff] }
 0x15c   : > { %1919 = vmatprep.subr.mxu1 %v6639_v35  ;;  %2030 = vmatprep.subr.mxu0 %v8253_v16  ;;  %v1463_v49 = vpop.f32.mrf.mxu1  ;;  %v1275_v32 = vadd.f32 %v6731_v14, %v1173_v37  ;;  %v1277_v58 = vadd.f32 %v6745_v59, %v1175_v42  ;;  %v1259_v31 = vadd.f32 %v6672_v17, %v1159_v9  ;;  %v8259_v37 = vld [vmem:[#allocation33_spill] sm:$0xff]  ;;  %v8261_v42 = vand.u32 4294901760, %v6642_v50 }
 0x15d   : > { %1921 = vmatpush1.msra.mxu1 %v6620_v25  ;;  %1636 = vmatprep.mubr.f32.mxu0 %v8250_v1  ;;  %v1377_v20 = vpop.f32.mrf.mxu0  ;;  %v1268_v14 = vadd.f32 %v6713_v13, %v1167_v22  ;;  %v1183_v55 = vadd.f32 %v6743_v40, %v1082_v45  ;;  %v1284_v19 = vadd.f32 %v6759_v43, %v1181_v3  ;;  %v8256_v13 = vld [vmem:[#allocation30_spill] sm:$0xff]  ;;  %v8258_v43 = vld [vmem:[#allocation25_spill] sm:$0xff]  ;;  %v8260_v45 = vld [vmem:[#allocation32_spill] sm:$0xff] }
 0x15e   : > { %1923 = vmatprep.subr.mxu1 %v6606_v0  ;;  %1759 = vmatprep.mubr.f32.mxu1 %v8250_v1  ;;  %v1465_v28 = vpop.f32.mrf.mxu1  ;;  %v1376_v11 = vadd.f32 %v1375_v39, %v1275_v32  ;;  %v1378_v59 = vadd.f32 %v1377_v20, %v1277_v58  ;;  %v1266_v17 = vadd.f32 %v8255_v2, %v1165_v27  ;;  %v8262_v32 = vld [vmem:[#allocation29_spill] sm:$0xff] }
 0x15f   : > { %1925 = vmatpush1.msra.mxu1 %v6608_v33  ;;  %1642 = vmatmul.mubr.f32.gmra.mxu0 %v6811_v7  ;;  %v1382_v23 = vpop.f32.mrf.mxu0  ;;  %v1371_v10 = vadd.f32 %v1370_v4, %v1268_v14  ;;  %v1286_v51 = vadd.f32 %v6769_v36, %v1183_v55  ;;  %v1257_v16 = vadd.f32 %v8259_v37, %v1157_v44  ;;  %v8263_v20 = vand.u32 4294901760, %v8262_v32  ;;  %v8264_v44 = vld [vmem:[#allocation44_spill] sm:$0xff]  ;;  %v8268_v14 = vld [vmem:[#allocation31_spill] sm:$0xff] }
 0x160   : > { %1761 = vmatmul.mubr.f32.gmra.mxu1 %v6604_v61  ;;  %1927 = vmatprep.subr.mxu1 %v6614_v34  ;;  %v1470_v47 = vpop.f32.mrf.mxu1  ;;  %v1383_v40 = vadd.f32 %v1382_v23, %v1284_v19  ;;  %v1369_v39 = vadd.f32 %v6787_v38, %v1266_v17  ;;  %v1364_v22 = vadd.f32 %v6771_v8, %v1259_v31 }
 0x161   : > { %1929 = vmatpush1.msra.mxu1 %v8254_v57  ;;  %1766 = vmatprep.mubr.f32.mxu1 %v8250_v1  ;;  %v1471_v30 = vadd.f32 %v1470_v47, %v1376_v11  ;;  %v1384_v6 = vpop.f32.mrf.mxu0  ;;  %v1466_v4 = vadd.f32 %v1465_v28, %v1371_v10  ;;  %v1362_v3 = vadd.f32 %v8264_v44, %v1257_v16  ;;  %v8265_v28 = vand.u32 4294901760, %v6645_v24  ;;  %v8273_v11 = vld [vmem:[#allocation27_spill] sm:$0xff] }
 0x162   : > { %1931 = vmatprep.subr.mxu1 %v8256_v13  ;;  %1861 = vmatprep.mubr.f32.mxu0 %v8250_v1  ;;  %v1472_v54 = vpop.f32.mrf.mxu1  ;;  %v1385_v36 = vadd.f32 %v1384_v6, %v1286_v51  ;;  %v1464_v38 = vadd.f32 %v1463_v49, %v1369_v39  ;;  %v1459_v8 = vadd.f32 %v6803_v46, %v1364_v22  ;;  %v8267_v49 = vld [vmem:[#allocation37_spill] sm:$0xff]  ;;  %v8269_v24 = vand.u32 4294901760, %v6668_v15  ;;  %v8274_v15 = vld [vmem:[#allocation35_spill] sm:$0xff] }
 0x163   : > { %1933 = vmatpush1.msra.mxu1 %v8257_v62  ;;  %1864 = vmatmul.mubr.f32.vlgmr.msra.gmra.mxu0 %v8258_v43  ;;  %v1473_v63 = vadd.f32 %v1472_v54, %v1378_v59  ;;  %v1457_v31 = vadd.f32 %v6789_v21, %v1362_v3  ;;  %v8270_v46 = vand.u32 4294901760, %v6679_v29  ;;  %v8272_v21 = vld [vmem:[#allocation36_spill] sm:$0xff] }
 0x164   : > { %1768 = vmatmul.mubr.f32.gmra.mxu1 %v8260_v45  ;;  %2034 = vmatpush1.msra.mxu0 %v8261_v42  ;;  %v1477_v9 = vpop.f32.mrf.mxu1 }
 0x165   : > { %2145 = vmatprep.subr.mxu1 %v6639_v35  ;;  %5955 = vtanh.f32 %v1473_v63  ;;  %2038 = vmatprep.subr.mxu0 %v8263_v20  ;;  %v1478_v27 = vadd.f32 %v1477_v9, %v1383_v40  ;;  %v8266_v35 = vand.u32 4294901760, %v6658_v5  ;;  %v8271_v5 = vand.u32 4294901760, %v6699_v26 }
 0x166   : > { %5957 = vtanh.f32 %v1471_v30  ;;  %2042 = vmatpush1.msra.mxu0 %v8265_v28  ;;  %1773 = vmatprep.mubr.f32.mxu1 %v8250_v1  ;;  %v1479_v50 = vpop.f32.mrf.mxu1  ;;  %v8276_v28 = vld [vmem:[#allocation39_spill] sm:$0xff] }
 0x167   : > { %5959 = vtanh.f32 %v1478_v27  ;;  %1869 = vmatprep.mubr.f32.mxu0 %v8250_v1  ;;  %2046 = vmatprep.subr.mxu0 %v8266_v35  ;;  %v1480_v58 = vadd.f32 %v1479_v50, %v1385_v36 }
 0x168   : > { %5961 = vtanh.f32 %v1466_v4  ;;  %1775 = vmatmul.mubr.f32.gmra.mxu1 %v8267_v49  ;;  %1872 = vmatmul.mubr.f32.gmra.mxu0 %v8268_v14 }
 0x169   : > { %2050 = vmatpush1.msra.mxu0 %v8269_v24  ;;  %5963 = vtanh.f32 %v1480_v58  ;;  %1877 = vmatprep.mubr.f32.mxu0 %v8250_v1 }
 0x16a   : > { %5965 = vtanh.f32 %v1464_v38  ;;  %2054 = vmatprep.subr.mxu0 %v8270_v46  ;;  %1966 = vmatprep.mubr.f32.mxu1 %v8250_v1 }
 0x16b   : > { %5967 = vtanh.f32 %v1459_v8  ;;  %2058 = vmatpush1.msra.mxu0 %v8271_v5 }
 0x16c   : > { %5969 = vtanh.f32 %v1457_v31  ;;  %1880 = vmatmul.mubr.f32.gmra.mxu0 %v8272_v21  ;;  %1970 = vmatmul.mubr.f32.vlgmr.msra.gmra.mxu1 %v8273_v11 }
 0x16d   : > { %2147 = vmatpush1.msra.mxu1 %v6620_v25  ;;  %1885 = vmatprep.mubr.f32.mxu0 %v8250_v1 }
 0x16e   : > { %2149 = vmatprep.subr.mxu1 %v6606_v0  ;;  %1975 = vmatprep.mubr.f32.mxu1 %v8250_v1 }
 0x16f   : > { %2151 = vmatpush1.msra.mxu1 %v6608_v33 }
 0x170   : > { %2153 = vmatprep.subr.mxu1 %v6614_v34  ;;  %1888 = vmatmul.mubr.f32.gmra.mxu0 %v6727_v56  ;;  %v8275_v34 = vld [vmem:[#allocation40_spill] sm:$0xff] }
 0x171   : > { %1979 = vmatmul.mubr.f32.gmra.mxu1 %v8274_v15  ;;  %2091 = vmatprep.mubr.f32.mxu0 %v8250_v1 }
 0x172   : > { %v5956_v29 = vpop.eup %5955  ;;  %2155 = vmatpush1.msra.mxu1 %v8254_v57  ;;  %1984 = vmatprep.mubr.f32.mxu1 %v8250_v1 }
 0x173   : > { %v5958_v25 = vpop.eup %5957  ;;  %2157 = vmatprep.subr.mxu1 %v8256_v13  ;;  %v6896_v23 = vand.u32 4294901760, %v5956_v29 }
 0x174   : > { %v5960_v0 = vpop.eup %5959  ;;  %2159 = vmatpush1.msra.mxu1 %v8257_v62  ;;  %2093 = vmatmul.mubr.f32.vlgmr.msra.gmra.mxu0 %v6580_v12  ;;  %v6901_v59 = vand.u32 4294901760, %v5958_v25 }
 0x175   : > { %v5962_v33 = vpop.eup %5961  ;;  %1988 = vmatmul.mubr.f32.gmra.mxu1 %v8275_v34  ;;  %2098 = vmatprep.mubr.f32.mxu0 %v8250_v1  ;;  %v6894_v26 = vand.u32 4294901760, %v5960_v0  ;;  %v6915_v30 = vsub.f32 %v5956_v29, %v6896_v23 }
 0x176   : > { %v5964_v47 = vpop.eup %5963  ;;  %1993 = vmatprep.mubr.f32.mxu1 %v8250_v1  ;;  %v6909_v10 = vand.u32 4294901760, %v5962_v33  ;;  %v6926_v40 = vsub.f32 %v5958_v25, %v6901_v59  ;;  %v8277_v25 = vld [vmem:[#allocation42_spill] sm:$0xff] }
 0x177   : > { %v5966_v55 = vpop.eup %5965  ;;  %v6899_v19 = vand.u32 4294901760, %v5964_v47  ;;  %v6905_v2 = vsub.f32 %v5960_v0, %v6894_v26  ;;  %v2376_v16 = vand.u32 4294901760, %v6915_v30 }
 0x178   : > { %v5968_v57 = vpop.eup %5967  ;;  %2100 = vmatmul.mubr.f32.gmra.mxu0 %v6604_v61  ;;  %v6919_v6 = vand.u32 4294901760, %v5966_v55  ;;  %v6940_v39 = vsub.f32 %v5962_v33, %v6909_v10  ;;  %v2382_v42 = vand.u32 4294901760, %v6926_v40 }
 0x179   : > { %v5970_v17 = vpop.eup %5969  ;;  %1997 = vmatmul.mubr.f32.gmra.mxu1 %v6756_v18  ;;  %2105 = vmatprep.mubr.f32.mxu0 %v8250_v1  ;;  %v6912_v13 = vsub.f32 %v5964_v47, %v6899_v19  ;;  %v6922_v54 = vand.u32 4294901760, %v5968_v57  ;;  %v2370_v63 = vand.u32 4294901760, %v6905_v2  ;;  %v2377_v20 = vsub.f32 %v6915_v30, %v2376_v16 }
 0x17a   : > { %2192 = vmatprep.mubr.f32.mxu1 %v8250_v1  ;;  %2246 = vmatprep.subr.mxu0 %v6899_v19  ;;  %v6930_v62 = vand.u32 4294901760, %v5970_v17  ;;  %v6945_v4 = vsub.f32 %v5966_v55, %v6919_v6  ;;  %v2388_v27 = vand.u32 4294901760, %v6940_v39  ;;  %v2383_v3 = vsub.f32 %v6926_v40, %v2382_v42  ;;  %v5874_v55 = vld [vmem:[%s6288_s9 + $0x10] sm:$0x77] }
 0x17b   : > { %2248 = vmatpush1.msra.mxu0 %v6894_v26  ;;  %v2364_v51 = vand.u32 4294901760, %v6912_v13  ;;  %v6950_v9 = vsub.f32 %v5968_v57, %v6922_v54  ;;  %v2371_v36 = vsub.f32 %v6905_v2, %v2370_v63  ;;  %v2378_v35 = vand.u32 4294901760, %v2377_v20  ;;  %v8284_v20 = vld [vmem:[#allocation11_spill] sm:$0xff] }
 0x17c   : > { %2107 = vmatmul.mubr.f32.gmra.mxu0 %v8260_v45  ;;  %2250 = vmatprep.subr.mxu0 %v6896_v23  ;;  %v6957_v32 = vsub.f32 %v5970_v17, %v6930_v62  ;;  %v2394_v44 = vand.u32 4294901760, %v6945_v4  ;;  %v2389_v58 = vsub.f32 %v6940_v39, %v2388_v27  ;;  %v2384_v24 = vand.u32 4294901760, %v2383_v3 }
 0x17d   : > { %2194 = vmatmul.mubr.f32.vlgmr.msra.gmra.mxu1 %v6580_v12  ;;  %2112 = vmatprep.mubr.f32.mxu0 %v8250_v1  ;;  %v2365_v37 = vsub.f32 %v6912_v13, %v2364_v51  ;;  %v2400_v38 = vand.u32 4294901760, %v6950_v9  ;;  %v2372_v50 = vand.u32 4294901760, %v2371_v36  ;;  %v3047_v57 = vcombine.high %v5874_v55, %v5874_v55  ;;  %v8283_v36 = vld [vmem:[#allocation9_spill] sm:$0xff] }
 0x17e   : > { %2199 = vmatprep.mubr.f32.mxu1 %v8250_v1  ;;  %2252 = vmatpush1.msra.mxu0 %v6901_v59  ;;  %v2406_v8 = vand.u32 4294901760, %v6957_v32  ;;  %v2395_v31 = vsub.f32 %v6945_v4, %v2394_v44  ;;  %v2390_v29 = vand.u32 4294901760, %v2389_v58  ;;  %v8288_v58 = vld [vmem:[#allocation13_spill] sm:$0xff] }
 0x17f   : > { %2254 = vmatprep.subr.mxu0 %v6909_v10  ;;  %v2366_v22 = vand.u32 4294901760, %v2365_v37  ;;  %v2401_v46 = vsub.f32 %v6950_v9, %v2400_v38  ;;  %v3051_v17 = vsel %vm249_vm0, %v3047_v57, 0  ;;  %v8279_v37 = vld [vmem:[#allocation20_spill] sm:$0xff] }
 0x180   : > { %2114 = vmatmul.mubr.f32.gmra.mxu0 %v8267_v49  ;;  %v2407_v5 = vsub.f32 %v6957_v32, %v2406_v8  ;;  %v2396_v0 = vand.u32 4294901760, %v2395_v31  ;;  %v8289_v31 = vld [vmem:[#allocation15_spill] sm:$0xff] }
 0x181   : > { %2201 = vmatmul.mubr.f32.gmra.mxu1 %v6604_v61  ;;  %2256 = vmatpush1.msra.mxu0 %v6919_v6  ;;  %v2402_v33 = vand.u32 4294901760, %v2401_v46  ;;  %v8290_v46 = vld [vmem:[#allocation18_spill] sm:$0xff] }
 0x182   : > { %2258 = vmatprep.subr.mxu0 %v6922_v54  ;;  %2206 = vmatprep.mubr.f32.mxu1 %v8250_v1  ;;  %v2408_v47 = vand.u32 4294901760, %v2407_v5  ;;  %v8291_v5 = vld [vmem:[#allocation16_spill] sm:$0xff] }
 0x183   : > { %2260 = vmatpush1.msra.mxu0 %v6930_v62  ;;  %2293 = vmatprep.mubr.f32.mxu0 %v8250_v1 }
 0x184   : > { %2299 = vmatmul.mubr.f32.vlgmr.msra.gmra.mxu0 %v8276_v28  ;;  %2367 = vmatprep.subr.mxu1 %v2366_v22  ;;  %v8282_v22 = vld [vmem:[#allocation23_spill] sm:$0xff] }
 0x185   : > { %2208 = vmatmul.mubr.f32.gmra.mxu1 %v8260_v45  ;;  %2497 = vmatprep.subr.mxu0 %v6912_v13  ;;  %v7024_v13 = vand.u32 4294901760, %v3051_v17 }
 0x186   : > { %2373 = vmatpush1.msra.mxu1 %v2372_v50  ;;  %2500 = vmatpush1.msra.mxu0 %v6905_v2  ;;  %v8287_v50 = vld [vmem:[#allocation14_spill] sm:$0xff] }
 0x187   : > { %2379 = vmatprep.subr.mxu1 %v2378_v35  ;;  %2503 = vmatprep.subr.mxu0 %v6915_v30  ;;  %v3199_v2 = vsub.f32 %v3051_v17, %v7024_v13 }
 0x188   : > { %2213 = vmatprep.mubr.f32.mxu1 %v8250_v1  ;;  %2304 = vmatprep.mubr.f32.mxu0 %v8250_v1 }
 0x189   : > { %2385 = vmatpush1.msra.mxu1 %v2384_v24  ;;  %2506 = vmatpush1.msra.mxu0 %v6926_v40  ;;  %v3200_v30 = vand.u32 4294901760, %v3199_v2 }
 0x18a   : > { %2215 = vmatmul.mubr.f32.gmra.mxu1 %v8267_v49  ;;  %2310 = vmatmul.mubr.f32.gmra.mxu0 %v8277_v25 }
 0x18b   : > { %2391 = vmatprep.subr.mxu1 %v2390_v29  ;;  %2509 = vmatprep.subr.mxu0 %v6940_v39 }
 0x18c   : > { %2397 = vmatpush1.msra.mxu1 %v2396_v0  ;;  %2512 = vmatpush1.msra.mxu0 %v6945_v4  ;;  %v8280_v4 = vld [vmem:[#allocation22_spill] sm:$0xff]  ;;  %v8292_v0 = vld [vmem:[#allocation17_spill] sm:$0xff] }
 0x18d   : > { %2403 = vmatprep.subr.mxu1 %v2402_v33  ;;  %2515 = vmatprep.subr.mxu0 %v6950_v9 }
 0x18e   : > { %2315 = vmatprep.mubr.f32.mxu0 %v8250_v1  ;;  %2409 = vmatpush1.msra.mxu1 %v2408_v47  ;;  %v8293_v47 = vld [vmem:[#allocation21_spill] sm:$0xff] }
 0x18f   : > { %2442 = vmatprep.mubr.f32.mxu1 %v8250_v1  ;;  %2518 = vmatpush1.msra.mxu0 %v6957_v32 }
 0x190   : > { %2321 = vmatmul.mubr.f32.gmra.mxu0 %v6776_v53  ;;  %2444 = vmatmul.mubr.f32.vlgmr.msra.gmra.mxu1 %v6580_v12 }
 0x191   : > { %2609 = vmatprep.subr.mxu1 %v6899_v19  ;;  %2720 = vmatprep.subr.mxu0 %v2364_v51  ;;  %v3049_v51 = vsel %vm249_vm0, %v5874_v55, 0 }
 0x192   : > { %2611 = vmatpush1.msra.mxu1 %v6894_v26  ;;  %2326 = vmatprep.mubr.f32.mxu0 %v8250_v1 }
 0x193   : > { %2613 = vmatprep.subr.mxu1 %v6896_v23  ;;  %2449 = vmatprep.mubr.f32.mxu1 %v8250_v1 }
 0x194   : > { %2615 = vmatpush1.msra.mxu1 %v6901_v59  ;;  %2332 = vmatmul.mubr.f32.gmra.mxu0 %v6811_v7 }
 0x195   : > { %2451 = vmatmul.mubr.f32.gmra.mxu1 %v6604_v61  ;;  %2617 = vmatprep.subr.mxu1 %v6909_v10 }
 0x196   : > { %2619 = vmatpush1.msra.mxu1 %v6919_v6  ;;  %2456 = vmatprep.mubr.f32.mxu1 %v8250_v1 }
 0x197   : > { %2621 = vmatprep.subr.mxu1 %v6922_v54  ;;  %2551 = vmatprep.mubr.f32.mxu0 %v8250_v1 }
 0x198   : > { %2623 = vmatpush1.msra.mxu1 %v6930_v62  ;;  %2554 = vmatmul.mubr.f32.vlgmr.msra.gmra.mxu0 %v8258_v43 }
 0x199   : > { %2458 = vmatmul.mubr.f32.gmra.mxu1 %v8260_v45  ;;  %2724 = vmatpush1.msra.mxu0 %v2370_v63  ;;  %v3201_v63 = vsub.f32 %v3199_v2, %v3200_v30 }
 0x19a   : > { %2835 = vmatprep.subr.mxu1 %v6899_v19  ;;  %2728 = vmatprep.subr.mxu0 %v2376_v16  ;;  %v7048_v19 = vand.u32 4294901760, %v3049_v51 }
 0x19b   : > { %2732 = vmatpush1.msra.mxu0 %v2382_v42  ;;  %2463 = vmatprep.mubr.f32.mxu1 %v8250_v1  ;;  %v8281_v42 = vld [vmem:[#allocation8_spill] sm:$0xff] }
 0x19c   : > { %2559 = vmatprep.mubr.f32.mxu0 %v8250_v1  ;;  %2736 = vmatprep.subr.mxu0 %v2388_v27  ;;  %v7059_v40 = vsub.f32 %v3049_v51, %v7048_v19  ;;  %v8285_v27 = vld [vmem:[#allocation10_spill] sm:$0xff] }
 0x19d   : > { %2465 = vmatmul.mubr.f32.gmra.mxu1 %v8267_v49  ;;  %2562 = vmatmul.mubr.f32.gmra.mxu0 %v8268_v14 }
 0x19e   : > { %2740 = vmatpush1.msra.mxu0 %v2394_v44  ;;  %2567 = vmatprep.mubr.f32.mxu0 %v8250_v1 }
 0x19f   : > { %2744 = vmatprep.subr.mxu0 %v2400_v38  ;;  %2656 = vmatprep.mubr.f32.mxu1 %v8250_v1  ;;  %v8286_v38 = vld [vmem:[#allocation12_spill] sm:$0xff] }
 0x1a0   : > { %2748 = vmatpush1.msra.mxu0 %v2406_v8 }
 0x1a1   : > { %2570 = vmatmul.mubr.f32.gmra.mxu0 %v8272_v21  ;;  %2660 = vmatmul.mubr.f32.vlgmr.msra.gmra.mxu1 %v8273_v11 }
 0x1a2   : > { %2837 = vmatpush1.msra.mxu1 %v6894_v26  ;;  %2575 = vmatprep.mubr.f32.mxu0 %v8250_v1  ;;  %v3206_v26 = vand.u32 4294901760, %v7059_v40 }
 0x1a3   : > { %2839 = vmatprep.subr.mxu1 %v6896_v23  ;;  %2665 = vmatprep.mubr.f32.mxu1 %v8250_v1  ;;  %v3202_v23 = vand.u32 4294901760, %v3201_v63 }
 0x1a4   : > { %2841 = vmatpush1.msra.mxu1 %v6901_v59  ;;  %3088 = vmatprep.subr.mxu0 %v7024_v13  ;;  %v3207_v59 = vsub.f32 %v7059_v40, %v3206_v26 }
 0x1a5   : > { %2843 = vmatprep.subr.mxu1 %v6909_v10  ;;  %2578 = vmatmul.mubr.f32.gmra.mxu0 %v6727_v56 }
 0x1a6   : > { %2669 = vmatmul.mubr.f32.gmra.mxu1 %v8274_v15  ;;  %2781 = vmatprep.mubr.f32.mxu0 %v8250_v1  ;;  %v3208_v10 = vand.u32 4294901760, %v3207_v59  ;;  %v7219_v59 = vpop.permute.xlu1 %1505 }
 0x1a7   : > { %2845 = vmatpush1.msra.mxu1 %v6919_v6  ;;  %2674 = vmatprep.mubr.f32.mxu1 %v8250_v1  ;;  %v5875_v6 = vld [vmem:[%s6288_s9 + $0x18] sm:$0x77]  ;;  %8295 = vst [vmem:[#allocation38_spill] sm:$0xff] %v7219_v59  ;;  %s5873_s9 = sshll.u32 %s6284_s29, 3 }
 0x1a8   : > { %2847 = vmatprep.subr.mxu1 %v6922_v54  ;;  %v8278_v54 = vld [vmem:[#allocation19_spill] sm:$0xff]  ;;  %v3053_v44 = vsel %vm249_vm0, %v5875_v6, 0  ;;  %s7500_s22 = scalar_lea.vmem [#allocation5], %s5873_s9 }
 0x1a9   : > { %2849 = vmatpush1.msra.mxu1 %v6930_v62  ;;  %2783 = vmatmul.mubr.f32.vlgmr.msra.gmra.mxu0 %v6580_v12  ;;  %v3048_v62 = vcombine.high %v5875_v6, %v5875_v6  ;;  %v7125_v8 = vand.u32 4294901760, %v3053_v44  ;;  %s5795_s27 = sshll.u32 %s7500_s22, 4  ;;  %s5796_s27 = int_to_ptr.vmem [resolvable:$true] %s5795_s27 }
 0x1aa   : > { %2678 = vmatmul.mubr.f32.gmra.mxu1 %v8275_v34  ;;  %2788 = vmatprep.mubr.f32.mxu0 %v8250_v1  ;;  %s6095_s6 = scalar_lea.vmem %s5796_s27, 128  ;;  %p6102_p3 = scmp.lt.s32.totalorder %s5796_s27, %s6100_s16 }
 0x1ab   : > { %2683 = vmatprep.mubr.f32.mxu1 %v8250_v1  ;;  %3090 = vmatpush1.msra.mxu0 %v7048_v19  ;;  %v3055_v16 = vsel %vm249_vm0, %v3048_v62, 0  ;;  %v3817_v24 = vsub.f32 %v3053_v44, %v7125_v8  ;;  %p6096_p11 = scmp.ne.s32.totalorder %s5796_s27, %s6095_s6  ;;  %p6103_p5 = scmp.lt.s32.totalorder %s6101_s8, %s6095_s6 }
 0x1ac   : > { %3203 = vmatprep.subr.mxu1 %v3202_v23  ;;  %3303 = vmatprep.subr.mxu0 %v3199_v2  ;;  %v7102_v39 = vand.u32 4294901760, %v3055_v16  ;;  %v7210_v2 = vpop.permute.xlu0 %1500 }
 0x1ad   : > { %2790 = vmatmul.mubr.f32.gmra.mxu0 %v6604_v61  ;;  %v3818_v29 = vand.u32 4294901760, %v3817_v24  ;;  %8294 = vst [vmem:[#allocation28_spill] sm:$0xff] %v7210_v2  ;;  %p6097_p13 = pnand %p6096_p11, %p8355_p12  ;;  %p6104_p8 = por %p6103_p5, %p6102_p3 }
 0x1ae   : > { %2687 = vmatmul.mubr.f32.gmra.mxu1 %v6756_v18  ;;  %2795 = vmatprep.mubr.f32.mxu0 %v8250_v1  ;;  %v3811_v9 = vsub.f32 %v3055_v16, %v7102_v39 }
 0x1af   : > { %2882 = vmatprep.mubr.f32.mxu1 %v8250_v1  ;;  %v3819_v33 = vsub.f32 %v3817_v24, %v3818_v29  ;;  %p6098_p1 = pneg %p6097_p13 }
 0x1b0   : > { %v3812_v32 = vand.u32 4294901760, %v3811_v9  ;;  %v7226_v16 = vpop.permute.xlu0 %1510 }
 0x1b1   : > { %2797 = vmatmul.mubr.f32.gmra.mxu0 %v8260_v45  ;;  %v3820_v55 = vand.u32 4294901760, %v3819_v33  ;;  %8296 = vst [vmem:[#allocation30_spill] sm:$0xff] %v7226_v16  ;;  %p6105_p10 = pnand %p6104_p8, %p6098_p1 }
 0x1b2   : > { %2884 = vmatmul.mubr.f32.vlgmr.msra.gmra.mxu1 %v6580_v12  ;;  %2802 = vmatprep.mubr.f32.mxu0 %v8250_v1  ;;  %v3813_v3 = vsub.f32 %v3811_v9, %v3812_v32 }
 0x1b3   : > { %2889 = vmatprep.mubr.f32.mxu1 %v8250_v1  ;;  %3209 = vmatpush1.msra.mxu1 %v3208_v10 }
 0x1b4   : > { %3403 = vmatprep.subr.mxu1 %v7024_v13  ;;  %v3814_v35 = vand.u32 4294901760, %v3813_v3 }
 0x1b5   : > { %2804 = vmatmul.mubr.f32.gmra.mxu0 %v8267_v49 }
 0x1b6   : > { %2891 = vmatmul.mubr.f32.gmra.mxu1 %v6604_v61  ;;  %3123 = vmatprep.mubr.f32.mxu0 %v8250_v1 }
 0x1b7   : > { %2896 = vmatprep.mubr.f32.mxu1 %v8250_v1 }
 0x1b9   : > { %3129 = vmatmul.mubr.f32.vlgmr.msra.gmra.mxu0 %v8278_v54 }
 0x1ba   : > { %2898 = vmatmul.mubr.f32.gmra.mxu1 %v8260_v45  ;;  %3134 = vmatprep.mubr.f32.mxu0 %v8250_v1 }
 0x1bb   : > { %2903 = vmatprep.mubr.f32.mxu1 %v8250_v1  ;;  %3306 = vmatpush1.msra.mxu0 %v7059_v40 }
 0x1bc   : > { %3508 = vmatprep.subr.mxu0 %v3200_v30 }
 0x1bd   : > { %3140 = vmatmul.mubr.f32.gmra.mxu0 %v8279_v37 }
 0x1be   : > { %2905 = vmatmul.mubr.f32.gmra.mxu1 %v8267_v49  ;;  %3145 = vmatprep.mubr.f32.mxu0 %v8250_v1 }
 0x1bf   : > { %3242 = vmatprep.mubr.f32.mxu1 %v8250_v1 }
 0x1c1   : > { %3151 = vmatmul.mubr.f32.gmra.mxu0 %v8280_v4 }
 0x1c2   : > { %3244 = vmatmul.mubr.f32.vlgmr.msra.gmra.mxu1 %v8281_v42  ;;  %3156 = vmatprep.mubr.f32.mxu0 %v8250_v1 }
 0x1c3   : > { %3249 = vmatprep.mubr.f32.mxu1 %v8250_v1  ;;  %3405 = vmatpush1.msra.mxu1 %v7048_v19 }
 0x1c4   : > { %3605 = vmatprep.subr.mxu1 %v7024_v13 }
 0x1c5   : > { %3162 = vmatmul.mubr.f32.gmra.mxu0 %v8282_v22 }
 0x1c6   : > { %3251 = vmatmul.mubr.f32.gmra.mxu1 %v8283_v36  ;;  %3339 = vmatprep.mubr.f32.mxu0 %v8250_v1 }
 0x1c7   : > { %3256 = vmatprep.mubr.f32.mxu1 %v8250_v1 }
 0x1c9   : > { %3342 = vmatmul.mubr.f32.vlgmr.msra.gmra.mxu0 %v8284_v20 }
 0x1ca   : > { %3258 = vmatmul.mubr.f32.gmra.mxu1 %v8285_v27  ;;  %3347 = vmatprep.mubr.f32.mxu0 %v8250_v1 }
 0x1cb   : > { %3263 = vmatprep.mubr.f32.mxu1 %v8250_v1  ;;  %3512 = vmatpush1.msra.mxu0 %v3206_v26 }
 0x1cc   : > { %3700 = vmatprep.subr.mxu0 %v7102_v39 }
 0x1cd   : > { %3350 = vmatmul.mubr.f32.gmra.mxu0 %v8286_v38 }
 0x1ce   : > { %3265 = vmatmul.mubr.f32.gmra.mxu1 %v8287_v50  ;;  %3355 = vmatprep.mubr.f32.mxu0 %v8250_v1 }
 0x1cf   : > { %3438 = vmatprep.mubr.f32.mxu1 %v8250_v1 }
 0x1d1   : > { %3358 = vmatmul.mubr.f32.gmra.mxu0 %v8288_v58 }
 0x1d2   : > { %3442 = vmatmul.mubr.f32.vlgmr.msra.gmra.mxu1 %v8289_v31  ;;  %3363 = vmatprep.mubr.f32.mxu0 %v8250_v1 }
 0x1d3   : > { %3447 = vmatprep.mubr.f32.mxu1 %v8250_v1  ;;  %3607 = vmatpush1.msra.mxu1 %v7048_v19 }
 0x1d4   : > { %3815 = vmatprep.subr.mxu1 %v3814_v35 }
 0x1d5   : > { %3366 = vmatmul.mubr.f32.gmra.mxu0 %v8290_v46 }
 0x1d6   : > { %3451 = vmatmul.mubr.f32.gmra.mxu1 %v8291_v5  ;;  %3545 = vmatprep.mubr.f32.mxu0 %v8250_v1 }
 0x1d7   : > { %3456 = vmatprep.mubr.f32.mxu1 %v8250_v1 }
 0x1d9   : > { %3547 = vmatmul.mubr.f32.vlgmr.msra.gmra.mxu0 %v8281_v42 }
 0x1da   : > { %3460 = vmatmul.mubr.f32.gmra.mxu1 %v8292_v0  ;;  %3552 = vmatprep.mubr.f32.mxu0 %v8250_v1 }
 0x1db   : > { %3465 = vmatprep.mubr.f32.mxu1 %v8250_v1  ;;  %3702 = vmatpush1.msra.mxu0 %v7125_v8 }
 0x1dc   : > { %3915 = vmatprep.subr.mxu0 %v3811_v9 }
 0x1dd   : > { %3554 = vmatmul.mubr.f32.gmra.mxu0 %v8283_v36 }
 0x1de   : > { %3469 = vmatmul.mubr.f32.gmra.mxu1 %v8293_v47  ;;  %3559 = vmatprep.mubr.f32.mxu0 %v8250_v1 }
 0x1df   : > { %3640 = vmatprep.mubr.f32.mxu1 %v8250_v1 }
 0x1e1   : > { %3561 = vmatmul.mubr.f32.gmra.mxu0 %v8285_v27 }
 0x1e2   : > { %3642 = vmatmul.mubr.f32.vlgmr.msra.gmra.mxu1 %v8281_v42  ;;  %3566 = vmatprep.mubr.f32.mxu0 %v8250_v1 }
 0x1e3   : > { %3647 = vmatprep.mubr.f32.mxu1 %v8250_v1  ;;  %3821 = vmatpush1.msra.mxu1 %v3820_v55 }
 0x1e4   : > { %4015 = vmatprep.subr.mxu1 %v7102_v39 }
 0x1e5   : > { %3568 = vmatmul.mubr.f32.gmra.mxu0 %v8287_v50 }
 0x1e6   : > { %3649 = vmatmul.mubr.f32.gmra.mxu1 %v8283_v36  ;;  %3735 = vmatprep.mubr.f32.mxu0 %v8250_v1 }
 0x1e7   : > { %3654 = vmatprep.mubr.f32.mxu1 %v8250_v1 }
 0x1e9   : > { %3741 = vmatmul.mubr.f32.vlgmr.msra.gmra.mxu0 %v8278_v54 }
 0x1ea   : > { %3656 = vmatmul.mubr.f32.gmra.mxu1 %v8285_v27  ;;  %3746 = vmatprep.mubr.f32.mxu0 %v8250_v1 }
 0x1eb   : > { %3661 = vmatprep.mubr.f32.mxu1 %v8250_v1  ;;  %3918 = vmatpush1.msra.mxu0 %v3817_v24 }
 0x1ec   : > { %4120 = vmatprep.subr.mxu0 %v3812_v32 }
 0x1ed   : > { %3752 = vmatmul.mubr.f32.gmra.mxu0 %v8279_v37 }
 0x1ee   : > { %3663 = vmatmul.mubr.f32.gmra.mxu1 %v8287_v50  ;;  %3757 = vmatprep.mubr.f32.mxu0 %v8250_v1 }
 0x1ef   : > { %3854 = vmatprep.mubr.f32.mxu1 %v8250_v1 }
 0x1f1   : > { %3763 = vmatmul.mubr.f32.gmra.mxu0 %v8280_v4 }
 0x1f2   : > { %3856 = vmatmul.mubr.f32.vlgmr.msra.gmra.mxu1 %v8281_v42  ;;  %3768 = vmatprep.mubr.f32.mxu0 %v8250_v1 }
 0x1f3   : > { %3861 = vmatprep.mubr.f32.mxu1 %v8250_v1  ;;  %4017 = vmatpush1.msra.mxu1 %v7125_v8 }
 0x1f4   : > { %4217 = vmatprep.subr.mxu1 %v7102_v39 }
 0x1f5   : > { %3774 = vmatmul.mubr.f32.gmra.mxu0 %v8282_v22 }
 0x1f6   : > { %3863 = vmatmul.mubr.f32.gmra.mxu1 %v8283_v36  ;;  %3951 = vmatprep.mubr.f32.mxu0 %v8250_v1 }
 0x1f7   : > { %3868 = vmatprep.mubr.f32.mxu1 %v8250_v1 }
 0x1f9   : > { %3954 = vmatmul.mubr.f32.vlgmr.msra.gmra.mxu0 %v8284_v20  ;;  %v7233_v20 = vpop.permute.xlu1 %1515 }
 0x1fa   : > { %3870 = vmatmul.mubr.f32.gmra.mxu1 %v8285_v27  ;;  %3959 = vmatprep.mubr.f32.mxu0 %v8250_v1  ;;  %8297 = vst [vmem:[#allocation34_spill] sm:$0xff] %v7233_v20 }
 0x1fb   : > { %3875 = vmatprep.mubr.f32.mxu1 %v8250_v1  ;;  %4124 = vmatpush1.msra.mxu0 %v3818_v29 }
 0x1fd   : > { %3962 = vmatmul.mubr.f32.gmra.mxu0 %v8286_v38 }
 0x1fe   : > { %3877 = vmatmul.mubr.f32.gmra.mxu1 %v8287_v50  ;;  %3967 = vmatprep.mubr.f32.mxu0 %v8250_v1 }
 0x1ff   : > { %4050 = vmatprep.mubr.f32.mxu1 %v8250_v1 }
 0x201   : > { %3970 = vmatmul.mubr.f32.gmra.mxu0 %v8288_v58 }
 0x202   : > { %4054 = vmatmul.mubr.f32.vlgmr.msra.gmra.mxu1 %v8289_v31  ;;  %3975 = vmatprep.mubr.f32.mxu0 %v8250_v1 }
 0x203   : > { %4059 = vmatprep.mubr.f32.mxu1 %v8250_v1  ;;  %4219 = vmatpush1.msra.mxu1 %v7125_v8 }
 0x205   : > { %3978 = vmatmul.mubr.f32.gmra.mxu0 %v8290_v46 }
 0x206   : > { %4063 = vmatmul.mubr.f32.gmra.mxu1 %v8291_v5  ;;  %4157 = vmatprep.mubr.f32.mxu0 %v8250_v1 }
 0x207   : > { %4068 = vmatprep.mubr.f32.mxu1 %v8250_v1 }
 0x209   : > { %4159 = vmatmul.mubr.f32.vlgmr.msra.gmra.mxu0 %v8281_v42 }
 0x20a   : > { %4072 = vmatmul.mubr.f32.gmra.mxu1 %v8292_v0  ;;  %4164 = vmatprep.mubr.f32.mxu0 %v8250_v1 }
 0x20b   : > { %4077 = vmatprep.mubr.f32.mxu1 %v8250_v1 }
 0x20d   : > { %4166 = vmatmul.mubr.f32.gmra.mxu0 %v8283_v36 }
 0x20e   : > { %4081 = vmatmul.mubr.f32.gmra.mxu1 %v8293_v47  ;;  %4171 = vmatprep.mubr.f32.mxu0 %v8250_v1 }
 0x20f   : > { %4252 = vmatprep.mubr.f32.mxu1 %v8250_v1 }
 0x211   : > { %4173 = vmatmul.mubr.f32.gmra.mxu0 %v8285_v27  ;;  %v1610_v57 = vpop.f32.mrf.mxu0 }
 0x212   : > { %4254 = vmatmul.mubr.f32.vlgmr.msra.gmra.mxu1 %v8281_v42  ;;  %4178 = vmatprep.mubr.f32.mxu0 %v8250_v1  ;;  %v1611_v19 = vadd.f32 %v1610_v57, %v7210_v2 }
 0x213   : > { %4259 = vmatprep.mubr.f32.mxu1 %v8250_v1  ;;  %v7202_v17 = vpop.f32.mrf.mxu0 }
 0x215   : > { %4180 = vmatmul.mubr.f32.gmra.mxu0 %v8287_v50 }
 0x216   : > { %4261 = vmatmul.mubr.f32.gmra.mxu1 %v8283_v36  ;;  %v1621_v13 = vpop.f32.mrf.mxu0  ;;  %4369 = vmatprep.mubr.f32.mxu0 %v8250_v1 }
 0x217   : > { %4266 = vmatprep.mubr.f32.mxu1 %v8250_v1  ;;  %v1622_v10 = vadd.f32 %v1621_v13, %v7219_v59 }
 0x218   : > { %v7208_v51 = vpop.f32.mrf.mxu0 }
 0x21a   : > { %4268 = vmatmul.mubr.f32.gmra.mxu1 %v8285_v27 }
 0x21b   : > { %4273 = vmatprep.mubr.f32.mxu1 %v8250_v1  ;;  %v1632_v30 = vpop.f32.mrf.mxu0  ;;  %v1755_v40 = vpop.f32.mrf.mxu1 }
 0x21c   : > { %v1756_v63 = vadd.f32 %v1755_v40, %v1611_v19  ;;  %v1633_v4 = vadd.f32 %v1632_v30, %v7226_v16 }
 0x21d   : > { %v7215_v26 = vpop.f32.mrf.mxu0  ;;  %v7217_v23 = vpop.f32.mrf.mxu1 }
 0x21e   : > { %4275 = vmatmul.mubr.f32.gmra.mxu1 %v8287_v50 }
 0x21f   : > { %v1643_v6 = vpop.f32.mrf.mxu0  ;;  %4518 = vmatprep.mubr.f32.mxu1 %v8250_v1 }
 0x220   : > { %v1762_v54 = vpop.f32.mrf.mxu1  ;;  %v1644_v44 = vadd.f32 %v1643_v6, %v7233_v20 }
 0x221   : > { %v1763_v62 = vadd.f32 %v1762_v54, %v1622_v10  ;;  %v7224_v37 = vpop.f32.mrf.mxu0 }
 0x222   : > { %v7228_v39 = vpop.f32.mrf.mxu1 }
 0x223   : > { %v1865_v42 = vpop.f32.mrf.mxu0 }
 0x224   : > { %v1769_v9 = vpop.f32.mrf.mxu1  ;;  %v1866_v22 = vadd.f32 %v1865_v42, %v1756_v63 }
 0x225   : > { %v1770_v36 = vadd.f32 %v1769_v9, %v1633_v4  ;;  %v7231_v32 = vpop.f32.mrf.mxu0 }
 0x226   : > { %v7235_v27 = vpop.f32.mrf.mxu1 }
 0x228   : > { %v1776_v3 = vpop.f32.mrf.mxu1  ;;  %v1873_v38 = vpop.f32.mrf.mxu0 }
 0x229   : > { %v1777_v50 = vadd.f32 %v1776_v3, %v1644_v44  ;;  %v1874_v8 = vadd.f32 %v1873_v38, %v1763_v62 }
 0x22a   : > { %v7238_v35 = vpop.f32.mrf.mxu1  ;;  %v7240_v58 = vpop.f32.mrf.mxu0 }
 0x22c   : > { %v1881_v31 = vpop.f32.mrf.mxu0  ;;  %v1971_v24 = vpop.f32.mrf.mxu1 }
 0x22d   : > { %v1882_v46 = vadd.f32 %v1881_v31, %v1770_v36  ;;  %v1972_v5 = vadd.f32 %v1971_v24, %v1866_v22 }
 0x22e   : > { %v7242_v29 = vpop.f32.mrf.mxu0  ;;  %v7244_v0 = vpop.f32.mrf.mxu1 }
 0x230   : > { %v1889_v33 = vpop.f32.mrf.mxu0 }
 0x231   : > { %v1980_v47 = vpop.f32.mrf.mxu1 }
 0x232   : > { %v1981_v55 = vadd.f32 %v1980_v47, %v1874_v8  ;;  %v7246_v57 = vpop.f32.mrf.mxu0 }
 0x233   : > { %v7248_v13 = vpop.f32.mrf.mxu1 }
 0x234   : > { %v2094_v19 = vpop.f32.mrf.mxu0 }
 0x235   : > { %v1989_v30 = vpop.f32.mrf.mxu1  ;;  %v2095_v42 = vadd.f32 %v2094_v19, %v1972_v5  ;;  %v1890_v5 = vadd.f32 %v1889_v33, %v1777_v50  ;;  %v7278_v50 = vpop.permute.xlu0 %2929 }
 0x236   : > { %v1990_v40 = vadd.f32 %v1989_v30, %v1882_v46  ;;  %v7250_v63 = vpop.f32.mrf.mxu0  ;;  %8298 = vst [vmem:[#allocation33_spill] sm:$0xff] %v7278_v50 }
 0x237   : > { %v7252_v10 = vpop.f32.mrf.mxu1 }
 0x238   : > { %v2101_v6 = vpop.f32.mrf.mxu0 }
 0x239   : > { %v1998_v54 = vpop.f32.mrf.mxu1  ;;  %v2102_v38 = vadd.f32 %v2101_v6, %v1981_v55  ;;  %v7296_v56 = vpop.permute.xlu0 %2939 }
 0x23a   : > { %v7254_v62 = vpop.f32.mrf.mxu0  ;;  %v1999_v34 = vadd.f32 %v1998_v54, %v1890_v5  ;;  %8300 = vst [vmem:[#allocation44_spill] sm:$0xff] %v7296_v56 }
 0x23b   : > { %v7256_v4 = vpop.f32.mrf.mxu1 }
 0x23c   : > { %v2108_v9 = vpop.f32.mrf.mxu0 }
 0x23d   : > { %v2195_v22 = vpop.f32.mrf.mxu1  ;;  %v2109_v30 = vadd.f32 %v2108_v9, %v1990_v40 }
 0x23e   : > { %v2196_v36 = vadd.f32 %v2195_v22, %v2095_v42  ;;  %v7258_v44 = vpop.f32.mrf.mxu0 }
 0x23f   : > { %v7260_v3 = vpop.f32.mrf.mxu1 }
 0x240   : > { %v2115_v8 = vpop.f32.mrf.mxu0  ;;  %5971 = vtanh.f32 %v2196_v36 }
 0x241   : > { %v2202_v31 = vpop.f32.mrf.mxu1  ;;  %v2116_v55 = vadd.f32 %v2115_v8, %v1999_v34 }
 0x242   : > { %v2203_v24 = vadd.f32 %v2202_v31, %v2102_v38  ;;  %v7262_v46 = vpop.f32.mrf.mxu0 }
 0x243   : > { %v7264_v47 = vpop.f32.mrf.mxu1 }
 0x244   : > { %5973 = vtanh.f32 %v2203_v24  ;;  %v7266_v18 = vpop.f32.mrf.mxu0 }
 0x245   : > { %v2209_v19 = vpop.f32.mrf.mxu1 }
 0x246   : > { %v2210_v42 = vadd.f32 %v2209_v19, %v2109_v30  ;;  %v7268_v22 = vpop.f32.mrf.mxu0  ;;  %v7284_v30 = vpop.permute.xlu1 %2934 }
 0x247   : > { %v7270_v15 = vpop.f32.mrf.mxu1  ;;  %8299 = vst [vmem:[#allocation29_spill] sm:$0xff] %v7284_v30 }
 0x248   : > { %5975 = vtanh.f32 %v2210_v42  ;;  %v1613_v42 = vadd.f32 %v7202_v17, %v7210_v2 }
 0x24a   : > { %v2216_v6 = vpop.f32.mrf.mxu1  ;;  %v7272_v36 = vpop.f32.mrf.mxu0 }
 0x24b   : > { %v2217_v38 = vadd.f32 %v2216_v6, %v2116_v55  ;;  %v7312_v7 = vpop.permute.xlu1 %2944 }
 0x24c   : > { %v7274_v31 = vpop.f32.mrf.mxu1  ;;  %v7276_v40 = vpop.f32.mrf.mxu0  ;;  %8301 = vst [vmem:[#allocation42_spill] sm:$0xff] %v7312_v7 }
 0x24d   : > { %5977 = vtanh.f32 %v2217_v38  ;;  %v5972_v9 = vpop.eup %5971 }
 0x24e   : > { %v2947_v34 = vmul.f32 %v5972_v9, %v7278_v50  ;;  %v1624_v9 = vadd.f32 %v7208_v51, %v7219_v59  ;;  %v1635_v51 = vadd.f32 %v7215_v26, %v7226_v16 }
 0x250   : > { %v7280_v33 = vpop.f32.mrf.mxu0  ;;  %v7282_v24 = vpop.f32.mrf.mxu1  ;;  %v1765_v17 = vadd.f32 %v7228_v39, %v1624_v9 }
 0x251   : > { %v5974_v54 = vpop.eup %5973 }
 0x252   : > { %v2951_v8 = vmul.f32 %v5974_v54, %v7284_v30  ;;  %v7288_v5 = vpop.f32.mrf.mxu0  ;;  %v7290_v19 = vpop.f32.mrf.mxu1  ;;  %v1758_v54 = vadd.f32 %v7217_v23, %v1613_v42  ;;  %v1876_v23 = vadd.f32 %v7240_v58, %v1765_v17 }
 0x254   : > { %v2963_v55 = vadd.f32 %v2951_v8, %v2947_v34  ;;  %v7294_v6 = vpop.f32.mrf.mxu0  ;;  %v1868_v34 = vadd.f32 %v7231_v32, %v1758_v54  ;;  %v1772_v32 = vadd.f32 %v7235_v27, %v1635_v51 }
 0x255   : > { %v5976_v38 = vpop.eup %5975  ;;  %v7298_v11 = vpop.f32.mrf.mxu1 }
 0x256   : > { %v2955_v21 = vmul.f32 %v5976_v38, %v7296_v56  ;;  %v7304_v14 = vpop.f32.mrf.mxu0  ;;  %v1974_v42 = vadd.f32 %v7244_v0, %v1868_v34 }
 0x257   : > { %v7306_v49 = vpop.f32.mrf.mxu1 }
 0x258   : > { %v2964_v8 = vadd.f32 %v2963_v55, %v2955_v21  ;;  %v2555_v45 = vpop.f32.mrf.mxu0  ;;  %v1646_v21 = vadd.f32 %v7224_v37, %v7233_v20  ;;  %v1983_v55 = vadd.f32 %v7248_v13, %v1876_v23  ;;  %v2097_v9 = vadd.f32 %v7250_v63, %v1974_v42 }
 0x259   : > { %v7310_v43 = vpop.f32.mrf.mxu1 }
 0x25a   : > { %v5978_v61 = vpop.eup %5977  ;;  %v2557_v38 = vpop.f32.mrf.mxu0  ;;  %v1779_v0 = vadd.f32 %v7238_v35, %v1646_v21  ;;  %v2104_v17 = vadd.f32 %v7254_v62, %v1983_v55  ;;  %v2198_v34 = vadd.f32 %v7260_v3, %v2097_v9  ;;  %v2301_v9 = vadd.f32 %v7266_v18, %v7210_v2 }
 0x25b   : > { %v2959_v12 = vmul.f32 %v5978_v61, %v7312_v7  ;;  %v7319_v39 = vpop.f32.mrf.mxu1  ;;  %v1884_v61 = vadd.f32 %v7242_v29, %v1772_v32 }
 0x25c   : > { %v1892_v13 = vadd.f32 %v7246_v57, %v1779_v0  ;;  %5979 = vtanh.f32 %v2198_v34 }
 0x25d   : > { %v7326_v54 = vadd.f32 %v2964_v8, %v2959_v12  ;;  %v7328_v26 = vpop.f32.mrf.mxu1  ;;  %v2563_v58 = vpop.f32.mrf.mxu0  ;;  %v1992_v63 = vadd.f32 %v7252_v10, %v1884_v61  ;;  %v2205_v12 = vadd.f32 %v7264_v47, %v2104_v17  ;;  %v2446_v61 = vadd.f32 %v7282_v24, %v2301_v9 }
 0x25e   : > { %v2001_v23 = vadd.f32 %v7256_v4, %v1892_v13  ;;  %v2314_v13 = vadd.f32 %v7276_v40, %v7219_v59 }
 0x25f   : > { %v7334_v37 = vpop.f32.mrf.mxu1  ;;  %v2565_v27 = vpop.f32.mrf.mxu0  ;;  %v2111_v35 = vadd.f32 %v7258_v44, %v1992_v63  ;;  %5981 = vtanh.f32 %v2205_v12 }
 0x260   : > { %v2118_v3 = vadd.f32 %v7262_v46, %v2001_v23  ;;  %v2312_v46 = vadd.f32 %v7272_v36, %v7219_v59  ;;  %v2556_v23 = vadd.f32 %v2555_v45, %v2446_v61  ;;  %v2323_v36 = vadd.f32 %v7280_v33, %v7226_v16 }
 0x261   : > { %v2571_v8 = vpop.f32.mrf.mxu0  ;;  %v2661_v51 = vpop.f32.mrf.mxu1  ;;  %v2212_v42 = vadd.f32 %v7270_v15, %v2111_v35 }
 0x262   : > { %v2219_v57 = vadd.f32 %v7274_v31, %v2118_v3  ;;  %v2303_v31 = vadd.f32 %v7268_v22, %v7210_v2  ;;  %v2453_v63 = vadd.f32 %v7298_v11, %v2312_v46  ;;  %v2455_v22 = vadd.f32 %v7306_v49, %v2314_v13 }
 0x263   : > { %v2573_v29 = vpop.f32.mrf.mxu0  ;;  %v2663_v62 = vpop.f32.mrf.mxu1  ;;  %5983 = vtanh.f32 %v2212_v42  ;;  %v2662_v2 = vadd.f32 %v2661_v51, %v2556_v23  ;;  %v2325_v11 = vadd.f32 %v7288_v5, %v7226_v16  ;;  %v2334_v49 = vadd.f32 %v7294_v6, %v7233_v20 }
 0x264   : > { %5985 = vtanh.f32 %v2219_v57  ;;  %v2448_v18 = vadd.f32 %v7290_v19, %v2303_v31  ;;  %v2564_v42 = vadd.f32 %v2563_v58, %v2453_v63  ;;  %v2460_v19 = vadd.f32 %v7310_v43, %v2323_v36 }
 0x265   : > { %v2579_v21 = vpop.f32.mrf.mxu0  ;;  %v2566_v45 = vadd.f32 %v2565_v27, %v2455_v22  ;;  %v2336_v43 = vadd.f32 %v7304_v14, %v7233_v20  ;;  %v2467_v27 = vadd.f32 %v7328_v26, %v2334_v49 }
 0x266   : > { %v2670_v10 = vpop.f32.mrf.mxu1  ;;  %v2558_v9 = vadd.f32 %v2557_v38, %v2448_v18  ;;  %v2462_v38 = vadd.f32 %v7319_v39, %v2325_v11  ;;  %v2572_v51 = vadd.f32 %v2571_v8, %v2460_v19 }
 0x267   : > { %v7344_v32 = vpop.f32.mrf.mxu0  ;;  %v2671_v46 = vadd.f32 %v2670_v10, %v2564_v42  ;;  %v2469_v8 = vadd.f32 %v7334_v37, %v2336_v43 }
 0x268   : > { %v2672_v47 = vpop.f32.mrf.mxu1  ;;  %v2664_v33 = vadd.f32 %v2663_v62, %v2558_v9  ;;  %v2574_v6 = vadd.f32 %v2573_v29, %v2462_v38 }
 0x269   : > { %v2784_v55 = vpop.f32.mrf.mxu0  ;;  %v5980_v34 = vpop.eup %5979  ;;  %v2673_v63 = vadd.f32 %v2672_v47, %v2566_v45  ;;  %v2580_v47 = vadd.f32 %v2579_v21, %v2467_v27 }
 0x26a   : > { %v2679_v4 = vpop.f32.mrf.mxu1  ;;  %v2948_v57 = vmul.f32 %v5980_v34, %v7278_v50  ;;  %v2785_v58 = vadd.f32 %v2784_v55, %v2662_v2 }
 0x26b   : > { %v2786_v44 = vpop.f32.mrf.mxu0  ;;  %v2680_v62 = vadd.f32 %v2679_v4, %v2572_v51  ;;  %v2582_v4 = vadd.f32 %v7344_v32, %v2469_v8 }
 0x26c   : > { %v2681_v0 = vpop.f32.mrf.mxu1  ;;  %v5982_v3 = vpop.eup %5981  ;;  %v2787_v10 = vadd.f32 %v2786_v44, %v2664_v33 }
 0x26d   : > { %v2791_v15 = vpop.f32.mrf.mxu0  ;;  %v2952_v61 = vmul.f32 %v5982_v3, %v7284_v30  ;;  %v2682_v9 = vadd.f32 %v2681_v0, %v2574_v6 }
 0x26e   : > { %v2688_v17 = vpop.f32.mrf.mxu1  ;;  %v2792_v18 = vadd.f32 %v2791_v15, %v2671_v46 }
 0x26f   : > { %v2793_v12 = vpop.f32.mrf.mxu0  ;;  %v2689_v11 = vadd.f32 %v2688_v17, %v2580_v47 }
 0x270   : > { %v2690_v35 = vpop.f32.mrf.mxu1  ;;  %v5984_v34 = vpop.eup %5983  ;;  %v2794_v2 = vadd.f32 %v2793_v12, %v2673_v63  ;;  %v2966_v63 = vrot.slane %v7326_v54, 4 }
 0x271   : > { %v2798_v24 = vpop.f32.mrf.mxu0  ;;  %v5986_v36 = vpop.eup %5985  ;;  %v2956_v39 = vmul.f32 %v5984_v34, %v7296_v56 }
 0x272   : > { %v2885_v40 = vpop.f32.mrf.mxu1  ;;  %v2799_v14 = vadd.f32 %v2798_v24, %v2680_v62  ;;  %v2960_v29 = vmul.f32 %v5986_v36, %v7312_v7  ;;  %v2691_v24 = vadd.f32 %v2690_v35, %v2582_v4  ;;  %v2967_v6 = vadd.f32 %v2966_v63, %v7326_v54 }
 0x273   : > { %v2800_v31 = vpop.f32.mrf.mxu0  ;;  %v2886_v23 = vadd.f32 %v2885_v40, %v2785_v58  ;;  %v2972_v40 = vadd.f32 %v2952_v61, %v2948_v57 }
 0x274   : > { %v2887_v13 = vpop.f32.mrf.mxu1  ;;  %v2801_v19 = vadd.f32 %v2800_v31, %v2682_v9 }
 0x275   : > { %v2805_v5 = vpop.f32.mrf.mxu0  ;;  %v2888_v15 = vadd.f32 %v2887_v13, %v2787_v10  ;;  %v2973_v45 = vadd.f32 %v2972_v40, %v2956_v39 }
 0x276   : > { %v2892_v3 = vpop.f32.mrf.mxu1  ;;  %v2806_v46 = vadd.f32 %v2805_v5, %v2689_v11 }
 0x277   : > { %v2893_v55 = vadd.f32 %v2892_v3, %v2792_v18  ;;  %v2807_v22 = vpop.f32.mrf.mxu0  ;;  %v2974_v61 = vadd.f32 %v2973_v45, %v2960_v29 }
 0x278   : > { %v2894_v42 = vpop.f32.mrf.mxu1  ;;  %v2808_v32 = vadd.f32 %v2807_v22, %v2691_v24 }
 0x279   : > { %5987 = vtanh.f32 %v2893_v55  ;;  %v2895_v26 = vadd.f32 %v2894_v42, %v2794_v2  ;;  %v7373_v44 = vpop.f32.mrf.mxu0  ;;  %v2975_v38 = vrot.slane %v2974_v61, 4 }
 0x27a   : > { %5989 = vtanh.f32 %v2886_v23  ;;  %v2899_v12 = vpop.f32.mrf.mxu1 }
 0x27b   : > { %5991 = vtanh.f32 %v2895_v26  ;;  %v2900_v37 = vadd.f32 %v2899_v12, %v2799_v14  ;;  %v7377_v21 = vpop.f32.mrf.mxu0  ;;  %v2976_v27 = vadd.f32 %v2975_v38, %v2974_v61  ;;  %v2968_v26 = vrot.slane %v2967_v6, 2 }
 0x27c   : > { %5993 = vtanh.f32 %v2888_v15  ;;  %v2901_v0 = vpop.f32.mrf.mxu1 }
 0x27d   : > { %5995 = vtanh.f32 %v2900_v37  ;;  %v2902_v49 = vadd.f32 %v2901_v0, %v2801_v19  ;;  %v7379_v57 = vpop.f32.mrf.mxu0  ;;  %v2977_v8 = vrot.slane %v2976_v27, 2 }
 0x27e   : > { %v2906_v33 = vpop.f32.mrf.mxu1 }
 0x27f   : > { %5997 = vtanh.f32 %v2902_v49  ;;  %v2907_v58 = vadd.f32 %v2906_v33, %v2806_v46  ;;  %v7381_v17 = vpop.f32.mrf.mxu0  ;;  %v2978_v37 = vadd.f32 %v2977_v8, %v2976_v27  ;;  %v2969_v33 = vadd.f32 %v2968_v26, %v2967_v6 }
 0x280   : > { %v2908_v31 = vpop.f32.mrf.mxu1  ;;  %v3017_v26 = vlaneseq }
 0x281   : > { %5999 = vtanh.f32 %v2907_v58  ;;  %v2909_v13 = vadd.f32 %v2908_v31, %v2808_v32  ;;  %v7383_v34 = vpop.f32.mrf.mxu0  ;;  %v2979_v63 = vrot.slane %v2978_v37, 1 }
 0x282   : > { %v7385_v51 = vpop.f32.mrf.mxu1  ;;  %vm7454_vm3 = vcmp.lt.s32.totalorder %v3017_v26, 512 }
 0x283   : > { %6001 = vtanh.f32 %v2909_v13  ;;  %v7387_v35 = vpop.f32.mrf.mxu0 }
 0x284   : > { %v7390_v18 = vpop.f32.mrf.mxu1 }
 0x285   : > { %v7392_v5 = vpop.f32.mrf.mxu0 }
 0x286   : > { %v5988_v43 = vpop.eup %5987  ;;  %v7394_v10 = vpop.f32.mrf.mxu1 }
 0x287   : > { %v5990_v23 = vpop.eup %5989  ;;  %v7396_v3 = vpop.f32.mrf.mxu0  ;;  %v2953_v55 = vmul.f32 %v5988_v43, %v7284_v30 }
 0x288   : > { %v5992_v36 = vpop.eup %5991  ;;  %v7399_v62 = vpop.f32.mrf.mxu1  ;;  %v2949_v15 = vmul.f32 %v5990_v23, %v7278_v50 }
 0x289   : > { %v5994_v2 = vpop.eup %5993  ;;  %v7402_v22 = vpop.f32.mrf.mxu0  ;;  %v2954_v42 = vmul.f32 %v5992_v36, %v7284_v30 }
 0x28a   : > { %v5996_v39 = vpop.eup %5995  ;;  %v7404_v47 = vpop.f32.mrf.mxu1  ;;  %v2950_v29 = vmul.f32 %v5994_v2, %v7278_v50  ;;  %v2981_v4 = vadd.f32 %v2953_v55, %v2949_v15  ;;  %v2970_v2 = vrot.slane %v2969_v33, 1  ;;  %v2980_v15 = vadd.f32 %v2979_v63, %v2978_v37 }
 0x28b   : > { %v2957_v9 = vmul.f32 %v5996_v39, %v7296_v56  ;;  %v7409_v14 = vpop.f32.mrf.mxu0  ;;  %v3018_v63 = vshrl.u32 %v3017_v26, 7 }
 0x28c   : > { %v5998_v54 = vpop.eup %5997  ;;  %v7411_v40 = vpop.f32.mrf.mxu1  ;;  %v2990_v0 = vadd.f32 %v2954_v42, %v2950_v29 }
 0x28d   : > { %v2958_v12 = vmul.f32 %v5998_v54, %v7296_v56  ;;  %v7415_v11 = vpop.f32.mrf.mxu0  ;;  %v2982_v24 = vadd.f32 %v2981_v4, %v2957_v9  ;;  %v6164_v9 = vmov 1966171168  }
 0x28e   : > { %v6000_v19 = vpop.eup %5999  ;;  %v7417_v45 = vpop.f32.mrf.mxu1  ;;  %v3015_v54 = vunpack.c.l.s4 %v6164_v9 }
 0x28f   : > { %v2961_v46 = vmul.f32 %v6000_v19, %v7312_v7  ;;  %v7420_v49 = vpop.f32.mrf.mxu0  ;;  %v2991_v58 = vadd.f32 %v2990_v0, %v2958_v12  ;;  %v2971_v19 = vadd.f32 %v2970_v2, %v2969_v33 }
 0x290   : > { %v6002_v61 = vpop.eup %6001  ;;  %v7422_v32 = vpop.f32.mrf.mxu1  ;;  %v3016_v37 = vunpack.c.0.s8 %v3015_v54 }
 0x291   : > { %v2983_v31 = vadd.f32 %v2982_v24, %v2961_v46  ;;  %v2962_v13 = vmul.f32 %v6002_v61, %v7312_v7  ;;  %v7425_v38 = vpop.f32.mrf.mxu0  ;;  %v7437_v24 = vpop.permute.xlu0 %3001 }
 0x292   : > { %v7427_v43 = vpop.f32.mrf.mxu1  ;;  %8302 = vst [vmem:[#allocation19_spill] sm:$0xff] %v7437_v24  ;;  %v7447_v50 = vsub.s32 %v3016_v37, %v3018_v63 }
 0x293   : > { %v2984_v27 = vrot.slane %v2983_v31, 4  ;;  %v2992_v23 = vadd.f32 %v2991_v58, %v2962_v13  ;;  %v7429_v36 = vpop.f32.mrf.mxu0  ;;  %v3005_v13 = vadd.f32 %v7437_v24, %v2980_v15 }
 0x294   : > { %v7431_v55 = vpop.f32.mrf.mxu1  ;;  %8303 = vst [vmem:[#allocation20_spill] sm:$0xff] %v7447_v50 }
 0x295   : > { %v2985_v39 = vadd.f32 %v2984_v27, %v2983_v31  ;;  %v2993_v6 = vrot.slane %v2992_v23, 4  ;;  %v7433_v8 = vpop.f32.mrf.mxu0 }
 0x296   : > { %v3452_v42 = vpop.f32.mrf.mxu1 }
 0x297   : > { %v2986_v29 = vrot.slane %v2985_v39, 2  ;;  %v2994_v4 = vadd.f32 %v2993_v6, %v2992_v23  ;;  %v7435_v12 = vpop.f32.mrf.mxu0  ;;  %v3004_v6 = vadd.f32 %v7437_v24, %v2971_v19  ;;  %v8304_v19 = vmov 0 }
 0x298   : > { %v3454_v0 = vpop.f32.mrf.mxu1  ;;  %v8305_v19 = vsel %vm7454_vm3, 4294967295, %v8304_v19 }
 0x299   : > { %v2987_v46 = vadd.f32 %v2986_v29, %v2985_v39  ;;  %v2995_v61 = vrot.slane %v2994_v4, 2  ;;  %v7439_v58 = vpop.f32.mrf.mxu0  ;;  %v3142_v39 = vadd.f32 %v7379_v57, %v6546_v48  ;;  %v3012_v30 = vcombine.low %v3004_v6, %v3005_v13  ;;  %8306 = vst [vmem:[#allocation22_spill] sm:$0xff] %v8305_v19 }
 0x29a   : > { %v3461_v31 = vpop.f32.mrf.mxu1  ;;  %v3131_v57 = vadd.f32 %v7373_v44, %v6551_v60 }
 0x29b   : > { %v2988_v27 = vrot.slane %v2987_v46, 1  ;;  %v2996_v9 = vadd.f32 %v2995_v61, %v2994_v4  ;;  %v7442_v7 = vpop.f32.mrf.mxu0  ;;  %v3144_v4 = vadd.f32 %v7381_v17, %v6546_v48  ;;  %v3253_v61 = vadd.f32 %v7394_v10, %v3142_v39 }
 0x29c   : > { %v3463_v23 = vpop.f32.mrf.mxu1  ;;  %v3133_v17 = vadd.f32 %v7377_v21, %v6551_v60  ;;  %v3246_v44 = vadd.f32 %v7385_v51, %v3131_v57  ;;  %v3164_v21 = vadd.f32 %v7392_v5, %v6544_v41 }
 0x29d   : > { %v2989_v33 = vadd.f32 %v2988_v27, %v2987_v46  ;;  %v2997_v2 = vrot.slane %v2996_v9, 1  ;;  %v3555_v56 = vpop.f32.mrf.mxu0  ;;  %v3153_v46 = vadd.f32 %v7383_v34, %v6548_v52  ;;  %v3255_v10 = vadd.f32 %v7399_v62, %v3144_v4 }
 0x29e   : > { %v3470_v29 = vpop.f32.mrf.mxu1  ;;  %v3352_v26 = vadd.f32 %v7415_v11, %v3253_v61  ;;  %v3155_v34 = vadd.f32 %v7387_v35, %v6548_v52  ;;  %v3248_v39 = vadd.f32 %v7390_v18, %v3133_v17  ;;  %v3344_v18 = vadd.f32 %v7402_v22, %v3246_v44 }
 0x29f   : > { %v2998_v15 = vadd.f32 %v2997_v2, %v2996_v9  ;;  %v3557_v54 = vpop.f32.mrf.mxu0  ;;  %v3006_v37 = vadd.f32 %v7437_v24, %v2989_v33  ;;  %v3020_v9 = vrot.slane %v3012_v30, %v7447_v50  ;;  %v3260_v6 = vadd.f32 %v7404_v47, %v3153_v46 }
 0x2a0   : > { %v7452_v20 = vpop.f32.mrf.mxu1  ;;  %v3354_v62 = vadd.f32 %v7420_v49, %v3255_v10  ;;  %v3453_v11 = vadd.f32 %v3452_v42, %v3352_v26  ;;  %v3166_v30 = vadd.f32 %v7396_v3, %v6544_v41  ;;  %v3262_v51 = vadd.f32 %v7411_v40, %v3155_v34 }
 0x2a1   : > { %v3562_v13 = vpop.f32.mrf.mxu0  ;;  %v3007_v63 = vadd.f32 %v7437_v24, %v2998_v15  ;;  %v3360_v35 = vadd.f32 %v7425_v38, %v3260_v6  ;;  %v3346_v61 = vadd.f32 %v7409_v14, %v3248_v39  ;;  %v3267_v42 = vadd.f32 %v7417_v45, %v3164_v21 }
 0x2a2   : > { %v3643_v27 = vpop.f32.mrf.mxu1  ;;  %v3455_v5 = vadd.f32 %v3454_v0, %v3354_v62  ;;  %v3556_v57 = vadd.f32 %v3555_v56, %v3453_v11  ;;  %v3362_v46 = vadd.f32 %v7429_v36, %v3262_v51  ;;  %v3269_v38 = vadd.f32 %v7422_v32, %v3166_v30 }
 0x2a3   : > { %v3564_v33 = vpop.f32.mrf.mxu0  ;;  %v3013_v2 = vcombine.low %v3006_v37, %v3007_v63  ;;  %v3462_v3 = vadd.f32 %v3461_v31, %v3360_v35  ;;  %v3446_v63 = vadd.f32 %v7431_v55, %v3346_v61  ;;  %v3368_v14 = vadd.f32 %v7433_v8, %v3267_v42 }
 0x2a4   : > { %v3645_v15 = vpop.f32.mrf.mxu1  ;;  %v3558_v17 = vadd.f32 %v3557_v54, %v3455_v5  ;;  %v3464_v0 = vadd.f32 %v3463_v23, %v3362_v46  ;;  %v3444_v36 = vadd.f32 %v7427_v43, %v3344_v18  ;;  %v3370_v55 = vadd.f32 %v7435_v12, %v3269_v38 }
 0x2a5   : > { %v3569_v4 = vpop.f32.mrf.mxu0  ;;  %v3027_v47 = vrot.slane %v3013_v2, %v7447_v50  ;;  %v3563_v56 = vadd.f32 %v3562_v13, %v3462_v3  ;;  %v3551_v31 = vadd.f32 %v7442_v7, %v3446_v63  ;;  %v3471_v54 = vadd.f32 %v3470_v29, %v3368_v14 }
 0x2a6   : > { %v3650_v49 = vpop.f32.mrf.mxu1  ;;  %v3565_v44 = vadd.f32 %v3564_v33, %v3464_v0  ;;  %v3549_v43 = vadd.f32 %v7439_v58, %v3444_v36  ;;  %v3473_v23 = vadd.f32 %v7452_v20, %v3370_v55 }
 0x2a7   : > { %v3571_v37 = vpop.f32.mrf.mxu0  ;;  %v3028_v40 = vcombine.low %v3020_v9, %v3027_v47  ;;  %v3651_v10 = vadd.f32 %v3650_v49, %v3556_v57  ;;  %v3646_v8 = vadd.f32 %v3645_v15, %v3551_v31  ;;  %v3570_v12 = vadd.f32 %v3569_v4, %v3471_v54 }
 0x2a8   : > { %v3652_v22 = vpop.f32.mrf.mxu1  ;;  %v3644_v33 = vadd.f32 %v3643_v27, %v3549_v43  ;;  %v3572_v39 = vadd.f32 %v3571_v37, %v3473_v23 }
 0x2a9   : > { %v7490_v26 = vpop.f32.mrf.mxu0  ;;  %v3035_v45 = vrot.slane %v3028_v40, %v7447_v50  ;;  %v3653_v9 = vadd.f32 %v3652_v22, %v3558_v17  ;;  %6003 = vtanh.f32 %v3651_v10 }
 0x2aa   : > { %v3657_v32 = vpop.f32.mrf.mxu1 }
 0x2ab   : > { %v3658_v34 = vadd.f32 %v3657_v32, %v3563_v56  ;;  %v7496_v6 = vpop.f32.mrf.mxu0  ;;  %3041 = vst.msk [vmem:[%s7500_s22] sm:$0xf] %vm7454_vm3, %v3035_v45 }
 0x2ac   : > { %v3659_v7 = vpop.f32.mrf.mxu1 }
 0x2ad   : > { %6005 = vtanh.f32 %v3658_v34  ;;  %v3660_v29 = vadd.f32 %v3659_v7, %v3565_v44  ;;  %v7507_v13 = vpop.f32.mrf.mxu0 }
 0x2ae   : > { %6007 = vtanh.f32 %v3653_v9  ;;  %v3664_v2 = vpop.f32.mrf.mxu1 }
 0x2af   : > { %6009 = vtanh.f32 %v3660_v29  ;;  %v3665_v21 = vadd.f32 %v3664_v2, %v3570_v12  ;;  %v7509_v62 = vpop.f32.mrf.mxu0 }
 0x2b0   : > { %6011 = vtanh.f32 %v3646_v8  ;;  %v3666_v58 = vpop.f32.mrf.mxu1 }
 0x2b1   : > { %6013 = vtanh.f32 %v3665_v21  ;;  %v3667_v11 = vadd.f32 %v3666_v58, %v3572_v39  ;;  %v7511_v15 = vpop.f32.mrf.mxu0 }
 0x2b2   : > { %6015 = vtanh.f32 %v3644_v33  ;;  %v7513_v20 = vpop.f32.mrf.mxu1 }
 0x2b3   : > { %6017 = vtanh.f32 %v3667_v11  ;;  %v7515_v30 = vpop.f32.mrf.mxu0 }
 0x2b4   : > { %v7517_v27 = vpop.f32.mrf.mxu1 }
 0x2b5   : > { %v7519_v51 = vpop.f32.mrf.mxu0 }
 0x2b6   : > { %v7521_v35 = vpop.f32.mrf.mxu1  ;;  %v6004_v18 = vpop.eup %6003 }
 0x2b7   : > { %v7523_v4 = vpop.f32.mrf.mxu0  ;;  %v7549_v45 = vand.u32 4294901760, %v6004_v18 }
 0x2b8   : > { %v7525_v47 = vpop.f32.mrf.mxu1 }
 0x2b9   : > { %v7527_v61 = vpop.f32.mrf.mxu0  ;;  %v7584_v2 = vsub.f32 %v6004_v18, %v7549_v45 }
 0x2ba   : > { %v6006_v5 = vpop.eup %6005  ;;  %v7529_v57 = vpop.f32.mrf.mxu1 }
 0x2bb   : > { %v6008_v49 = vpop.eup %6007  ;;  %v7531_v42 = vpop.f32.mrf.mxu0  ;;  %v7539_v63 = vand.u32 4294901760, %v6006_v5 }
 0x2bc   : > { %v6010_v46 = vpop.eup %6009  ;;  %v7533_v3 = vpop.f32.mrf.mxu1  ;;  %v7543_v22 = vand.u32 4294901760, %v6008_v49 }
 0x2bd   : > { %v6012_v37 = vpop.eup %6011  ;;  %v7535_v40 = vpop.f32.mrf.mxu0  ;;  %v7537_v38 = vand.u32 4294901760, %v6010_v46  ;;  %v7566_v34 = vsub.f32 %v6006_v5, %v7539_v63 }
 0x2be   : > { %v6014_v17 = vpop.eup %6013  ;;  %v7541_v10 = vpop.f32.mrf.mxu1  ;;  %v7556_v32 = vand.u32 4294901760, %v6012_v37  ;;  %v7573_v7 = vsub.f32 %v6008_v49, %v7543_v22 }
 0x2bf   : > { %v6016_v14 = vpop.eup %6015  ;;  %v7545_v0 = vpop.f32.mrf.mxu0  ;;  %v7547_v56 = vand.u32 4294901760, %v6014_v17  ;;  %v7552_v36 = vsub.f32 %v6010_v46, %v7537_v38  ;;  %v8311_v24 = vand.u32 4294901760, %v7566_v34 }
 0x2c0   : > { %v6018_v31 = vpop.eup %6017  ;;  %v7554_v9 = vpop.f32.mrf.mxu1  ;;  %v7570_v8 = vand.u32 4294901760, %v6016_v14  ;;  %v7590_v21 = vsub.f32 %v6012_v37, %v7556_v32  ;;  %v8312_v19 = vand.u32 4294901760, %v7573_v7 }
 0x2c1   : > { %8307 = vst [vmem:[#allocation8_spill] sm:$0xff] %v7552_v36  ;;  %v7558_v55 = vpop.f32.mrf.mxu0  ;;  %v7560_v54 = vand.u32 4294901760, %v6018_v31  ;;  %v7563_v44 = vsub.f32 %v6014_v17, %v7547_v56  ;;  %v8191_v33 = vand.u32 4294901760, %v7552_v36 }
 0x2c2   : > { %v7568_v43 = vpop.f32.mrf.mxu1  ;;  %8309 = vst [vmem:[#allocation9_spill] sm:$0xff] %v7570_v8  ;;  %v7605_v37 = vsub.f32 %v6016_v14, %v7570_v8  ;;  %v4465_v59 = vsub.f32 %v7573_v7, %v8312_v19 }
 0x2c3   : > { %8308 = vst [vmem:[#allocation23_spill] sm:$0xff] %v7568_v43  ;;  %4322 = vmatprep.subr.mxu0 %v7560_v54  ;;  %v7576_v23 = vpop.f32.mrf.mxu0  ;;  %v7579_v12 = vsub.f32 %v6018_v31, %v7560_v54  ;;  %v8183_v29 = vand.u32 4294901760, %v7563_v44  ;;  %v4453_v5 = vsub.f32 %v7552_v36, %v8191_v33  ;;  %v8314_v43 = vand.u32 4294901760, %v7584_v2 }
 0x2c4   : > { %v7586_v39 = vpop.f32.mrf.mxu1  ;;  %4324 = vmatpush1.msra.mxu0 %v7547_v56 }
 0x2c5   : > { %4326 = vmatprep.subr.mxu0 %v7537_v38  ;;  %v7593_v58 = vpop.f32.mrf.mxu0  ;;  %v8188_v11 = vand.u32 4294901760, %v7579_v12  ;;  %v4447_v18 = vsub.f32 %v7563_v44, %v8183_v29 }
 0x2c6   : > { %v7597_v49 = vpop.f32.mrf.mxu1  ;;  %4328 = vmatpush1.msra.mxu0 %v7539_v63 }
 0x2c7   : > { %4330 = vmatprep.subr.mxu0 %v7543_v22  ;;  %v7608_v17 = vpop.f32.mrf.mxu0  ;;  %v4441_v31 = vsub.f32 %v7579_v12, %v8188_v11  ;;  %v4459_v11 = vsub.f32 %v7566_v34, %v8311_v24  ;;  %v4448_v33 = vand.u32 4294901760, %v4447_v18  ;;  %v4471_v24 = vsub.f32 %v7584_v2, %v8314_v43 }
 0x2c8   : > { %v7617_v29 = vpop.f32.mrf.mxu1  ;;  %4332 = vmatpush1.msra.mxu0 %v7549_v45  ;;  %v8315_v18 = vand.u32 4294901760, %v7590_v21  ;;  %v4466_v43 = vand.u32 4294901760, %v4465_v59 }
 0x2c9   : > { %4334 = vmatprep.subr.mxu0 %v7556_v32  ;;  %v7622_v46 = vpop.f32.mrf.mxu0  ;;  %v4442_v50 = vand.u32 4294901760, %v4441_v31  ;;  %v4454_v31 = vand.u32 4294901760, %v4453_v5  ;;  %v4460_v14 = vand.u32 4294901760, %v4459_v11 }
 0x2ca   : > { %8310 = vst [vmem:[#allocation11_spill] sm:$0xff] %v7622_v46  ;;  %v7627_v16 = vpop.f32.mrf.mxu1  ;;  %4336 = vmatpush1.msra.mxu0 %v7570_v8  ;;  %v4477_v19 = vsub.f32 %v7590_v21, %v8315_v18 }
 0x2cb   : > { %4375 = vmatmul.mubr.f32.vlgmr.msra.gmra.mxu0 %v8276_v28  ;;  %4443 = vmatprep.subr.mxu1 %v4442_v50  ;;  %v7635_v46 = vpop.f32.mrf.mxu0  ;;  %v8316_v28 = vand.u32 4294901760, %v7605_v37 }
 0x2cc   : > { %8313 = vst [vmem:[#allocation10_spill] sm:$0xff] %v7635_v46  ;;  %4573 = vmatprep.subr.mxu0 %v7579_v12  ;;  %v7641_v8 = vpop.f32.mrf.mxu1  ;;  %4449 = vmatpush1.msra.mxu1 %v4448_v33  ;;  %v3743_v46 = vadd.f32 %v7490_v26, %v6551_v60  ;;  %v3756_v26 = vadd.f32 %v7509_v62, %v6546_v48 }
 0x2cd   : > { %4576 = vmatpush1.msra.mxu0 %v7563_v44  ;;  %4455 = vmatprep.subr.mxu1 %v4454_v31  ;;  %v7647_v50 = vpop.f32.mrf.mxu0  ;;  %v4483_v33 = vsub.f32 %v7605_v37, %v8316_v28  ;;  %v4472_v31 = vand.u32 4294901760, %v4471_v24  ;;  %v3745_v28 = vadd.f32 %v7496_v6, %v6551_v60  ;;  %v3765_v24 = vadd.f32 %v7511_v15, %v6548_v52 }
 0x2ce   : > { %4579 = vmatprep.subr.mxu0 %v7552_v36  ;;  %v7650_v5 = vpop.f32.mrf.mxu1  ;;  %4380 = vmatprep.mubr.f32.mxu0 %v8250_v1  ;;  %v4478_v36 = vand.u32 4294901760, %v4477_v19  ;;  %v3767_v60 = vadd.f32 %v7515_v30, %v6548_v52  ;;  %v3778_v52 = vadd.f32 %v7523_v4, %v6544_v41 }
 0x2cf   : > { %4461 = vmatpush1.msra.mxu1 %v4460_v14  ;;  %4582 = vmatpush1.msra.mxu0 %v7566_v34  ;;  %v7657_v18 = vpop.f32.mrf.mxu0  ;;  %v3754_v14 = vadd.f32 %v7507_v13, %v6546_v48  ;;  %v3860_v6 = vadd.f32 %v7517_v27, %v3745_v28  ;;  %v3776_v13 = vadd.f32 %v7519_v51, %v6544_v41  ;;  %v8317_v27 = vld [vmem:[#allocation24_spill] sm:$0xff]  ;;  %v8319_v28 = vld [vmem:[#allocation45_spill] sm:$0xff] }
 0x2d0   : > { %4386 = vmatmul.mubr.f32.gmra.mxu0 %v8277_v25  ;;  %4467 = vmatprep.subr.mxu1 %v4466_v43  ;;  %v7660_v11 = vpop.f32.mrf.mxu1  ;;  %v4484_v43 = vand.u32 4294901760, %v4483_v33  ;;  %v3872_v15 = vadd.f32 %v7529_v57, %v3765_v24  ;;  %v3874_v30 = vadd.f32 %v7533_v3, %v3767_v60  ;;  %v3867_v51 = vadd.f32 %v7525_v47, %v3756_v26  ;;  %v8322_v60 = vld [vmem:[#allocation25_spill] sm:$0xff] }
 0x2d1   : > { %4585 = vmatprep.subr.mxu0 %v7573_v7  ;;  %4473 = vmatpush1.msra.mxu1 %v4472_v31  ;;  %v4174_v59 = vpop.f32.mrf.mxu0  ;;  %v3858_v31 = vadd.f32 %v7513_v20, %v3743_v46  ;;  %v3865_v20 = vadd.f32 %v7521_v35, %v3754_v14  ;;  %v8318_v46 = vand.u32 4294901760, %v7579_v12  ;;  %v3958_v41 = vadd.f32 %v7531_v42, %v3860_v6  ;;  %v8320_v14 = vld [vmem:[#allocation26_spill] sm:$0xff] }
 0x2d2   : > { %4588 = vmatpush1.msra.mxu0 %v7584_v2  ;;  %4479 = vmatprep.subr.mxu1 %v4478_v36  ;;  %v7672_v19 = vpop.f32.mrf.mxu1  ;;  %v3972_v36 = vadd.f32 %v7558_v55, %v3872_v15  ;;  %v3879_v4 = vadd.f32 %v7541_v10, %v3776_v13  ;;  %v3974_v3 = vadd.f32 %v7576_v23, %v3874_v30  ;;  %v8323_v13 = vld [vmem:[#allocation23_spill] sm:$0xff] }
 0x2d3   : > { %4591 = vmatprep.subr.mxu0 %v7590_v21  ;;  %4391 = vmatprep.mubr.f32.mxu0 %v8250_v1  ;;  %v4176_v48 = vpop.f32.mrf.mxu0  ;;  %v3956_v57 = vadd.f32 %v7527_v61, %v3858_v31  ;;  %v3964_v47 = vadd.f32 %v7535_v40, %v3865_v20  ;;  %v3966_v61 = vadd.f32 %v7545_v0, %v3867_v51  ;;  %v8325_v20 = vand.u32 4294901760, %v7563_v44  ;;  %v8326_v30 = vld [vmem:[#allocation10_spill] sm:$0xff] }
 0x2d4   : > { %4485 = vmatpush1.msra.mxu1 %v4484_v43  ;;  %4594 = vmatpush1.msra.mxu0 %v7605_v37  ;;  %v7686_v62 = vpop.f32.mrf.mxu1  ;;  %v4074_v55 = vadd.f32 %v7627_v16, %v3972_v36  ;;  %v3881_v10 = vadd.f32 %v7554_v9, %v3778_v52  ;;  %v3980_v23 = vadd.f32 %v7593_v58, %v3879_v4  ;;  %v8327_v36 = vld [vmem:[#allocation8_spill] sm:$0xff] }
 0x2d5   : > { %4397 = vmatmul.mubr.f32.gmra.mxu0 %v6776_v53  ;;  %4520 = vmatmul.mubr.f32.vlgmr.msra.gmra.mxu1 %v8317_v27  ;;  %v4181_v12 = vpop.f32.mrf.mxu0  ;;  %v4076_v33 = vadd.f32 %v7641_v8, %v3974_v3  ;;  %v4058_v40 = vadd.f32 %v7586_v39, %v3958_v41  ;;  %v4067_v16 = vadd.f32 %v7617_v29, %v3966_v61  ;;  %v8330_v3 = vand.u32 4294901760, %v7566_v34 }
 0x2d6   : > { %4685 = vmatprep.subr.mxu1 %v7560_v54  ;;  %4796 = vmatprep.subr.mxu0 %v8318_v46  ;;  %v4262_v35 = vpop.f32.mrf.mxu1  ;;  %v4175_v0 = vadd.f32 %v4174_v59, %v4074_v55  ;;  %v3982_v9 = vadd.f32 %v7608_v17, %v3881_v10  ;;  %v4083_v58 = vadd.f32 %v7650_v5, %v3980_v23  ;;  %v8321_v5 = vld [vmem:[#allocation9_spill] sm:$0xff]  ;;  %v8328_v46 = vand.u32 4294901760, %v8327_v36 }
 0x2d7   : > { %4687 = vmatpush1.msra.mxu1 %v7547_v56  ;;  %4402 = vmatprep.mubr.f32.mxu0 %v8250_v1  ;;  %v4177_v43 = vadd.f32 %v4176_v48, %v4076_v33  ;;  %v4065_v8 = vadd.f32 %v7597_v49, %v3964_v47  ;;  %v4170_v39 = vadd.f32 %v7657_v18, %v4067_v16  ;;  %v4183_v29 = vpop.f32.mrf.mxu0  ;;  %v8324_v48 = vld [vmem:[#allocation32_spill] sm:$0xff]  ;;  %v8334_v34 = vand.u32 4294901760, %v7584_v2  ;;  %v8339_v2 = vld [vmem:[#allocation41_spill] sm:$0xff] }
 0x2d8   : > { %4689 = vmatprep.subr.mxu1 %v7537_v38  ;;  %4525 = vmatprep.mubr.f32.mxu1 %v8250_v1  ;;  %v4264_v42 = vpop.f32.mrf.mxu1  ;;  %v4085_v17 = vadd.f32 %v7660_v11, %v3982_v9  ;;  %v4182_v31 = vadd.f32 %v4181_v12, %v4083_v58  ;;  %v4056_v15 = vadd.f32 %v8323_v13, %v3956_v57  ;;  %v8329_v57 = vld [vmem:[#allocation11_spill] sm:$0xff] }
 0x2d9   : > { %4691 = vmatpush1.msra.mxu1 %v7539_v63  ;;  %4408 = vmatmul.mubr.f32.gmra.mxu0 %v8319_v28  ;;  %v4168_v49 = vadd.f32 %v7647_v50, %v4065_v8  ;;  %v4265_v18 = vadd.f32 %v4264_v42, %v4170_v39  ;;  %v4163_v51 = vadd.f32 %v8326_v30, %v4058_v40  ;;  %v8333_v12 = vld [vmem:[#allocation31_spill] sm:$0xff] }
 0x2da   : > { %4527 = vmatmul.mubr.f32.gmra.mxu1 %v8320_v14  ;;  %4693 = vmatprep.subr.mxu1 %v7543_v22  ;;  %v4269_v24 = vpop.f32.mrf.mxu1  ;;  %v4184_v11 = vadd.f32 %v4183_v29, %v4085_v17  ;;  %v4161_v4 = vadd.f32 %v8329_v57, %v4056_v15  ;;  %v8338_v42 = vld [vmem:[#allocation27_spill] sm:$0xff] }
 0x2db   : > { %4695 = vmatpush1.msra.mxu1 %v7549_v45  ;;  %4532 = vmatprep.mubr.f32.mxu1 %v8250_v1  ;;  %v4270_v59 = vadd.f32 %v4269_v24, %v4175_v0  ;;  %v4263_v50 = vadd.f32 %v4262_v35, %v4168_v49  ;;  %v4258_v47 = vadd.f32 %v7686_v62, %v4163_v51  ;;  %v8332_v35 = vld [vmem:[#allocation37_spill] sm:$0xff]  ;;  %v8335_v62 = vand.u32 4294901760, %v7590_v21  ;;  %v8340_v21 = vld [vmem:[#allocation35_spill] sm:$0xff] }
 0x2dc   : > { %4697 = vmatprep.subr.mxu1 %v7556_v32  ;;  %4627 = vmatprep.mubr.f32.mxu0 %v8250_v1  ;;  %v4271_v26 = vpop.f32.mrf.mxu1  ;;  %v4256_v55 = vadd.f32 %v7672_v19, %v4161_v4  ;;  %v8337_v19 = vld [vmem:[#allocation36_spill] sm:$0xff]  ;;  %v8342_v9 = vld [vmem:[#allocation43_spill] sm:$0xff] }
 0x2dd   : > { %4699 = vmatpush1.msra.mxu1 %v8321_v5  ;;  %4630 = vmatmul.mubr.f32.vlgmr.msra.gmra.mxu0 %v8322_v60  ;;  %v4272_v6 = vadd.f32 %v4271_v26, %v4177_v43  ;;  %v8343_v57 = vld [vmem:[#allocation39_spill] sm:$0xff] }
 0x2de   : > { %4534 = vmatmul.mubr.f32.gmra.mxu1 %v8324_v48  ;;  %4800 = vmatpush1.msra.mxu0 %v8325_v20  ;;  %v4276_v52 = vpop.f32.mrf.mxu1 }
 0x2df   : > { %4911 = vmatprep.subr.mxu1 %v7560_v54  ;;  %6019 = vtanh.f32 %v4272_v6  ;;  %4804 = vmatprep.subr.mxu0 %v8328_v46  ;;  %v4277_v41 = vadd.f32 %v4276_v52, %v4182_v31  ;;  %v8331_v54 = vand.u32 4294901760, %v7573_v7  ;;  %v8336_v7 = vand.u32 4294901760, %v7605_v37 }
 0x2e0   : > { %6021 = vtanh.f32 %v4270_v59  ;;  %4808 = vmatpush1.msra.mxu0 %v8330_v3  ;;  %4539 = vmatprep.mubr.f32.mxu1 %v8250_v1  ;;  %v4278_v44 = vpop.f32.mrf.mxu1 }
 0x2e1   : > { %6023 = vtanh.f32 %v4277_v41  ;;  %4635 = vmatprep.mubr.f32.mxu0 %v8250_v1  ;;  %4812 = vmatprep.subr.mxu0 %v8331_v54  ;;  %v4279_v61 = vadd.f32 %v4278_v44, %v4184_v11 }
 0x2e2   : > { %6025 = vtanh.f32 %v4265_v18  ;;  %4541 = vmatmul.mubr.f32.gmra.mxu1 %v8332_v35  ;;  %4638 = vmatmul.mubr.f32.gmra.mxu0 %v8333_v12 }
 0x2e3   : > { %4816 = vmatpush1.msra.mxu0 %v8334_v34  ;;  %6027 = vtanh.f32 %v4279_v61  ;;  %4643 = vmatprep.mubr.f32.mxu0 %v8250_v1 }
 0x2e4   : > { %6029 = vtanh.f32 %v4263_v50  ;;  %4820 = vmatprep.subr.mxu0 %v8335_v62  ;;  %4732 = vmatprep.mubr.f32.mxu1 %v8250_v1 }
 0x2e5   : > { %6031 = vtanh.f32 %v4258_v47  ;;  %4824 = vmatpush1.msra.mxu0 %v8336_v7 }
 0x2e6   : > { %6033 = vtanh.f32 %v4256_v55  ;;  %4646 = vmatmul.mubr.f32.gmra.mxu0 %v8337_v19  ;;  %4736 = vmatmul.mubr.f32.vlgmr.msra.gmra.mxu1 %v8338_v42 }
 0x2e7   : > { %4913 = vmatpush1.msra.mxu1 %v7547_v56  ;;  %4651 = vmatprep.mubr.f32.mxu0 %v8250_v1 }
 0x2e8   : > { %4915 = vmatprep.subr.mxu1 %v7537_v38  ;;  %4741 = vmatprep.mubr.f32.mxu1 %v8250_v1 }
 0x2e9   : > { %4917 = vmatpush1.msra.mxu1 %v7539_v63 }
 0x2ea   : > { %4919 = vmatprep.subr.mxu1 %v7543_v22  ;;  %4654 = vmatmul.mubr.f32.gmra.mxu0 %v8339_v2  ;;  %v8341_v22 = vld [vmem:[#allocation40_spill] sm:$0xff] }
 0x2eb   : > { %4745 = vmatmul.mubr.f32.gmra.mxu1 %v8340_v21  ;;  %4857 = vmatprep.mubr.f32.mxu0 %v8250_v1 }
 0x2ec   : > { %v6020_v37 = vpop.eup %6019  ;;  %4921 = vmatpush1.msra.mxu1 %v7549_v45  ;;  %4750 = vmatprep.mubr.f32.mxu1 %v8250_v1 }
 0x2ed   : > { %v6022_v56 = vpop.eup %6021  ;;  %4923 = vmatprep.subr.mxu1 %v7556_v32  ;;  %v7778_v23 = vand.u32 4294901760, %v6020_v37 }
 0x2ee   : > { %v6024_v38 = vpop.eup %6023  ;;  %4925 = vmatpush1.msra.mxu1 %v8321_v5  ;;  %4859 = vmatmul.mubr.f32.vlgmr.msra.gmra.mxu0 %v8317_v27  ;;  %v7783_v32 = vand.u32 4294901760, %v6022_v56 }
 0x2ef   : > { %v6026_v63 = vpop.eup %6025  ;;  %4754 = vmatmul.mubr.f32.gmra.mxu1 %v8341_v22  ;;  %4864 = vmatprep.mubr.f32.mxu0 %v8250_v1  ;;  %v7776_v10 = vand.u32 4294901760, %v6024_v38  ;;  %v7797_v8 = vsub.f32 %v6020_v37, %v7778_v23 }
 0x2f0   : > { %v6028_v45 = vpop.eup %6027  ;;  %4759 = vmatprep.mubr.f32.mxu1 %v8250_v1  ;;  %v7791_v58 = vand.u32 4294901760, %v6026_v63  ;;  %v7808_v26 = vsub.f32 %v6022_v56, %v7783_v32 }
 0x2f1   : > { %v6030_v33 = vpop.eup %6029  ;;  %v7781_v40 = vand.u32 4294901760, %v6028_v45  ;;  %v7787_v0 = vsub.f32 %v6024_v38, %v7776_v10  ;;  %v5142_v6 = vand.u32 4294901760, %v7797_v8 }
 0x2f2   : > { %v6032_v16 = vpop.eup %6031  ;;  %4866 = vmatmul.mubr.f32.gmra.mxu0 %v8320_v14  ;;  %v7801_v39 = vand.u32 4294901760, %v6030_v33  ;;  %v7822_v13 = vsub.f32 %v6026_v63, %v7791_v58  ;;  %v5148_v49 = vand.u32 4294901760, %v7808_v26  ;;  %v8345_v63 = vld [vmem:[#allocation38_spill] sm:$0xff] }
 0x2f3   : > { %v6034_v24 = vpop.eup %6033  ;;  %4763 = vmatmul.mubr.f32.gmra.mxu1 %v8342_v9  ;;  %4871 = vmatprep.mubr.f32.mxu0 %v8250_v1  ;;  %v7794_v43 = vsub.f32 %v6028_v45, %v7781_v40  ;;  %v7804_v29 = vand.u32 4294901760, %v6032_v16  ;;  %v5136_v31 = vand.u32 4294901760, %v7787_v0  ;;  %v5143_v51 = vsub.f32 %v7797_v8, %v5142_v6 }
 0x2f4   : > { %4958 = vmatprep.mubr.f32.mxu1 %v8250_v1  ;;  %5012 = vmatprep.subr.mxu0 %v7781_v40  ;;  %v7812_v17 = vand.u32 4294901760, %v6034_v24  ;;  %v7827_v15 = vsub.f32 %v6030_v33, %v7801_v39  ;;  %v5154_v11 = vand.u32 4294901760, %v7822_v13  ;;  %v5149_v46 = vsub.f32 %v7808_v26, %v5148_v49  ;;  %v8346_v33 = vld [vmem:[#allocation30_spill] sm:$0xff] }
 0x2f5   : > { %5014 = vmatpush1.msra.mxu0 %v7776_v10  ;;  %v5130_v59 = vand.u32 4294901760, %v7794_v43  ;;  %v7832_v18 = vsub.f32 %v6032_v16, %v7804_v29  ;;  %v5137_v52 = vsub.f32 %v7787_v0, %v5136_v31  ;;  %v5144_v3 = vand.u32 4294901760, %v5143_v51 }
 0x2f6   : > { %4873 = vmatmul.mubr.f32.gmra.mxu0 %v8324_v48  ;;  %5016 = vmatprep.subr.mxu0 %v7778_v23  ;;  %v7839_v30 = vsub.f32 %v6034_v24, %v7812_v17  ;;  %v5160_v36 = vand.u32 4294901760, %v7827_v15  ;;  %v5155_v44 = vsub.f32 %v7822_v13, %v5154_v11  ;;  %v5150_v54 = vand.u32 4294901760, %v5149_v46 }
 0x2f7   : > { %4960 = vmatmul.mubr.f32.vlgmr.msra.gmra.mxu1 %v8317_v27  ;;  %4878 = vmatprep.mubr.f32.mxu0 %v8250_v1  ;;  %v5131_v5 = vsub.f32 %v7794_v43, %v5130_v59  ;;  %v5166_v41 = vand.u32 4294901760, %v7832_v18  ;;  %v5138_v4 = vand.u32 4294901760, %v5137_v52 }
 0x2f8   : > { %4965 = vmatprep.mubr.f32.mxu1 %v8250_v1  ;;  %5018 = vmatpush1.msra.mxu0 %v7783_v32  ;;  %v5172_v50 = vand.u32 4294901760, %v7839_v30  ;;  %v5161_v47 = vsub.f32 %v7827_v15, %v5160_v36  ;;  %v5156_v34 = vand.u32 4294901760, %v5155_v44 }
 0x2f9   : > { %5020 = vmatprep.subr.mxu0 %v7791_v58  ;;  %v5132_v20 = vand.u32 4294901760, %v5131_v5  ;;  %v5167_v61 = vsub.f32 %v7832_v18, %v5166_v41 }
 0x2fa   : > { %4880 = vmatmul.mubr.f32.gmra.mxu0 %v8332_v35  ;;  %v5173_v55 = vsub.f32 %v7839_v30, %v5172_v50  ;;  %v5162_v62 = vand.u32 4294901760, %v5161_v47 }
 0x2fb   : > { %4967 = vmatmul.mubr.f32.gmra.mxu1 %v8320_v14  ;;  %5022 = vmatpush1.msra.mxu0 %v7801_v39  ;;  %v5168_v7 = vand.u32 4294901760, %v5167_v61 }
 0x2fc   : > { %5024 = vmatprep.subr.mxu0 %v7804_v29  ;;  %4972 = vmatprep.mubr.f32.mxu1 %v8250_v1  ;;  %v5174_v37 = vand.u32 4294901760, %v5173_v55 }
 0x2fd   : > { %5026 = vmatpush1.msra.mxu0 %v7812_v17  ;;  %5059 = vmatprep.mubr.f32.mxu0 %v8250_v1 }
 0x2fe   : > { %5065 = vmatmul.mubr.f32.vlgmr.msra.gmra.mxu0 %v8343_v57  ;;  %5133 = vmatprep.subr.mxu1 %v5132_v20 }
 0x2ff   : > { %4974 = vmatmul.mubr.f32.gmra.mxu1 %v8324_v48  ;;  %5263 = vmatprep.subr.mxu0 %v7794_v43 }
 0x300   : > { %5139 = vmatpush1.msra.mxu1 %v5138_v4  ;;  %5266 = vmatpush1.msra.mxu0 %v7787_v0 }
 0x301   : > { %5145 = vmatprep.subr.mxu1 %v5144_v3  ;;  %5269 = vmatprep.subr.mxu0 %v7797_v8 }
 0x302   : > { %4979 = vmatprep.mubr.f32.mxu1 %v8250_v1  ;;  %5070 = vmatprep.mubr.f32.mxu0 %v8250_v1 }
 0x303   : > { %5151 = vmatpush1.msra.mxu1 %v5150_v54  ;;  %5272 = vmatpush1.msra.mxu0 %v7808_v26 }
 0x304   : > { %4981 = vmatmul.mubr.f32.gmra.mxu1 %v8332_v35  ;;  %5076 = vmatmul.mubr.f32.gmra.mxu0 %v8277_v25 }
 0x305   : > { %5157 = vmatprep.subr.mxu1 %v5156_v34  ;;  %5275 = vmatprep.subr.mxu0 %v7822_v13 }
 0x306   : > { %5163 = vmatpush1.msra.mxu1 %v5162_v62  ;;  %5278 = vmatpush1.msra.mxu0 %v7827_v15 }
 0x307   : > { %5169 = vmatprep.subr.mxu1 %v5168_v7  ;;  %5281 = vmatprep.subr.mxu0 %v7832_v18 }
 0x308   : > { %5081 = vmatprep.mubr.f32.mxu0 %v8250_v1  ;;  %5175 = vmatpush1.msra.mxu1 %v5174_v37 }
 0x309   : > { %5208 = vmatprep.mubr.f32.mxu1 %v8250_v1  ;;  %5284 = vmatpush1.msra.mxu0 %v7839_v30 }
 0x30a   : > { %5087 = vmatmul.mubr.f32.gmra.mxu0 %v6776_v53  ;;  %5210 = vmatmul.mubr.f32.vlgmr.msra.gmra.mxu1 %v8317_v27 }
 0x30b   : > { %5375 = vmatprep.subr.mxu1 %v7781_v40  ;;  %5486 = vmatprep.subr.mxu0 %v5130_v59 }
 0x30c   : > { %5377 = vmatpush1.msra.mxu1 %v7776_v10  ;;  %5092 = vmatprep.mubr.f32.mxu0 %v8250_v1 }
 0x30d   : > { %5379 = vmatprep.subr.mxu1 %v7778_v23  ;;  %5215 = vmatprep.mubr.f32.mxu1 %v8250_v1 }
 0x30e   : > { %5381 = vmatpush1.msra.mxu1 %v7783_v32  ;;  %5098 = vmatmul.mubr.f32.gmra.mxu0 %v8319_v28 }
 0x30f   : > { %5217 = vmatmul.mubr.f32.gmra.mxu1 %v8320_v14  ;;  %5383 = vmatprep.subr.mxu1 %v7791_v58 }
 0x310   : > { %5385 = vmatpush1.msra.mxu1 %v7801_v39  ;;  %5222 = vmatprep.mubr.f32.mxu1 %v8250_v1 }
 0x311   : > { %5387 = vmatprep.subr.mxu1 %v7804_v29  ;;  %5317 = vmatprep.mubr.f32.mxu0 %v8250_v1 }
 0x312   : > { %5389 = vmatpush1.msra.mxu1 %v7812_v17  ;;  %5320 = vmatmul.mubr.f32.vlgmr.msra.gmra.mxu0 %v8322_v60  ;;  %v8344_v60 = vld [vmem:[#allocation28_spill] sm:$0xff] }
 0x313   : > { %5224 = vmatmul.mubr.f32.gmra.mxu1 %v8324_v48  ;;  %5490 = vmatpush1.msra.mxu0 %v5136_v31 }
 0x314   : > { %5601 = vmatprep.subr.mxu1 %v7781_v40  ;;  %5494 = vmatprep.subr.mxu0 %v5142_v6 }
 0x315   : > { %5498 = vmatpush1.msra.mxu0 %v5148_v49  ;;  %5229 = vmatprep.mubr.f32.mxu1 %v8250_v1 }
 0x316   : > { %5325 = vmatprep.mubr.f32.mxu0 %v8250_v1  ;;  %5502 = vmatprep.subr.mxu0 %v5154_v11 }
 0x317   : > { %5231 = vmatmul.mubr.f32.gmra.mxu1 %v8332_v35  ;;  %5328 = vmatmul.mubr.f32.gmra.mxu0 %v8333_v12 }
 0x318   : > { %5506 = vmatpush1.msra.mxu0 %v5160_v36  ;;  %5333 = vmatprep.mubr.f32.mxu0 %v8250_v1 }
 0x319   : > { %5510 = vmatprep.subr.mxu0 %v5166_v41  ;;  %5422 = vmatprep.mubr.f32.mxu1 %v8250_v1 }
 0x31a   : > { %5514 = vmatpush1.msra.mxu0 %v5172_v50 }
 0x31b   : > { %5336 = vmatmul.mubr.f32.gmra.mxu0 %v8337_v19  ;;  %5426 = vmatmul.mubr.f32.vlgmr.msra.gmra.mxu1 %v8338_v42 }
 0x31c   : > { %5603 = vmatpush1.msra.mxu1 %v7776_v10  ;;  %5341 = vmatprep.mubr.f32.mxu0 %v8250_v1 }
 0x31d   : > { %5605 = vmatprep.subr.mxu1 %v7778_v23  ;;  %5431 = vmatprep.mubr.f32.mxu1 %v8250_v1 }
 0x31e   : > { %5607 = vmatpush1.msra.mxu1 %v7783_v32 }
 0x31f   : > { %5609 = vmatprep.subr.mxu1 %v7791_v58  ;;  %5344 = vmatmul.mubr.f32.gmra.mxu0 %v8339_v2 }
 0x320   : > { %5435 = vmatmul.mubr.f32.gmra.mxu1 %v8340_v21  ;;  %5547 = vmatprep.mubr.f32.mxu0 %v8250_v1 }
 0x321   : > { %5611 = vmatpush1.msra.mxu1 %v7801_v39  ;;  %5440 = vmatprep.mubr.f32.mxu1 %v8250_v1 }
 0x322   : > { %5613 = vmatprep.subr.mxu1 %v7804_v29  ;;  %v8347_v29 = vld [vmem:[#allocation34_spill] sm:$0xff] }
 0x323   : > { %5615 = vmatpush1.msra.mxu1 %v7812_v17  ;;  %5549 = vmatmul.mubr.f32.vlgmr.msra.gmra.mxu0 %v8317_v27 }
 0x324   : > { %5444 = vmatmul.mubr.f32.gmra.mxu1 %v8341_v22  ;;  %5554 = vmatprep.mubr.f32.mxu0 %v8250_v1 }
 0x325   : > { %5449 = vmatprep.mubr.f32.mxu1 %v8250_v1 }
 0x327   : > { %5556 = vmatmul.mubr.f32.gmra.mxu0 %v8320_v14 }
 0x328   : > { %5453 = vmatmul.mubr.f32.gmra.mxu1 %v8342_v9  ;;  %5561 = vmatprep.mubr.f32.mxu0 %v8250_v1 }
 0x329   : > { %5648 = vmatprep.mubr.f32.mxu1 %v8250_v1 }
 0x32b   : > { %5563 = vmatmul.mubr.f32.gmra.mxu0 %v8324_v48 }
 0x32c   : > { %5650 = vmatmul.mubr.f32.vlgmr.msra.gmra.mxu1 %v8317_v27  ;;  %5568 = vmatprep.mubr.f32.mxu0 %v8250_v1 }
 0x32d   : > { %5655 = vmatprep.mubr.f32.mxu1 %v8250_v1 }
 0x32f   : > { %5570 = vmatmul.mubr.f32.gmra.mxu0 %v8332_v35 }
 0x330   : > { %5657 = vmatmul.mubr.f32.gmra.mxu1 %v8320_v14 }
 0x331   : > { %5662 = vmatprep.mubr.f32.mxu1 %v8250_v1 }
 0x334   : > { %5664 = vmatmul.mubr.f32.gmra.mxu1 %v8324_v48 }
 0x335   : > { %5669 = vmatprep.mubr.f32.mxu1 %v8250_v1 }
 0x338   : > { %5671 = vmatmul.mubr.f32.gmra.mxu1 %v8332_v35 }
 0x38b   : > { %v4376_v53 = vpop.f32.mrf.mxu0 }
 0x38c   : > { %v4377_v12 = vadd.f32 %v4376_v53, %v8344_v60 }
 0x38d   : > { %v4378_v25 = vpop.f32.mrf.mxu0 }
 0x38e   : > { %v4379_v2 = vadd.f32 %v4378_v25, %v8344_v60 }
 0x390   : > { %v4387_v28 = vpop.f32.mrf.mxu0 }
 0x391   : > { %v4388_v48 = vadd.f32 %v4387_v28, %v8345_v63 }
 0x392   : > { %v4389_v27 = vpop.f32.mrf.mxu0 }
 0x393   : > { %v4390_v35 = vadd.f32 %v4389_v27, %v8345_v63 }
 0x395   : > { %v4398_v19 = vpop.f32.mrf.mxu0  ;;  %v4521_v42 = vpop.f32.mrf.mxu1 }
 0x396   : > { %v4522_v21 = vadd.f32 %v4521_v42, %v4377_v12  ;;  %v4399_v40 = vadd.f32 %v4398_v19, %v8346_v33 }
 0x397   : > { %v4400_v14 = vpop.f32.mrf.mxu0  ;;  %v4523_v56 = vpop.f32.mrf.mxu1 }
 0x398   : > { %v4524_v38 = vadd.f32 %v4523_v56, %v4379_v2  ;;  %v4401_v9 = vadd.f32 %v4400_v14, %v8346_v33 }
 0x399   : > { %v4409_v22 = vpop.f32.mrf.mxu0 }
 0x39a   : > { %v4528_v1 = vpop.f32.mrf.mxu1  ;;  %v4410_v59 = vadd.f32 %v4409_v22, %v8347_v29 }
 0x39b   : > { %v4529_v10 = vadd.f32 %v4528_v1, %v4388_v48  ;;  %v4411_v23 = vpop.f32.mrf.mxu0 }
 0x39c   : > { %v4530_v45 = vpop.f32.mrf.mxu1  ;;  %v4412_v5 = vadd.f32 %v4411_v23, %v8347_v29 }
 0x39d   : > { %v4531_v32 = vadd.f32 %v4530_v45, %v4390_v35  ;;  %v4631_v16 = vpop.f32.mrf.mxu0 }
 0x39e   : > { %v4535_v0 = vpop.f32.mrf.mxu1  ;;  %v4632_v24 = vadd.f32 %v4631_v16, %v4522_v21 }
 0x39f   : > { %v4536_v58 = vadd.f32 %v4535_v0, %v4399_v40  ;;  %v4633_v43 = vpop.f32.mrf.mxu0 }
 0x3a0   : > { %v4537_v8 = vpop.f32.mrf.mxu1  ;;  %v4634_v39 = vadd.f32 %v4633_v43, %v4524_v38 }
 0x3a1   : > { %v4538_v26 = vadd.f32 %v4537_v8, %v4401_v9 }
 0x3a2   : > { %v4542_v17 = vpop.f32.mrf.mxu1  ;;  %v4639_v31 = vpop.f32.mrf.mxu0 }
 0x3a3   : > { %v4543_v6 = vadd.f32 %v4542_v17, %v4410_v59  ;;  %v4640_v13 = vadd.f32 %v4639_v31, %v4529_v10 }
 0x3a4   : > { %v4544_v15 = vpop.f32.mrf.mxu1  ;;  %v4641_v49 = vpop.f32.mrf.mxu0 }
 0x3a5   : > { %v4545_v18 = vadd.f32 %v4544_v15, %v4412_v5  ;;  %v4642_v20 = vadd.f32 %v4641_v49, %v4531_v32 }
 0x3a6   : > { %v4647_v52 = vpop.f32.mrf.mxu0  ;;  %v4737_v30 = vpop.f32.mrf.mxu1 }
 0x3a7   : > { %v4648_v51 = vadd.f32 %v4647_v52, %v4536_v58  ;;  %v4738_v11 = vadd.f32 %v4737_v30, %v4632_v24 }
 0x3a8   : > { %v4649_v36 = vpop.f32.mrf.mxu0  ;;  %v4739_v46 = vpop.f32.mrf.mxu1 }
 0x3a9   : > { %v4740_v41 = vadd.f32 %v4739_v46, %v4634_v39  ;;  %v4650_v22 = vadd.f32 %v4649_v36, %v4538_v26  ;;  %v8348_v46 = vld [vmem:[#allocation33_spill] sm:$0xff] }
 0x3aa   : > { %v4655_v57 = vpop.f32.mrf.mxu0 }
 0x3ab   : > { %v4746_v4 = vpop.f32.mrf.mxu1  ;;  %v4656_v0 = vadd.f32 %v4655_v57, %v4543_v6  ;;  %v8349_v57 = vld [vmem:[#allocation29_spill] sm:$0xff] }
 0x3ac   : > { %v4747_v50 = vadd.f32 %v4746_v4, %v4640_v13  ;;  %v4657_v3 = vpop.f32.mrf.mxu0 }
 0x3ad   : > { %v4748_v44 = vpop.f32.mrf.mxu1  ;;  %v4658_v8 = vadd.f32 %v4657_v3, %v4545_v18 }
 0x3ae   : > { %v4749_v47 = vadd.f32 %v4748_v44, %v4642_v20  ;;  %v4860_v54 = vpop.f32.mrf.mxu0 }
 0x3af   : > { %v4755_v61 = vpop.f32.mrf.mxu1  ;;  %v4861_v28 = vadd.f32 %v4860_v54, %v4738_v11 }
 0x3b0   : > { %v4756_v55 = vadd.f32 %v4755_v61, %v4648_v51  ;;  %v4862_v34 = vpop.f32.mrf.mxu0 }
 0x3b1   : > { %v4757_v62 = vpop.f32.mrf.mxu1  ;;  %v4863_v19 = vadd.f32 %v4862_v34, %v4740_v41 }
 0x3b2   : > { %v4867_v7 = vpop.f32.mrf.mxu0  ;;  %v4758_v45 = vadd.f32 %v4757_v62, %v4650_v22 }
 0x3b3   : > { %v4764_v37 = vpop.f32.mrf.mxu1  ;;  %v4868_v14 = vadd.f32 %v4867_v7, %v4747_v50 }
 0x3b4   : > { %v4869_v53 = vpop.f32.mrf.mxu0  ;;  %v4765_v39 = vadd.f32 %v4764_v37, %v4656_v0  ;;  %v8350_v37 = vld [vmem:[#allocation44_spill] sm:$0xff] }
 0x3b5   : > { %v4766_v25 = vpop.f32.mrf.mxu1  ;;  %v4870_v1 = vadd.f32 %v4869_v53, %v4749_v47 }
 0x3b6   : > { %v4874_v27 = vpop.f32.mrf.mxu0  ;;  %v4767_v17 = vadd.f32 %v4766_v25, %v4658_v8 }
 0x3b7   : > { %v4961_v12 = vpop.f32.mrf.mxu1  ;;  %v4875_v40 = vadd.f32 %v4874_v27, %v4756_v55 }
 0x3b8   : > { %v4962_v42 = vadd.f32 %v4961_v12, %v4861_v28  ;;  %v4876_v2 = vpop.f32.mrf.mxu0 }
 0x3b9   : > { %v4963_v21 = vpop.f32.mrf.mxu1  ;;  %v4877_v9 = vadd.f32 %v4876_v2, %v4758_v45 }
 0x3ba   : > { %v4964_v56 = vadd.f32 %v4963_v21, %v4863_v19  ;;  %v4881_v38 = vpop.f32.mrf.mxu0  ;;  %6035 = vtanh.f32 %v4962_v42 }
 0x3bb   : > { %v4968_v48 = vpop.f32.mrf.mxu1  ;;  %v4882_v31 = vadd.f32 %v4881_v38, %v4765_v39  ;;  %v8351_v38 = vld [vmem:[#allocation42_spill] sm:$0xff] }
 0x3bc   : > { %v4969_v35 = vadd.f32 %v4968_v48, %v4868_v14  ;;  %v4883_v10 = vpop.f32.mrf.mxu0  ;;  %6037 = vtanh.f32 %v4964_v56 }
 0x3bd   : > { %v4970_v23 = vpop.f32.mrf.mxu1  ;;  %v4884_v15 = vadd.f32 %v4883_v10, %v4767_v17 }
 0x3be   : > { %6039 = vtanh.f32 %v4969_v35  ;;  %v4971_v32 = vadd.f32 %v4970_v23, %v4870_v1  ;;  %v7967_v16 = vpop.f32.mrf.mxu0 }
 0x3bf   : > { %v4975_v24 = vpop.f32.mrf.mxu1 }
 0x3c0   : > { %6041 = vtanh.f32 %v4971_v32  ;;  %v4976_v58 = vadd.f32 %v4975_v24, %v4875_v40  ;;  %v7969_v43 = vpop.f32.mrf.mxu0 }
 0x3c1   : > { %v4977_v59 = vpop.f32.mrf.mxu1 }
 0x3c2   : > { %6043 = vtanh.f32 %v4976_v58  ;;  %v4978_v26 = vadd.f32 %v4977_v59, %v4877_v9 }
 0x3c4   : > { %6045 = vtanh.f32 %v4978_v26  ;;  %v4982_v5 = vpop.f32.mrf.mxu1  ;;  %v7971_v13 = vpop.f32.mrf.mxu0 }
 0x3c5   : > { %v4983_v49 = vadd.f32 %v4982_v5, %v4882_v31 }
 0x3c6   : > { %v4984_v6 = vpop.f32.mrf.mxu1  ;;  %v7973_v20 = vpop.f32.mrf.mxu0 }
 0x3c7   : > { %6047 = vtanh.f32 %v4983_v49  ;;  %v4985_v52 = vadd.f32 %v4984_v6, %v4884_v15  ;;  %v6036_v30 = vpop.eup %6035 }
 0x3c8   : > { %v5693_v41 = vmul.f32 %v6036_v30, %v8348_v46 }
 0x3c9   : > { %6049 = vtanh.f32 %v4985_v52  ;;  %v6038_v18 = vpop.eup %6037 }
 0x3ca   : > { %v7975_v51 = vpop.f32.mrf.mxu0  ;;  %v7977_v11 = vpop.f32.mrf.mxu1  ;;  %v5694_v47 = vmul.f32 %v6038_v18, %v8348_v46 }
 0x3cb   : > { %v6040_v36 = vpop.eup %6039 }
 0x3cc   : > { %v5697_v4 = vmul.f32 %v6040_v36, %v8349_v57  ;;  %v7981_v50 = vpop.f32.mrf.mxu0  ;;  %v7983_v3 = vpop.f32.mrf.mxu1 }
 0x3cd   : > { %v6042_v44 = vpop.eup %6041 }
 0x3ce   : > { %v5709_v54 = vadd.f32 %v5697_v4, %v5693_v41  ;;  %v5698_v61 = vmul.f32 %v6042_v44, %v8349_v57  ;;  %v7987_v55 = vpop.f32.mrf.mxu0 }
 0x3cf   : > { %v6044_v34 = vpop.eup %6043  ;;  %v5218_v62 = vpop.f32.mrf.mxu1 }
 0x3d0   : > { %v5718_v7 = vadd.f32 %v5698_v61, %v5694_v47  ;;  %v5701_v53 = vmul.f32 %v6044_v34, %v8350_v37  ;;  %v7990_v25 = vpop.f32.mrf.mxu0  ;;  %v5067_v34 = vadd.f32 %v7967_v16, %v8344_v60  ;;  %v5080_v16 = vadd.f32 %v7973_v20, %v8345_v63 }
 0x3d1   : > { %v6046_v28 = vpop.eup %6045  ;;  %v5220_v27 = vpop.f32.mrf.mxu1 }
 0x3d2   : > { %v5710_v12 = vadd.f32 %v5709_v54, %v5701_v53  ;;  %v5702_v19 = vmul.f32 %v6046_v28, %v8350_v37  ;;  %v5321_v42 = vpop.f32.mrf.mxu0  ;;  %v5078_v53 = vadd.f32 %v7971_v13, %v8345_v63  ;;  %v5091_v63 = vadd.f32 %v7981_v50, %v8346_v33 }
 0x3d3   : > { %v5225_v2 = vpop.f32.mrf.mxu1 }
 0x3d4   : > { %v6048_v21 = vpop.eup %6047  ;;  %v5719_v14 = vadd.f32 %v5718_v7, %v5702_v19  ;;  %v5323_v56 = vpop.f32.mrf.mxu0 }
 0x3d5   : > { %v5705_v48 = vmul.f32 %v6048_v21, %v8351_v38  ;;  %v7994_v22 = vpop.f32.mrf.mxu1 }
 0x3d6   : > { %v6050_v1 = vpop.eup %6049 }
 0x3d7   : > { %v5711_v35 = vadd.f32 %v5710_v12, %v5705_v48  ;;  %v5706_v10 = vmul.f32 %v6050_v1, %v8351_v38  ;;  %v7997_v23 = vpop.f32.mrf.mxu1  ;;  %v5329_v45 = vpop.f32.mrf.mxu0  ;;  %v8352_v12 = vld [vmem:[#allocation19_spill] sm:$0xff]  ;;  %v5212_v48 = vadd.f32 %v7977_v11, %v5067_v34 }
 0x3d9   : > { %v5712_v40 = vrot.slane %v5711_v35, 4  ;;  %v5720_v32 = vadd.f32 %v5719_v14, %v5706_v10  ;;  %v7999_v0 = vpop.f32.mrf.mxu1  ;;  %v5331_v24 = vpop.f32.mrf.mxu0  ;;  %v5069_v14 = vadd.f32 %v7969_v43, %v8344_v60 }
 0x3db   : > { %v5713_v9 = vadd.f32 %v5712_v40, %v5711_v35  ;;  %v5721_v58 = vrot.slane %v5720_v32, 4  ;;  %v5337_v8 = vpop.f32.mrf.mxu0  ;;  %v5427_v39 = vpop.f32.mrf.mxu1  ;;  %v5219_v35 = vadd.f32 %v5218_v62, %v5078_v53  ;;  %v5214_v40 = vadd.f32 %v7983_v3, %v5069_v14 }
 0x3dc   : > { %v5100_v3 = vadd.f32 %v7987_v55, %v8347_v29 }
 0x3dd   : > { %v5714_v59 = vrot.slane %v5713_v9, 2  ;;  %v5722_v26 = vadd.f32 %v5721_v58, %v5720_v32  ;;  %v5339_v17 = vpop.f32.mrf.mxu0  ;;  %v5429_v31 = vpop.f32.mrf.mxu1  ;;  %v5322_v32 = vadd.f32 %v5321_v42, %v5212_v48  ;;  %v5089_v58 = vadd.f32 %v7975_v51, %v8346_v33 }
 0x3de   : > { %v5330_v60 = vadd.f32 %v5329_v45, %v5219_v35  ;;  %v5324_v11 = vadd.f32 %v5323_v56, %v5214_v40  ;;  %v5228_v51 = vadd.f32 %v7994_v22, %v5091_v63  ;;  %v5233_v33 = vadd.f32 %v7997_v23, %v5100_v3 }
 0x3df   : > { %v5715_v5 = vadd.f32 %v5714_v59, %v5713_v9  ;;  %v5723_v15 = vrot.slane %v5722_v26, 2  ;;  %v5345_v49 = vpop.f32.mrf.mxu0  ;;  %v5221_v59 = vadd.f32 %v5220_v27, %v5080_v16  ;;  %v5226_v20 = vadd.f32 %v5225_v2, %v5089_v58 }
 0x3e0   : > { %v5436_v6 = vpop.f32.mrf.mxu1  ;;  %v5430_v42 = vadd.f32 %v5429_v31, %v5324_v11 }
 0x3e1   : > { %v5716_v52 = vrot.slane %v5715_v5, 1  ;;  %v5724_v30 = vadd.f32 %v5723_v15, %v5722_v26  ;;  %v5347_v18 = vpop.f32.mrf.mxu0  ;;  %v5428_v26 = vadd.f32 %v5427_v39, %v5322_v32  ;;  %v5332_v62 = vadd.f32 %v5331_v24, %v5221_v59 }
 0x3e2   : > { %v5438_v36 = vpop.f32.mrf.mxu1  ;;  %v5437_v15 = vadd.f32 %v5436_v6, %v5330_v60  ;;  %v5338_v27 = vadd.f32 %v5337_v8, %v5226_v20  ;;  %v5102_v39 = vadd.f32 %v7990_v25, %v8347_v29  ;;  %v5340_v6 = vadd.f32 %v5339_v17, %v5228_v51 }
 0x3e3   : > { %v5717_v41 = vadd.f32 %v5716_v52, %v5715_v5  ;;  %v5725_v4 = vrot.slane %v5724_v30, 1  ;;  %v5550_v44 = vpop.f32.mrf.mxu0  ;;  %v5439_v45 = vadd.f32 %v5438_v36, %v5332_v62 }
 0x3e4   : > { %v5445_v47 = vpop.f32.mrf.mxu1  ;;  %v5551_v52 = vadd.f32 %v5550_v44, %v5428_v26  ;;  %v5235_v44 = vadd.f32 %v7999_v0, %v5102_v39 }
 0x3e5   : > { %v5726_v54 = vadd.f32 %v5725_v4, %v5724_v30  ;;  %v5552_v61 = vpop.f32.mrf.mxu0  ;;  %v8006_v19 = vadd.f32 %v5717_v41, %v8352_v12  ;;  %v5446_v4 = vadd.f32 %v5445_v47, %v5338_v27 }
 0x3e6   : > { %v5447_v7 = vpop.f32.mrf.mxu1  ;;  %v5553_v50 = vadd.f32 %v5552_v61, %v5430_v42  ;;  %v5348_v29 = vadd.f32 %v5347_v18, %v5235_v44  ;;  %v8353_v44 = vld [vmem:[#allocation20_spill] sm:$0xff] }
 0x3e7   : > { %v5557_v28 = vpop.f32.mrf.mxu0  ;;  %v8009_v21 = vadd.f32 %v5726_v54, %v8352_v12  ;;  %v5346_v54 = vadd.f32 %v5345_v49, %v5233_v33  ;;  %v5448_v36 = vadd.f32 %v5447_v7, %v5340_v6 }
 0x3e8   : > { %v5454_v1 = vpop.f32.mrf.mxu1  ;;  %v5558_v56 = vadd.f32 %v5557_v28, %v5437_v15 }
 0x3e9   : > { %v5559_v10 = vpop.f32.mrf.mxu0  ;;  %v5753_v13 = vcombine.low %v8006_v19, %v8009_v21  ;;  %v5455_v23 = vadd.f32 %v5454_v1, %v5346_v54 }
 0x3ea   : > { %v5456_v9 = vpop.f32.mrf.mxu1  ;;  %v5560_v55 = vadd.f32 %v5559_v10, %v5439_v45 }
 0x3eb   : > { %v5564_v43 = vpop.f32.mrf.mxu0  ;;  %v5457_v48 = vadd.f32 %v5456_v9, %v5348_v29  ;;  %v5761_v54 = vrot.slane %v5753_v13, %v8353_v44 }
 0x3ec   : > { %v5651_v5 = vpop.f32.mrf.mxu1  ;;  %v5565_v53 = vadd.f32 %v5564_v43, %v5446_v4 }
 0x3ed   : > { %v5566_v30 = vpop.f32.mrf.mxu0  ;;  %v5652_v2 = vadd.f32 %v5651_v5, %v5551_v52 }
 0x3ee   : > { %v5653_v41 = vpop.f32.mrf.mxu1  ;;  %v5567_v61 = vadd.f32 %v5566_v30, %v5448_v36 }
 0x3ef   : > { %v5654_v34 = vadd.f32 %v5653_v41, %v5553_v50  ;;  %v5571_v22 = vpop.f32.mrf.mxu0 }
 0x3f0   : > { %v5658_v24 = vpop.f32.mrf.mxu1  ;;  %v5572_v0 = vadd.f32 %v5571_v22, %v5455_v23 }
 0x3f1   : > { %v5659_v31 = vadd.f32 %v5658_v24, %v5558_v56  ;;  %v5573_v47 = vpop.f32.mrf.mxu0 }
 0x3f2   : > { %v5660_v8 = vpop.f32.mrf.mxu1  ;;  %v5574_v35 = vadd.f32 %v5573_v47, %v5457_v48 }
 0x3f3   : > { %6051 = vtanh.f32 %v5659_v31  ;;  %v5661_v28 = vadd.f32 %v5660_v8, %v5560_v55 }
 0x3f4   : > { %6053 = vtanh.f32 %v5652_v2  ;;  %v5665_v25 = vpop.f32.mrf.mxu1 }
 0x3f5   : > { %6055 = vtanh.f32 %v5661_v28  ;;  %v5666_v17 = vadd.f32 %v5665_v25, %v5565_v53 }
 0x3f6   : > { %6057 = vtanh.f32 %v5654_v34  ;;  %v5667_v14 = vpop.f32.mrf.mxu1 }
 0x3f7   : > { %6059 = vtanh.f32 %v5666_v17  ;;  %v5668_v49 = vadd.f32 %v5667_v14, %v5567_v61 }
 0x3f8   : > { %v5672_v16 = vpop.f32.mrf.mxu1 }
 0x3f9   : > { %6061 = vtanh.f32 %v5668_v49  ;;  %v5673_v7 = vadd.f32 %v5672_v16, %v5572_v0 }
 0x3fa   : > { %v5674_v10 = vpop.f32.mrf.mxu1 }
 0x3fb   : > { %6063 = vtanh.f32 %v5673_v7  ;;  %v5675_v18 = vadd.f32 %v5674_v10, %v5574_v35 }
 0x3fd   : > { %6065 = vtanh.f32 %v5675_v18 }
 0x400   : > { %v6052_v40 = vpop.eup %6051 }
 0x401   : > { %v6054_v1 = vpop.eup %6053  ;;  %v5699_v59 = vmul.f32 %v6052_v40, %v8349_v57 }
 0x402   : > { %v6056_v32 = vpop.eup %6055  ;;  %v5695_v9 = vmul.f32 %v6054_v1, %v8348_v46 }
 0x403   : > { %v6058_v58 = vpop.eup %6057  ;;  %v5700_v43 = vmul.f32 %v6056_v32, %v8349_v57 }
 0x404   : > { %v6060_v60 = vpop.eup %6059  ;;  %v5696_v5 = vmul.f32 %v6058_v58, %v8348_v46  ;;  %v5727_v63 = vadd.f32 %v5699_v59, %v5695_v9 }
 0x405   : > { %v5703_v11 = vmul.f32 %v6060_v60, %v8350_v37 }
 0x406   : > { %v6062_v26 = vpop.eup %6061  ;;  %v5736_v15 = vadd.f32 %v5700_v43, %v5696_v5 }
 0x407   : > { %v5704_v20 = vmul.f32 %v6062_v26, %v8350_v37  ;;  %v5728_v3 = vadd.f32 %v5727_v63, %v5703_v11 }
 0x408   : > { %v6064_v62 = vpop.eup %6063 }
 0x409   : > { %v5707_v42 = vmul.f32 %v6064_v62, %v8351_v38  ;;  %v5737_v30 = vadd.f32 %v5736_v15, %v5704_v20 }
 0x40a   : > { %v6066_v52 = vpop.eup %6065 }
 0x40b   : > { %v5729_v41 = vadd.f32 %v5728_v3, %v5707_v42  ;;  %v5708_v51 = vmul.f32 %v6066_v52, %v8351_v38 }
 0x40d   : > { %v5730_v27 = vrot.slane %v5729_v41, 4  ;;  %v5738_v57 = vadd.f32 %v5737_v30, %v5708_v51 }
 0x40f   : > { %v5731_v45 = vadd.f32 %v5730_v27, %v5729_v41  ;;  %v5739_v56 = vrot.slane %v5738_v57, 4 }
 0x411   : > { %v5732_v46 = vrot.slane %v5731_v45, 2  ;;  %v5740_v39 = vadd.f32 %v5739_v56, %v5738_v57 }
 0x413   : > { %v5733_v33 = vadd.f32 %v5732_v46, %v5731_v45  ;;  %v5741_v37 = vrot.slane %v5740_v39, 2 }
 0x415   : > { %v5734_v50 = vrot.slane %v5733_v33, 1  ;;  %v5742_v2 = vadd.f32 %v5741_v37, %v5740_v39 }
 0x417   : > { %v5735_v24 = vadd.f32 %v5734_v50, %v5733_v33  ;;  %v5743_v6 = vrot.slane %v5742_v2, 1 }
 0x419   : > { %v5744_v4 = vadd.f32 %v5743_v6, %v5742_v2  ;;  %v5747_v38 = vadd.f32 %v5735_v24, %v8352_v12 }
 0x41b   : > { %v5748_v55 = vadd.f32 %v5744_v4, %v8352_v12 }
 0x41d   : > { %v5754_v31 = vcombine.low %v5747_v38, %v5748_v55 }
 0x41f   : > { %v5768_v34 = vrot.slane %v5754_v31, %v8353_v44 }
 0x421   : > { %v5769_v22 = vcombine.low %v5761_v54, %v5768_v34 }
 0x423   : > { %v5776_v8 = vrot.slane %v5769_v22, %v8353_v44 }
 0x425   : > { %5876 = vst.msk [vmem:[%s7500_s22 + $0x4] sm:$0xf] %vm7454_vm3, %v5776_v8 }
 0x426   : > { %6108 = shalt.err (!%p6105_p10)
}
 0x427   : > { %s6109_s23 = scalar_lea.hbm %s5793_s5, 128  ;;  %s6113_s11 = scalar_lea.hbm %s8088_s3, 256 }
 0x428   : > { %p6110_p2 = scmp.ne.s32.totalorder %s5793_s5, %s6109_s23  ;;  %p6114_p7 = scmp.lt.s32.totalorder %s5793_s5, %s8088_s3 }
 0x429   : > { %p6115_p0 = scmp.lt.s32.totalorder %s6113_s11, %s6109_s23 }
 0x42a   : > { %p6111_p4 = pnand %p6110_p2, %p8355_p12 }
 0x42b   : > { %p6116_p6 = por %p6115_p0, %p6114_p7 }
 0x42c   : > { %p6112_p9 = pneg %p6111_p4 }
 0x42e   : > { %p6117_p11 = pnand %p6116_p6, %p6112_p9 }
 0x430   : > { %6120 = shalt.err (!%p6117_p11)
}
 0x431   : > { %5886 = dma.vmem_to_hbm [thread:$0]  (%p8355_p12), %s5796_s27, 128, %s5793_s5, %s5781_s4  }
 0x432 PF: > { %s5807_s20 = sand.u32 1, %s6147_s12   ;;  %p8356_p13 = scmp.ne.s32.totalorder %s8201_s25, 0 }
 0x433   : > { %p8357_p1 = scmp.ge.s32.totalorder %s6159_s15, 2  ;;  %s5808_s9 = scalar_lea.sflag [#allocation4], %s5807_s20 }
 0x435   : > { %p5893_p3 = pnand %p8357_p1, %p8356_p13 }
 0x437   : > { %p5894_p5 = pneg %p5893_p3 }
 0x439   : > { %6142 = dma.done.wait (%p5894_p5), %s5808_s9, 128  }
 0x43a   : > { %6144 = vsyncadd (%p5894_p5), %s5808_s9, 4294967168  ;;  %p16_p8 = scmp.ge.s32.totalorder %s6211_s18, 4   ;;  %s8358_s12 = smov %s6151_s13 }
 0x43b   : > { %s8359_s13 = smov %s6155_s14  ;;  %s8360_s14 = smov %s6223_s21 }
 0x43c   : > { %s8361_s15 = smov %s6211_s18  ;;  %18 = sbr.rel (!%p16_p8) target bundleno = 5 (0x5), region = 79 }
 0x441   :  { %5813 = vsyncpa [#allocation3], 1 }
 0x442   :  { %5815 = vsyncpa [#allocation3 + $0x1], 1 }
 0x443   :  { %5816 = vsyncpa [#allocation4], 1 }
 0x444   :  { %5818 = vsyncpa [#allocation4 + $0x1], 1 }

</bundles_post_ra>
